<compile_context>
chip_gen: v7x
topology: tpu7x:2x2x1
jax: 0.10.0
libtpu: 0.0.40
codegen_flags: <defaults>
</compile_context>

<pallas_src>
import functools

import jax
import jax.numpy as jnp
import numpy as np
from jax.experimental import pallas as pl
from jax.experimental.pallas import tpu as pltpu


def _replicate_pad_hw(x):
    """(R, C, ch) -> (R+2, C+2, ch), edge replication (padding_mode='replicate')."""
    x = jnp.concatenate([x[:1], x, x[-1:]], axis=0)
    x = jnp.concatenate([x[:, :1], x, x[:, -1:]], axis=1)
    return x


def _im2col_3x3(xp, rows, cols):
    """(rows+2, cols+2, ch) -> (rows*cols, 9*ch); taps ordered (dy, dx), channel-minor."""
    ch = xp.shape[-1]
    taps = [xp[dy:dy + rows, dx:dx + cols, :] for dy in range(3) for dx in range(3)]
    return jnp.concatenate(taps, axis=2).reshape(rows * cols, 9 * ch)


def _unet_block_kernel(x_ref, w1_ref, b1_ref, w2_ref, b2_ref, o_ref, y1p_ref,
                       *, H, W, Cout, tH):
    """Fused (conv3x3+BN+LeakyReLU) x2 for one batch element / one row tile.

    x_ref  : (1, H, W, Cin)          bf16 input (full image, fetched once per b)
    w1_ref : (9*Cin,  Cout)          bf16 folded conv1+BN1 weights
    b1_ref : (1, Cout)               f32  folded conv1+BN1 bias
    w2_ref : (9*Cout, Cout)          bf16 folded conv2+BN2 weights
    b2_ref : (1, Cout)               f32  folded conv2+BN2 bias
    o_ref  : (1, Cout, tH*W)         f32  NCHW-flat output tile (lane-dense)
    y1p_ref: (H+2, W+2, Cout)        bf16 scratch: replicate-padded stage-1 output
    """
    t = pl.program_id(1)

    # ---- stage 1: conv1 + BN1 + LeakyReLU over the full image, once per batch
    # element (t == 0).  Result stays in VMEM scratch, already replicate-padded
    # for stage 2 -- it never touches HBM.
    @pl.when(t == 0)
    def _stage1():
        x = x_ref[0]                                    # (H, W, Cin) bf16
        xp = _replicate_pad_hw(x)                       # (H+2, W+2, Cin)
        patch = _im2col_3x3(xp, H, W)                   # (H*W, 9*Cin)
        y1 = jnp.dot(patch, w1_ref[...],                # single MXU matmul, K=9*Cin
                     preferred_element_type=jnp.float32)
        y1 = y1 + b1_ref[...]                           # folded conv bias + BN
        y1 = jnp.where(y1 >= 0, y1, 0.2 * y1)           # LeakyReLU(0.2)
        y1 = y1.astype(y1p_ref.dtype).reshape(H, W, Cout)
        y1p_ref[...] = _replicate_pad_hw(y1)            # (H+2, W+2, Cout)

    # ---- stage 2: conv2 + BN2 + LeakyReLU for this row tile.
    rs = pl.multiple_of(t * tH, tH)                     # first padded row of the tile
    slab = y1p_ref[pl.ds(rs, tH + 2)]                   # (tH+2, W+2, Cout) bf16
    patch2 = _im2col_3x3(slab, tH, W)                   # (tH*W, 9*Cout)
    y2 = jnp.dot(patch2, w2_ref[...],                   # single MXU matmul, K=9*Cout
                 preferred_element_type=jnp.float32)
    y2 = y2 + b2_ref[...]
    y2 = jnp.where(y2 >= 0, y2, 0.2 * y2)
    # Dropout(p=0.5) is identity in eval mode.
    # Transpose -> (Cout, tH*W): last (lane) dim is a multiple of 128, so the
    # store is unmasked/lane-dense and the result is already NCHW-flat.
    o_ref[0] = jnp.transpose(y2).astype(o_ref.dtype)


def _fold_conv_bn(w_oihw, conv_b, gamma, beta, run_mean, run_var, eps=1e-5):
    """Fold inference-mode BatchNorm into conv weights/bias (f32 math, bf16 weights)."""
    scale = gamma / jnp.sqrt(run_var + eps)                 # (Cout,)
    bias = beta - run_mean * scale + conv_b * scale         # (Cout,)
    # (Cout, Cin, kh, kw) -> (kh, kw, Cin, Cout); row order of the reshape is
    # (dy*3 + dx)*Cin + cin, matching _im2col_3x3's tap/channel ordering.
    w = jnp.transpose(w_oihw, (2, 3, 1, 0)) * scale[None, None, None, :]
    kh, kw, cin, cout = w.shape
    return (w.reshape(kh * kw * cin, cout).astype(jnp.bfloat16),
            bias.reshape(1, cout).astype(jnp.float32))


def unet_conv_block(x_nchw, p):
    """Forward of UNetConvBlock (inference mode). Input/output are NCHW f32."""
    B, Cin, H, W = x_nchw.shape
    Cout = p["w1"].shape[0]

    # Row-tile height: keep (tH*W) a multiple of 128 so output stores are
    # lane-dense; otherwise fall back to a single tile per batch element.
    tH = 8 if (H % 8 == 0 and (8 * W) % 128 == 0) else H
    nT = H // tH

    w1, b1 = _fold_conv_bn(p["w1"], p["b1"], p["g1"], p["be1"], p["m1"], p["v1"])
    w2, b2 = _fold_conv_bn(p["w2"], p["b2"], p["g2"], p["be2"], p["m2"], p["v2"])

    # NCHW -> NHWC and bf16 activations (f32 accumulation happens on the MXU).
    x = jnp.transpose(x_nchw, (0, 2, 3, 1)).astype(jnp.bfloat16)

    kernel = functools.partial(_unet_block_kernel, H=H, W=W, Cout=Cout, tH=tH)

    flops = 2 * B * H * W * 9 * (Cin + Cout) * Cout
    bytes_accessed = (B * H * W * Cin * 2            # bf16 input
                      + 9 * Cin * Cout * 2 + 9 * Cout * Cout * 2
                      + 2 * Cout * 4                 # biases
                      + B * Cout * H * W * 4)        # f32 output

    out = pl.pallas_call(
        kernel,
        out_shape=jax.ShapeDtypeStruct((B, Cout, H * W), jnp.float32),
        grid_spec=pltpu.PrefetchScalarGridSpec(
            num_scalar_prefetch=0,
            grid=(B, nT),
            in_specs=[
                # Full image per batch element; the block index is t-invariant,
                # so Pallas DMAs it exactly once per batch element.
                pl.BlockSpec((1, H, W, Cin), lambda b, t: (b, 0, 0, 0)),
                # Folded weights/biases: constant block index -> fetched once,
                # resident across the whole grid.
                pl.BlockSpec((9 * Cin, Cout), lambda b, t: (0, 0)),
                pl.BlockSpec((1, Cout), lambda b, t: (0, 0)),
                pl.BlockSpec((9 * Cout, Cout), lambda b, t: (0, 0)),
                pl.BlockSpec((1, Cout), lambda b, t: (0, 0)),
            ],
            out_specs=pl.BlockSpec((1, Cout, tH * W), lambda b, t: (b, 0, t)),
            scratch_shapes=[pltpu.VMEM((H + 2, W + 2, Cout), jnp.bfloat16)],
        ),
        compiler_params=pltpu.CompilerParams(
            # Batch axis is "parallel" (v7x 2-TC megacore shards it); the
            # row-tile axis must be "arbitrary" because the stage-1 result in
            # scratch is produced at t==0 and reused by later tiles.
            dimension_semantics=("parallel", "arbitrary"),
            # <= physical VMEM on every generation (v7x: 64 MiB); actual usage
            # at these shapes is well under 1 MiB per buffer.
            vmem_limit_bytes=64 * 1024 * 1024,
        ),
        cost_estimate=pl.CostEstimate(flops=flops, transcendentals=0,
                                      bytes_accessed=bytes_accessed),
    )(x, w1, b1, w2, b2)

    # Kernel output is already NCHW-flat: just unflatten the spatial dims.
    return out.reshape(B, Cout, H, W)


def init_params(key, in_size, out_size):
    ks = jax.random.split(key, 8)

    def kaiming_normal(k, shape):
        # torch.nn.init.kaiming_normal_ default: fan_in, leaky_relu a=0 -> gain sqrt(2)
        fan_in = shape[1] * shape[2] * shape[3]
        std = np.sqrt(2.0 / fan_in)
        return std * jax.random.normal(k, shape, dtype=jnp.float32)

    def conv_bias(k, fan_in, cout):
        bound = 1.0 / np.sqrt(fan_in)
        return jax.random.uniform(k, (cout,), jnp.float32, -bound, bound)

    p = {}
    p["w1"] = kaiming_normal(ks[0], (out_size, in_size, 3, 3))
    p["b1"] = conv_bias(ks[1], in_size * 9, out_size)
    p["w2"] = kaiming_normal(ks[2], (out_size, out_size, 3, 3))
    p["b2"] = conv_bias(ks[3], out_size * 9, out_size)
    # BN params / running stats (non-trivial, to exercise the folding)
    p["g1"] = 1.0 + 0.1 * jax.random.normal(ks[4], (out_size,), jnp.float32)
    p["be1"] = 0.1 * jax.random.normal(ks[5], (out_size,), jnp.float32)
    p["m1"] = 0.05 * jax.random.normal(ks[6], (out_size,), jnp.float32)
    p["v1"] = jnp.abs(1.0 + 0.1 * jax.random.normal(ks[7], (out_size,), jnp.float32))
    p["g2"] = jnp.ones((out_size,), jnp.float32)
    p["be2"] = jnp.zeros((out_size,), jnp.float32)
    p["m2"] = jnp.zeros((out_size,), jnp.float32)
    p["v2"] = jnp.ones((out_size,), jnp.float32)
    return p


# ---------------- pure-JAX f32 reference (module semantics) ----------------
def _ref_block(x_nchw, p):
    def conv_bn_lrelu_ref(x, w, b, g, be, m, v):
        xp = jnp.pad(x, ((0, 0), (0, 0), (1, 1), (1, 1)), mode="edge")
        y = jax.lax.conv_general_dilated(
            xp, w, window_strides=(1, 1), padding="VALID",
            dimension_numbers=("NCHW", "OIHW", "NCHW"),
        ) + b[None, :, None, None]
        scale = g / jnp.sqrt(v + 1e-5)
        y = (y - m[None, :, None, None]) * scale[None, :, None, None] \
            + be[None, :, None, None]
        return jnp.where(y >= 0, y, 0.2 * y)

    out = conv_bn_lrelu_ref(x_nchw, p["w1"], p["b1"], p["g1"], p["be1"], p["m1"], p["v1"])
    out = conv_bn_lrelu_ref(out, p["w2"], p["b2"], p["g2"], p["be2"], p["m2"], p["v2"])
    return out


if __name__ == "__main__":
    key = jax.random.PRNGKey(0)
    k_x, k_p = jax.random.split(key)

    B, Cin, Cout, H, W = 2, 4, 8, 16, 16
    x = jax.random.normal(k_x, (B, Cin, H, W), dtype=jnp.float32)
    params = init_params(k_p, Cin, Cout)

    out = jax.jit(unet_conv_block)(x, params)
    out = jax.block_until_ready(out)

    ref = _ref_block(x, params)
    # bf16 activations/weights (f32 accumulation) vs. a pure-f32 reference.
    np.testing.assert_allclose(np.asarray(out), np.asarray(ref), rtol=5e-2, atol=2e-1)

    assert out.shape == (B, Cout, H, W)
    print("KERNEL_OK")
</pallas_src>

<mosaic_0001>
module attributes {stable_mosaic.version = 11 : i64} {
  func.func @_unet_block_kernel(%arg0: i32, %arg1: i32, %arg2: memref<1x16x16x4xbf16, #tpu.memory_space<vmem>>, %arg3: memref<36x8xbf16, #tpu.memory_space<vmem>>, %arg4: memref<1x8xf32, #tpu.memory_space<vmem>>, %arg5: memref<72x8xbf16, #tpu.memory_space<vmem>>, %arg6: memref<1x8xf32, #tpu.memory_space<vmem>>, %arg7: memref<1x8x128xf32, #tpu.memory_space<vmem>>, %arg8: memref<18x18x8xbf16, #tpu.memory_space<vmem>>) attributes {dimension_semantics = [#tpu.dimension_semantics<parallel>, #tpu.dimension_semantics<arbitrary>], iteration_bounds = array<i64: 2, 2>, scalar_prefetch = 0 : i64, scratch_operands = 1 : i64, tpu.core_type = #tpu.core_type<tc>, window_params = [{transform_indices = @transform_0, window_bounds = array<i64: 1, 16, 16, 4>}, {pipeline_mode = #tpu.pipeline_mode<synchronous>, transform_indices = @transform_1, window_bounds = array<i64: 36, 8>}, {pipeline_mode = #tpu.pipeline_mode<synchronous>, transform_indices = @transform_2, window_bounds = array<i64: 1, 8>}, {pipeline_mode = #tpu.pipeline_mode<synchronous>, transform_indices = @transform_3, window_bounds = array<i64: 72, 8>}, {pipeline_mode = #tpu.pipeline_mode<synchronous>, transform_indices = @transform_4, window_bounds = array<i64: 1, 8>}, {transform_indices = @transform_5, window_bounds = array<i64: 1, 8, 128>}]} {
    %c0_i32 = arith.constant 0 : i32
    %0 = arith.cmpi eq, %arg1, %c0_i32 : i32
    %1 = arith.extui %0 : i1 to i32
    %c0_i32_0 = arith.constant 0 : i32
    %2 = arith.cmpi ne, %1, %c0_i32_0 : i32
    scf.if %2 {
      %c0_11 = arith.constant 0 : index
      %c0_12 = arith.constant 0 : index
      %c0_13 = arith.constant 0 : index
      %c0_14 = arith.constant 0 : index
      %32 = vector.load %arg2[%c0_11, %c0_12, %c0_13, %c0_14] : memref<1x16x16x4xbf16, #tpu.memory_space<vmem>>, vector<1x16x16x4xbf16>
      %33 = vector.shape_cast %32 : vector<1x16x16x4xbf16> to vector<16x16x4xbf16>
      %34 = vector.extract_strided_slice %33 {offsets = [0, 0, 0], sizes = [1, 16, 4], strides = [1, 1, 1]} : vector<16x16x4xbf16> to vector<1x16x4xbf16>
      %35 = vector.extract_strided_slice %33 {offsets = [15, 0, 0], sizes = [1, 16, 4], strides = [1, 1, 1]} : vector<16x16x4xbf16> to vector<1x16x4xbf16>
      %36 = tpu.concatenate %34, %33, %35 in 0 : vector<1x16x4xbf16>, vector<16x16x4xbf16>, vector<1x16x4xbf16> -> vector<18x16x4xbf16>
      %37 = vector.extract_strided_slice %36 {offsets = [0, 0, 0], sizes = [18, 1, 4], strides = [1, 1, 1]} : vector<18x16x4xbf16> to vector<18x1x4xbf16>
      %38 = vector.extract_strided_slice %36 {offsets = [0, 15, 0], sizes = [18, 1, 4], strides = [1, 1, 1]} : vector<18x16x4xbf16> to vector<18x1x4xbf16>
      %39 = tpu.concatenate %37, %36, %38 in 1 : vector<18x1x4xbf16>, vector<18x16x4xbf16>, vector<18x1x4xbf16> -> vector<18x18x4xbf16>
      %40 = vector.extract_strided_slice %39 {offsets = [0, 0, 0], sizes = [16, 16, 4], strides = [1, 1, 1]} : vector<18x18x4xbf16> to vector<16x16x4xbf16>
      %41 = vector.extract_strided_slice %39 {offsets = [0, 1, 0], sizes = [16, 16, 4], strides = [1, 1, 1]} : vector<18x18x4xbf16> to vector<16x16x4xbf16>
      %42 = vector.extract_strided_slice %39 {offsets = [0, 2, 0], sizes = [16, 16, 4], strides = [1, 1, 1]} : vector<18x18x4xbf16> to vector<16x16x4xbf16>
      %43 = vector.extract_strided_slice %39 {offsets = [1, 0, 0], sizes = [16, 16, 4], strides = [1, 1, 1]} : vector<18x18x4xbf16> to vector<16x16x4xbf16>
      %44 = vector.extract_strided_slice %39 {offsets = [1, 1, 0], sizes = [16, 16, 4], strides = [1, 1, 1]} : vector<18x18x4xbf16> to vector<16x16x4xbf16>
      %45 = vector.extract_strided_slice %39 {offsets = [1, 2, 0], sizes = [16, 16, 4], strides = [1, 1, 1]} : vector<18x18x4xbf16> to vector<16x16x4xbf16>
      %46 = vector.extract_strided_slice %39 {offsets = [2, 0, 0], sizes = [16, 16, 4], strides = [1, 1, 1]} : vector<18x18x4xbf16> to vector<16x16x4xbf16>
      %47 = vector.extract_strided_slice %39 {offsets = [2, 1, 0], sizes = [16, 16, 4], strides = [1, 1, 1]} : vector<18x18x4xbf16> to vector<16x16x4xbf16>
      %48 = vector.extract_strided_slice %39 {offsets = [2, 2, 0], sizes = [16, 16, 4], strides = [1, 1, 1]} : vector<18x18x4xbf16> to vector<16x16x4xbf16>
      %49 = tpu.concatenate %40, %41, %42, %43, %44, %45, %46, %47, %48 in 2 : vector<16x16x4xbf16>, vector<16x16x4xbf16>, vector<16x16x4xbf16>, vector<16x16x4xbf16>, vector<16x16x4xbf16>, vector<16x16x4xbf16>, vector<16x16x4xbf16>, vector<16x16x4xbf16>, vector<16x16x4xbf16> -> vector<16x16x36xbf16>
      %50 = vector.shape_cast %49 : vector<16x16x36xbf16> to vector<256x36xbf16>
      %c0_15 = arith.constant 0 : index
      %c0_16 = arith.constant 0 : index
      %51 = vector.load %arg3[%c0_15, %c0_16] : memref<36x8xbf16, #tpu.memory_space<vmem>>, vector<36x8xbf16>
      %cst_17 = arith.constant dense<0.000000e+00> : vector<256x8xf32>
      %52 = tpu.matmul %50, %51, %cst_17 {dimension_numbers = #tpu.dot_dimension_numbers<[1], [0], [0], [1], [0, 0, 1, 1], [], []>} : vector<256x36xbf16>, vector<36x8xbf16>, vector<256x8xf32> -> vector<256x8xf32>
      %c0_18 = arith.constant 0 : index
      %c0_19 = arith.constant 0 : index
      %53 = vector.load %arg4[%c0_18, %c0_19] : memref<1x8xf32, #tpu.memory_space<vmem>>, vector<1x8xf32>
      %54 = vector.broadcast %53 : vector<1x8xf32> to vector<256x8xf32>
      %55 = arith.addf %52, %54 : vector<256x8xf32>
      %cst_20 = arith.constant 0.000000e+00 : f32
      %56 = vector.broadcast %cst_20 : f32 to vector<256x8xf32>
      %57 = arith.cmpf oge, %55, %56 : vector<256x8xf32>
      %cst_21 = arith.constant 2.000000e-01 : f32
      %58 = vector.broadcast %cst_21 : f32 to vector<256x8xf32>
      %59 = arith.mulf %58, %55 : vector<256x8xf32>
      %60 = arith.select %57, %55, %59 : vector<256x8xi1>, vector<256x8xf32>
      %61 = arith.truncf %60 : vector<256x8xf32> to vector<256x8xbf16>
      %62 = vector.shape_cast %61 : vector<256x8xbf16> to vector<16x16x8xbf16>
      %63 = vector.extract_strided_slice %62 {offsets = [0, 0, 0], sizes = [1, 16, 8], strides = [1, 1, 1]} : vector<16x16x8xbf16> to vector<1x16x8xbf16>
      %64 = vector.extract_strided_slice %62 {offsets = [15, 0, 0], sizes = [1, 16, 8], strides = [1, 1, 1]} : vector<16x16x8xbf16> to vector<1x16x8xbf16>
      %65 = tpu.concatenate %63, %62, %64 in 0 : vector<1x16x8xbf16>, vector<16x16x8xbf16>, vector<1x16x8xbf16> -> vector<18x16x8xbf16>
      %66 = vector.extract_strided_slice %65 {offsets = [0, 0, 0], sizes = [18, 1, 8], strides = [1, 1, 1]} : vector<18x16x8xbf16> to vector<18x1x8xbf16>
      %67 = vector.extract_strided_slice %65 {offsets = [0, 15, 0], sizes = [18, 1, 8], strides = [1, 1, 1]} : vector<18x16x8xbf16> to vector<18x1x8xbf16>
      %68 = tpu.concatenate %66, %65, %67 in 1 : vector<18x1x8xbf16>, vector<18x16x8xbf16>, vector<18x1x8xbf16> -> vector<18x18x8xbf16>
      %c0_22 = arith.constant 0 : index
      %c0_23 = arith.constant 0 : index
      %c0_24 = arith.constant 0 : index
      %69 = vector.load %arg8[%c0_22, %c0_23, %c0_24] : memref<18x18x8xbf16, #tpu.memory_space<vmem>>, vector<18x18x8xbf16>
      tpu.vector_store %arg8[%c0_22, %c0_23, %c0_24], %68 {strides = array<i32>} : memref<18x18x8xbf16, #tpu.memory_space<vmem>>, vector<18x18x8xbf16>,
    } else {
    }
    %c8_i32 = arith.constant 8 : i32
    %3 = arith.muli %arg1, %c8_i32 : i32
    %4 = tpu.assume_multiple %3, 8 : i32
    %5 = arith.index_cast %4 : i32 to index
    %c0 = arith.constant 0 : index
    %c0_1 = arith.constant 0 : index
    %6 = vector.load %arg8[%5, %c0, %c0_1] : memref<18x18x8xbf16, #tpu.memory_space<vmem>>, vector<10x18x8xbf16>
    %7 = vector.extract_strided_slice %6 {offsets = [0, 0, 0], sizes = [8, 16, 8], strides = [1, 1, 1]} : vector<10x18x8xbf16> to vector<8x16x8xbf16>
    %8 = vector.extract_strided_slice %6 {offsets = [0, 1, 0], sizes = [8, 16, 8], strides = [1, 1, 1]} : vector<10x18x8xbf16> to vector<8x16x8xbf16>
    %9 = vector.extract_strided_slice %6 {offsets = [0, 2, 0], sizes = [8, 16, 8], strides = [1, 1, 1]} : vector<10x18x8xbf16> to vector<8x16x8xbf16>
    %10 = vector.extract_strided_slice %6 {offsets = [1, 0, 0], sizes = [8, 16, 8], strides = [1, 1, 1]} : vector<10x18x8xbf16> to vector<8x16x8xbf16>
    %11 = vector.extract_strided_slice %6 {offsets = [1, 1, 0], sizes = [8, 16, 8], strides = [1, 1, 1]} : vector<10x18x8xbf16> to vector<8x16x8xbf16>
    %12 = vector.extract_strided_slice %6 {offsets = [1, 2, 0], sizes = [8, 16, 8], strides = [1, 1, 1]} : vector<10x18x8xbf16> to vector<8x16x8xbf16>
    %13 = vector.extract_strided_slice %6 {offsets = [2, 0, 0], sizes = [8, 16, 8], strides = [1, 1, 1]} : vector<10x18x8xbf16> to vector<8x16x8xbf16>
    %14 = vector.extract_strided_slice %6 {offsets = [2, 1, 0], sizes = [8, 16, 8], strides = [1, 1, 1]} : vector<10x18x8xbf16> to vector<8x16x8xbf16>
    %15 = vector.extract_strided_slice %6 {offsets = [2, 2, 0], sizes = [8, 16, 8], strides = [1, 1, 1]} : vector<10x18x8xbf16> to vector<8x16x8xbf16>
    %16 = tpu.concatenate %7, %8, %9, %10, %11, %12, %13, %14, %15 in 2 : vector<8x16x8xbf16>, vector<8x16x8xbf16>, vector<8x16x8xbf16>, vector<8x16x8xbf16>, vector<8x16x8xbf16>, vector<8x16x8xbf16>, vector<8x16x8xbf16>, vector<8x16x8xbf16>, vector<8x16x8xbf16> -> vector<8x16x72xbf16>
    %17 = vector.shape_cast %16 : vector<8x16x72xbf16> to vector<128x72xbf16>
    %c0_2 = arith.constant 0 : index
    %c0_3 = arith.constant 0 : index
    %18 = vector.load %arg5[%c0_2, %c0_3] : memref<72x8xbf16, #tpu.memory_space<vmem>>, vector<72x8xbf16>
    %cst = arith.constant dense<0.000000e+00> : vector<128x8xf32>
    %19 = tpu.matmul %17, %18, %cst {dimension_numbers = #tpu.dot_dimension_numbers<[1], [0], [0], [1], [0, 0, 1, 1], [], []>} : vector<128x72xbf16>, vector<72x8xbf16>, vector<128x8xf32> -> vector<128x8xf32>
    %c0_4 = arith.constant 0 : index
    %c0_5 = arith.constant 0 : index
    %20 = vector.load %arg6[%c0_4, %c0_5] : memref<1x8xf32, #tpu.memory_space<vmem>>, vector<1x8xf32>
    %21 = vector.broadcast %20 : vector<1x8xf32> to vector<128x8xf32>
    %22 = arith.addf %19, %21 : vector<128x8xf32>
    %cst_6 = arith.constant 0.000000e+00 : f32
    %23 = vector.broadcast %cst_6 : f32 to vector<128x8xf32>
    %24 = arith.cmpf oge, %22, %23 : vector<128x8xf32>
    %cst_7 = arith.constant 2.000000e-01 : f32
    %25 = vector.broadcast %cst_7 : f32 to vector<128x8xf32>
    %26 = arith.mulf %25, %22 : vector<128x8xf32>
    %27 = arith.select %24, %22, %26 : vector<128x8xi1>, vector<128x8xf32>
    %28 = tpu.transpose %27, [1, 0] : vector<128x8xf32> -> vector<8x128xf32>
    %c0_8 = arith.constant 0 : index
    %c0_9 = arith.constant 0 : index
    %c0_10 = arith.constant 0 : index
    %29 = vector.load %arg7[%c0_8, %c0_9, %c0_10] : memref<1x8x128xf32, #tpu.memory_space<vmem>>, vector<1x8x128xf32>
    %30 = vector.shape_cast %29 : vector<1x8x128xf32> to vector<8x128xf32>
    %31 = vector.shape_cast %28 : vector<8x128xf32> to vector<1x8x128xf32>
    tpu.vector_store %arg7[%c0_8, %c0_9, %c0_10], %31 {strides = array<i32>} : memref<1x8x128xf32, #tpu.memory_space<vmem>>, vector<1x8x128xf32>,
    return
  }
  func.func @transform_0(%arg0: i32, %arg1: i32) -> (i32, i32, i32, i32) {
    %c0_i32 = arith.constant 0 : i32
    %c0_i32_0 = arith.constant 0 : i32
    %c0_i32_1 = arith.constant 0 : i32
    %c0_i32_2 = arith.constant 0 : i32
    return %arg0, %c0_i32, %c0_i32_0, %c0_i32_1 : i32, i32, i32, i32
  }
  func.func @transform_1(%arg0: i32, %arg1: i32) -> (i32, i32) {
    %c0_i32 = arith.constant 0 : i32
    %c0_i32_0 = arith.constant 0 : i32
    %c0_i32_1 = arith.constant 0 : i32
    return %c0_i32, %c0_i32_0 : i32, i32
  }
  func.func @transform_2(%arg0: i32, %arg1: i32) -> (i32, i32) {
    %c0_i32 = arith.constant 0 : i32
    %c0_i32_0 = arith.constant 0 : i32
    %c0_i32_1 = arith.constant 0 : i32
    return %c0_i32, %c0_i32_0 : i32, i32
  }
  func.func @transform_3(%arg0: i32, %arg1: i32) -> (i32, i32) {
    %c0_i32 = arith.constant 0 : i32
    %c0_i32_0 = arith.constant 0 : i32
    %c0_i32_1 = arith.constant 0 : i32
    return %c0_i32, %c0_i32_0 : i32, i32
  }
  func.func @transform_4(%arg0: i32, %arg1: i32) -> (i32, i32) {
    %c0_i32 = arith.constant 0 : i32
    %c0_i32_0 = arith.constant 0 : i32
    %c0_i32_1 = arith.constant 0 : i32
    return %c0_i32, %c0_i32_0 : i32, i32
  }
  func.func @transform_5(%arg0: i32, %arg1: i32) -> (i32, i32, i32) {
    %c0_i32 = arith.constant 0 : i32
    %c0_i32_0 = arith.constant 0 : i32
    return %arg0, %c0_i32, %arg1 : i32, i32, i32
  }
}

</mosaic_0001>

<bundles_post_ra>
// kernel: unet_conv_block.1
= control target key start
LH: loop header
LB: loop body
LE: loop exit
PB: predicated region body
PF: predicated region fallthrough
CT: control target
= control target key end

     0   :  { %s5562_s0 = inlined_call_operand.hbm [shape: bf16[2,16,16,4], index: 0, kind: input, shape index: {}]   ;;  %s5563_s1 = inlined_call_operand.hbm [shape: bf16[36,8], index: 1, kind: input, shape index: {}]   ;;  %s5564_s2 = inlined_call_operand.hbm [shape: f32[1,8], index: 2, kind: input, shape index: {}]   ;;  %s5565_s3 = inlined_call_operand.hbm [shape: bf16[72,8], index: 3, kind: input, shape index: {}]   ;;  %s5566_s4 = inlined_call_operand.hbm [shape: f32[1,8], index: 4, kind: input, shape index: {}]   ;;  %s5567_s5 = inlined_call_operand.hbm [shape: f32[2,8,256], index: 5, kind: output, shape index: {}]  }
   0x1   :  { %5581 = sst [smem:[#allocation22_spill]] %s5563_s1 }
   0x2   :  { %5582 = sst [smem:[#allocation23_spill]] %s5564_s2 }
   0x3   :  { %5583 = sst [smem:[#allocation24_spill]] %s5567_s5 }
   0x4   :  { %10 = vsyncpa [#allocation4], 0 }
   0x5   :  { %12 = vsyncpa [#allocation4 + $0x1], 0 }
   0x6   :  { %13 = vsyncpa [#allocation7], 0 }
   0x7   :  { %14 = vsyncpa [#allocation10], 0 }
   0x8   :  { %15 = vsyncpa [#allocation5], 0 }
   0x9   :  { %17 = vsyncpa [#allocation5 + $0x1], 0  ;;  %s3964_s18 = smov 0   ;;  %s3966_s19 = smov 0  }
   0xa   :  { %s3968_s20 = smov 0   ;;  %s3970_s21 = smov 0  }
   0xb   :  { %s3972_s22 = smov 0   ;;  %s3974_s23 = smov 0  }
   0xc   :  { %s3976_s24 = smov 0   ;;  %s3978_s25 = smov 0  }
   0xd   :  { %s3980_s26 = smov 0   ;;  %s3982_s27 = smov 0  }
   0xe   :  { %s3984_s28 = smov 0  }
   0xf LB: > { %5584 = sst [smem:[#allocation17_spill]] %s3868_s18  ;;  %s3136_s29 = sadd.s32 4294967295, %s3908_s28   ;;  %s3908_s28 = sphi %s3984_s28, %s23_s28   ;;  %s3904_s27 = sphi %s3982_s27, %s5625_s27   ;;  %s3900_s26 = sphi %s3980_s26, %s5624_s26   ;;  %s3896_s25 = sphi %s3978_s25, %s5623_s25   ;;  %s3892_s24 = sphi %s3976_s24, %s5622_s24   ;;  %s3888_s23 = sphi %s3974_s23, %s5621_s23   ;;  %s3884_s22 = sphi %s3972_s22, %s5620_s22   ;;  %s3880_s21 = sphi %s3970_s21, %s5619_s21   ;;  %s3876_s20 = sphi %s3968_s20, %s5618_s20   ;;  %s3872_s19 = sphi %s3966_s19, %s5617_s19   ;;  %s3868_s18 = sphi %s3964_s18, %s5616_s18  }
  0x10   : > { %5585 = sst [smem:[#allocation18_spill]] %s3892_s24  ;;  %s3137_s30 = sadd.s32 4294967294, %s3908_s28  }
  0x11   : > { %5586 = sst [smem:[#allocation19_spill]] %s3896_s25  ;;  %p55_p0 = scmp.ne.s32.totalorder %s3884_s22, %s3880_s21 }
  0x12   : > { %p4020_p1 = scmp.eq.s32.totalorder %s3136_s29, 0  ;;  %p164_p2 = scmp.ne.s32.totalorder %s3876_s20, %s3872_s19 }
  0x13   : > { %p165_p3 = scmp.eq.s32.totalorder %s3136_s29, 3  ;;  %p170_p5 = scmp.ne.s32.totalorder %s3872_s19, %s3868_s18 }
  0x14   : > { %s5587_s6 = scalar_select %p4020_p1, 1, 0 }
  0x15   : > { %p4028_p4 = por %p4020_p1, %p55_p0  ;;  %p4034_p6 = por %p165_p3, %p164_p2 }
  0x16   : > { %p171_p7 = scmp.eq.s32.totalorder %s3137_s30, 3  ;;  %p3138_p8 = scmp.ge.s32.totalorder %s3908_s28, 1 }
  0x17   : > { %s5588_s7 = scalar_select %p4028_p4, 1, 0 }
  0x18   : > { %s5589_s8 = scalar_select %p4034_p6, 1, 0 }
  0x19   : > { %p178_p9 = scmp.lt.s32.totalorder %s3908_s28, 5  ;;  %p4040_p10 = por %p171_p7, %p170_p5 }
  0x1a   : > { %5590 = sst [smem:[#allocation20_spill]] %s5589_s8  ;;  %s3910_s11 = smov [#allocation6]  }
  0x1b   : > { %s5591_s9 = scalar_select %p4040_p10, 1, 0 }
  0x1c   : > { %p4044_p11 = pnand %p3138_p8, %p178_p9  ;;  %s190_s12 = sshll.u32 %s3910_s11, 4  ;;  %s191_s12 = int_to_ptr.vmem [resolvable:$true] %s190_s12 }
  0x1d   : > { %5592 = sst [smem:[#allocation21_spill]] %s5591_s9  ;;  %s3911_s14 = smov [#allocation9]  }
  0x1e   : > { %s5593_s10 = scalar_select %p4044_p11, 1, 0 }
  0x1f   : > { %p3435_p12 = pneg %p4044_p11  ;;  %s214_s15 = sshll.u32 %s3911_s14, 4  ;;  %s4056_s15 = int_to_ptr.vmem [resolvable:$true] %s214_s15 }
  0x20   : > { %s5595_s1 = sld [smem:[#allocation22_spill]] }
  0x21   : > { %p4052_p13 = pnand %p3435_p12, %p4020_p1 }
  0x23   : > { %p4066_p2 = pneg %p4052_p13 }
  0x26   : > { %s3636_s21 = scalar_lea.hbm %s5595_s1, 320 }
  0x27   : > { %p3637_p0 = scmp.ne.s32.totalorder %s5595_s1, %s3636_s21  ;;  %p3643_p7 = scmp.lt.u32.totalorder %s3636_s21, %s5595_s1 }
  0x29   : > { %p3639_p3 = pnand %p4066_p2, %p3637_p0 }
  0x2b   : > { %p3640_p5 = pneg %p3639_p3 }
  0x2d   : > { %p3645_p8 = pnand %p3643_p7, %p3640_p5 }
  0x2f   : > { %3648 = shalt.err (!%p3645_p8)
}
  0x30   : > { %s3649_s16 = scalar_lea.vmem %s191_s12, 320  ;;  %p3657_p6 = scmp.lt.s32.totalorder %s191_s12, %s191_s12 }
  0x31   : > { %p3650_p9 = scmp.ne.s32.totalorder %s191_s12, %s3649_s16  ;;  %p3658_p1 = scmp.lt.s32.totalorder %s3649_s16, %s3649_s16 }
  0x33   : > { %p3652_p12 = pnand %p3650_p9, %p4066_p2  ;;  %p3659_p4 = por %p3658_p1, %p3657_p6 }
  0x35   : > { %p3653_p10 = pneg %p3652_p12 }
  0x37   : > { %p3660_p11 = pnand %p3659_p4, %p3653_p10 }
  0x39   : > { %3663 = shalt.err (!%p3660_p11)
}
  0x3a   : > { %s5579_s17 = smov 64   ;;  %s5580_s29 = smov 4  }
  0x3b   : > { %3438 = dma.hbm_to_vmem [thread:$0]  (!%p4052_p13), %s5595_s1, 320, %s191_s12, [#allocation7], %s5579_s17, %s5579_s17, %s5580_s29  }
  0x3c   : > { %s3664_s18 = scalar_lea.hbm %s5565_s3, 576 }
  0x3d   : > { %p3665_p1 = scmp.ne.s32.totalorder %s5565_s3, %s3664_s18  ;;  %p3671_p10 = scmp.lt.u32.totalorder %s3664_s18, %s5565_s3 }
  0x3f   : > { %p3667_p4 = pnand %p3665_p1, %p4066_p2 }
  0x41   : > { %p3668_p6 = pneg %p3667_p4 }
  0x43   : > { %p3673_p11 = pnand %p3671_p10, %p3668_p6 }
  0x45   : > { %3676 = shalt.err (!%p3673_p11)
}
  0x46   : > { %s3677_s12 = scalar_lea.vmem %s4056_s15, 576  ;;  %p3685_p7 = scmp.lt.s32.totalorder %s4056_s15, %s4056_s15 }
  0x47   : > { %p3678_p0 = scmp.ne.s32.totalorder %s4056_s15, %s3677_s12  ;;  %p3686_p8 = scmp.lt.s32.totalorder %s3677_s12, %s3677_s12 }
  0x49   : > { %p3680_p3 = pnand %p3678_p0, %p4066_p2  ;;  %p3687_p9 = por %p3686_p8, %p3685_p7 }
  0x4b   : > { %p3681_p5 = pneg %p3680_p3 }
  0x4d   : > { %p3688_p12 = pnand %p3687_p9, %p3681_p5 }
  0x4f   : > { %3691 = shalt.err (!%p3688_p12)
}
  0x50   : > { %3444 = dma.hbm_to_vmem [thread:$0]  (!%p4052_p13), %s5565_s3, 576, %s4056_s15, [#allocation10], %s5579_s17, %s5579_s17, %s5580_s29  }
  0x51   : > { %s3914_s25 = smov [#allocation8]   ;;  %s3915_s9 = smov [#allocation11]  }
  0x52   : > { %s204_s8 = sshll.u32 %s3914_s25, 4  ;;  %s228_s21 = sshll.u32 %s3915_s9, 4  ;;  %s205_s8 = int_to_ptr.vmem [resolvable:$true] %s204_s8  ;;  %s229_s21 = int_to_ptr.vmem [resolvable:$true] %s228_s21 }
  0x53   : > { %s5597_s2 = sld [smem:[#allocation23_spill]] }
  0x59   : > { %s3692_s16 = scalar_lea.hbm %s5597_s2, 16 }
  0x5a   : > { %p3693_p1 = scmp.ne.s32.totalorder %s5597_s2, %s3692_s16  ;;  %p3699_p10 = scmp.lt.u32.totalorder %s3692_s16, %s5597_s2 }
  0x5c   : > { %p3695_p4 = pnand %p3693_p1, %p4066_p2 }
  0x5e   : > { %p3696_p6 = pneg %p3695_p4 }
  0x60   : > { %p3701_p11 = pnand %p3699_p10, %p3696_p6 }
  0x62   : > { %3704 = shalt.err (!%p3701_p11)
}
  0x63   : > { %s3705_s15 = scalar_lea.vmem %s205_s8, 16  ;;  %s3712_s18 = scalar_lea.vmem %s205_s8, 32 }
  0x64   : > { %p3706_p0 = scmp.ne.s32.totalorder %s205_s8, %s3705_s15  ;;  %p3713_p7 = scmp.lt.s32.totalorder %s205_s8, %s205_s8 }
  0x65   : > { %p3714_p8 = scmp.lt.s32.totalorder %s3712_s18, %s3705_s15 }
  0x66   : > { %p3708_p3 = pnand %p3706_p0, %p4066_p2 }
  0x67   : > { %p3715_p9 = por %p3714_p8, %p3713_p7 }
  0x68   : > { %p3709_p5 = pneg %p3708_p3 }
  0x6a   : > { %p3716_p12 = pnand %p3715_p9, %p3709_p5 }
  0x6c   : > { %3719 = shalt.err (!%p3716_p12)
}
  0x6d   : > { %3441 = dma.hbm_to_vmem [thread:$0]  (!%p4052_p13), %s5597_s2, 16, %s205_s8, [#allocation7]  }
  0x6e   : > { %s3720_s30 = scalar_lea.hbm %s5566_s4, 16 }
  0x6f   : > { %p3721_p1 = scmp.ne.s32.totalorder %s5566_s4, %s3720_s30  ;;  %p3727_p10 = scmp.lt.u32.totalorder %s3720_s30, %s5566_s4 }
  0x71   : > { %p3723_p4 = pnand %p3721_p1, %p4066_p2 }
  0x73   : > { %p3724_p6 = pneg %p3723_p4 }
  0x75   : > { %p3729_p11 = pnand %p3727_p10, %p3724_p6 }
  0x77   : > { %3732 = shalt.err (!%p3729_p11)
}
  0x78   : > { %s3733_s15 = scalar_lea.vmem %s229_s21, 16  ;;  %s3740_s8 = scalar_lea.vmem %s229_s21, 32 }
  0x79   : > { %p3734_p0 = scmp.ne.s32.totalorder %s229_s21, %s3733_s15  ;;  %p3741_p7 = scmp.lt.s32.totalorder %s229_s21, %s229_s21 }
  0x7a   : > { %p3742_p8 = scmp.lt.s32.totalorder %s3740_s8, %s3733_s15 }
  0x7b   : > { %p3736_p3 = pnand %p3734_p0, %p4066_p2 }
  0x7c   : > { %p3743_p9 = por %p3742_p8, %p3741_p7 }
  0x7d   : > { %p3737_p5 = pneg %p3736_p3 }
  0x7f   : > { %p3744_p12 = pnand %p3743_p9, %p3737_p5 }
  0x81   : > { %3747 = shalt.err (!%p3744_p12)
}
  0x82   : > { %3447 = dma.hbm_to_vmem [thread:$0]  (!%p4052_p13), %s5566_s4, 16, %s229_s21, [#allocation10]  }
  0x83   : > { %s32_s11 = sadd.s32 1, %s3900_s26  ;;  %s35_s13 = sadd.s32 1, %s3904_s27 }
  0x84   : > { %p33_p2 = scmp.ge.s32.totalorder %s32_s11, 2  ;;  %s42_s25 = sadd.s32 1, %s3888_s23 }
  0x85   : > { %p49_p1 = scmp.ne.s32.totalorder %s3888_s23, %s3884_s22  ;;  %p50_p4 = scmp.eq.s32.totalorder %s3908_s28, 0 }
  0x86   : > { %s5627_s11 = smov (%p33_p2, %s32_s11), 0  ;;  %s5629_s13 = smov (!%p33_p2, %s35_s13), %s3904_s27 }
  0x87   : > { %s150_s24 = ssub.s32 %s3900_s26, %s5627_s11  ;;  %p37_p6 = scmp.ge.s32.totalorder %s5629_s13, 2 }
  0x88   : > { %s154_s9 = sadd.s32 1, %s3876_s20  ;;  %p4159_p10 = por %p50_p4, %p49_p1 }
  0x89   : > { %p3460_p13 = scmp.lt.s32.totalorder %s3908_s28, 4  ;;  %s5631_s13 = smov (%p37_p6, %s5629_s13), 0 }
  0x8a   : > { %s239_s30 = sand.u32 1, %s3888_s23   ;;  %s3297_s14 = sshll.u32 %s3904_s27, 11 }
  0x8b   : > { %s39_s16 = ssub.s32 %s3904_s27, %s5631_s13  ;;  %s3144_s5 = sshll.u32 %s239_s30, 7 }
  0x8c   : > { %p40_p11 = scmp.eq.s32.totalorder %s39_s16, 0  ;;  %s151_s12 = sor.u32 %s150_s24, %s39_s16 }
  0x8d   : > { %p152_p0 = scmp.eq.s32.totalorder %s151_s12, 0  ;;  %s4179_s17 = scalar_lea.hbm %s5562_s0, %s3297_s14 }
  0x8e   : > { %s4171_s15 = scalar_select %p40_p11, %s3888_s23, %s42_s25  }
  0x8f   : > { %s4174_s8 = scalar_select %p152_p0, %s3876_s20, %s154_s9  }
  0x90   : > { %s243_s29 = scalar_lea.vmem [#allocation3], %s3144_s5  ;;  %p4185_p3 = pnand %p3460_p13, %p4159_p10 }
  0x91   : > { %s250_s2 = sshll.u32 %s243_s29, 4  ;;  %s4191_s25 = scalar_lea.sflag [#allocation4], %s239_s30  ;;  %s4189_s2 = int_to_ptr.vmem [resolvable:$true] %s250_s2 }
  0x92   : > { %s3748_s9 = scalar_lea.hbm %s4179_s17, 2048  ;;  %p3750_p7 = pneg %p4185_p3 }
  0x93   : > { %p3749_p5 = scmp.ne.s32.totalorder %s4179_s17, %s3748_s9  ;;  %s3753_s14 = scalar_lea.hbm %s5562_s0, 4096 }
  0x94   : > { %p3754_p12 = scmp.lt.u32.totalorder %s4179_s17, %s5562_s0  ;;  %p3755_p2 = scmp.lt.u32.totalorder %s3753_s14, %s3748_s9 }
  0x95   : > { %p3751_p8 = pnand %p3750_p7, %p3749_p5  ;;  %p3757_p4 = scmp.lt.u32.totalorder %s3748_s9, %s4179_s17 }
  0x96   : > { %p3756_p1 = por %p3755_p2, %p3754_p12 }
  0x97   : > { %p3752_p9 = pneg %p3751_p8 }
  0x98   : > { %p3758_p6 = por %p3757_p4, %p3756_p1 }
  0x9a   : > { %p3759_p10 = pnand %p3758_p6, %p3752_p9 }
  0x9c   : > { %3762 = shalt.err (!%p3759_p10)
}
  0x9d   : > { %s3763_s30 = scalar_lea.vmem %s4189_s2, 2048  ;;  %s3916_s5 = smov [#allocation3]  }
  0x9e   : > { %p3764_p13 = scmp.ne.s32.totalorder %s4189_s2, %s3763_s30  ;;  %s3768_s18 = sshll.u32 %s3916_s5, 4  ;;  %s3769_s18 = int_to_ptr.vmem [resolvable:$false] %s3768_s18 }
  0x9f   : > { %s3770_s1 = scalar_lea.vmem %s3769_s18, 4096  ;;  %p3771_p5 = scmp.lt.s32.totalorder %s4189_s2, %s3769_s18 }
  0xa0   : > { %p3766_p11 = pnand %p3764_p13, %p3750_p7  ;;  %p3772_p8 = scmp.lt.s32.totalorder %s3770_s1, %s3763_s30 }
  0xa2   : > { %p3767_p0 = pneg %p3766_p11  ;;  %p3773_p12 = por %p3772_p8, %p3771_p5 }
  0xa4   : > { %p3774_p2 = pnand %p3773_p12, %p3767_p0 }
  0xa6   : > { %3777 = shalt.err (!%p3774_p2)
}
  0xa7   : > { %s5600_s9 = smov 4   ;;  %s5601_s29 = smov 64  }
  0xa8   : > { %3451 = dma.hbm_to_vmem [thread:$0]  (!%p4185_p3), %s4179_s17, 2048, %s4189_s2, %s4191_s25, %s5601_s29, %s5601_s29, %s5600_s9  }
  0xa9   : > { %p5602_p7 = scmp.ne.s32.totalorder %s5593_s10, 0 }
  0xaa   : > { %s264_s21 = sand.u32 (!%p5602_p7), 1, %s3884_s22   ;;  %p5603_p9 = scmp.ne.s32.totalorder (!%p5602_p7), %s5588_s7, 0 }
  0xab   : > { %262 = sbr.rel (%p5602_p7) target bundleno = 1370 (0x55a), region = 40  ;;  %s3148_s14 = sshll.u32 (!%p5602_p7), %s264_s21, 7 }
  0xac   : > { %s265_s16 = scalar_lea.sflag (!%p5602_p7), [#allocation4], %s264_s21  ;;  %s4225_s12 = scalar_lea.vmem (!%p5602_p7), [#allocation3], %s3148_s14 }
  0xb2   : > { %3851 = dma.done.wait (%p5603_p9), %s265_s16, 2048  }
  0xb3   : > { %3853 = vsyncadd (%p5603_p9), %s265_s16, 4294965248  ;;  %p5604_p1 = scmp.ne.s32.totalorder %s5587_s6, 0 }
  0xb5   : > { %3855 = dma.done.wait (%p5604_p1), [#allocation7], 336  }
  0xb6   : > { %3857 = vsyncadd (%p5604_p1), [#allocation7], 4294966960 }
  0xb7   : > { %3859 = dma.done.wait (%p5604_p1), [#allocation10], 592  }
  0xb8   : > { %3861 = vsyncadd (%p5604_p1), [#allocation10], 4294966704  ;;  %s308_s2 = sand.u32 1, %s3872_s19   ;;  %s5605_s17 = sld [smem:[#allocation18_spill]] }
  0xb9   : > { %s4242_s10 = sshll.u32 %s308_s2, 3 }
  0xba   : > { %s310_s7 = scalar_lea.vmem [#allocation12], %s4242_s10 }
  0xbe   : > { %p3154_p3 = scmp.ne.s32.totalorder %s5605_s17, 0 }
  0xbf   : > { %v332_v0 = vld [vmem:[%s4225_s12 + $0x40] sm:$0xf] (!%p3154_p3)  ;;  %v333_v1 = vld [vmem:[%s4225_s12 + $0x44] sm:$0xf] (!%p3154_p3)  ;;  %vm620_vm0 = vcmask (!%p3154_p3), 1040384   ;;  %vm896_vm2 = vcmask (!%p3154_p3), 1046528  }
  0xc0   : > { %315 = sbr.rel (%p3154_p3) target bundleno = 801 (0x321), region = 64  ;;  %v3163_v2 = vcombine.low (!%p3154_p3), %v332_v0, %v333_v1  ;;  %vm621_vm1 = vsmask.f32 (!%p3154_p3), 256  ;;  %v316_v3 = vld [vmem:[%s4225_s12] sm:$0xf] (!%p3154_p3)  ;;  %v3179_v9 = vcombine.low (!%p3154_p3), %v333_v1, %v333_v1  ;;  %s3917_s6 = smov (!%p3154_p3), 12  }
  0xc1   : > { %v317_v4 = vld [vmem:[%s4225_s12 + $0x4] sm:$0xf] (!%p3154_p3)  ;;  %v318_v7 = vld [vmem:[%s4225_s12 + $0x8] sm:$0xf] (!%p3154_p3)  ;;  %v4252_v8 = vld [vmem:[%s4225_s12 + $0xc] sm:$0xf] (!%p3154_p3) }
  0xc2   : > { %v3155_v5 = vcombine.low (!%p3154_p3), %v316_v3, %v317_v4  ;;  %v3171_v6 = vcombine.low (!%p3154_p3), %v317_v4, %v317_v4  ;;  %v485_v10 = vshrl.u32 (!%p3154_p3), %v3163_v2, 16  ;;  %v488_v11 = vshll.u32 (!%p3154_p3), %v3163_v2, 16  ;;  %v330_v13 = vld [vmem:[%s4225_s12 + $0x38] sm:$0xf] (!%p3154_p3)  ;;  %v331_v14 = vld [vmem:[%s4225_s12 + $0x3c] sm:$0xf] (!%p3154_p3)  ;;  %vm4260_vm3 = vmand (!%p3154_p3), %vm620_vm0, %vm621_vm1 }
  0xc3   : > { %v3156_v12 = vcombine.low (!%p3154_p3), %v318_v7, %v4252_v8  ;;  %v3162_v18 = vcombine.low (!%p3154_p3), %v330_v13, %v331_v14  ;;  %v334_v19 = vld [vmem:[%s4225_s12 + $0x48] sm:$0xf] (!%p3154_p3)  ;;  %v3178_v24 = vcombine.low (!%p3154_p3), %v331_v14, %v331_v14  ;;  %v335_v25 = vld [vmem:[%s4225_s12 + $0x4c] sm:$0xf] (!%p3154_p3)  ;;  %v596_v29 = vrot.slane (!%p3154_p3), %v3179_v9, 3  ;;  %s3918_s24 = smov (!%p3154_p3), 8  }
  0xc4   : > { %v429_v15 = vshrl.u32 (!%p3154_p3), %v3155_v5, 16  ;;  %v432_v16 = vshll.u32 (!%p3154_p3), %v3155_v5, 16  ;;  %v588_v17 = vrot.slane (!%p3154_p3), %v3171_v6, 3  ;;  %v487_v20 = vrot.slane (!%p3154_p3), %v485_v10, 7  ;;  %s3919_s25 = smov (!%p3154_p3), 4   ;;  %s3920_s30 = smov (!%p3154_p3), 16  }
  0xc5   : > { %v436_v22 = vshrl.u32 (!%p3154_p3), %v3156_v12, 16  ;;  %v439_v23 = vshll.u32 (!%p3154_p3), %v3156_v12, 16  ;;  %v478_v27 = vshrl.u32 (!%p3154_p3), %v3162_v18, 16  ;;  %v481_v28 = vshll.u32 (!%p3154_p3), %v3162_v18, 16  ;;  %s3921_s5 = smov (!%p3154_p3), 20   ;;  %s3922_s18 = smov (!%p3154_p3), 24  }
  0xc6   : > { %v431_v26 = vrot.slane (!%p3154_p3), %v429_v15, 7  ;;  %v490_v30 = vor.u32 (!%p3154_p3), %v488_v11, %v487_v20  ;;  %v595_v32 = vrot.slane (!%p3154_p3), %v3178_v24, 3  ;;  %v3164_v33 = vcombine.low (!%p3154_p3), %v334_v19, %v335_v25  ;;  %v337_v24 = vld [vmem:[%s4225_s12 + $0x54] sm:$0xf] (!%p3154_p3)  ;;  %s3923_s1 = smov (!%p3154_p3), 28   ;;  %s3924_s9 = smov (!%p3154_p3), 32  }
  0xc7   : > { %v4265_v31 = vrot.slane %v436_v22, 7  ;;  %v480_v36 = vrot.slane %v478_v27, 7  ;;  %v647_v37 = vsel %vm4260_vm3, %v487_v20, %v596_v29  ;;  %v3172_v49 = vcombine.low %v4252_v8, %v4252_v8  ;;  %v321_v27 = vld [vmem:[%s4225_s12 + $0x14] sm:$0xf] }
  0xc8   : > { %v434_v34 = vor.u32 %v432_v16, %v431_v26  ;;  %v639_v35 = vsel %vm4260_vm3, %v431_v26, %v588_v17  ;;  %v4273_v38 = vsel %vm4260_vm3, %v332_v0, %v490_v30  ;;  %v922_v41 = vrot.slane %v647_v37, 1  ;;  %v320_v26 = vld [vmem:[%s4225_s12 + $0x10] sm:$0xf] }
  0xc9   : > { %v441_v39 = vor.u32 %v439_v23, %v4265_v31  ;;  %v898_v40 = vrot.slane %v639_v35, 1  ;;  %989 = vrot.lane.b32.xlu1 %v4273_v38, %s3917_s6  ;;  %v483_v43 = vor.u32 %v481_v28, %v480_v36  ;;  %v646_v44 = vsel %vm4260_vm3, %v480_v36, %v595_v32  ;;  %v336_v23 = vld [vmem:[%s4225_s12 + $0x50] sm:$0xf] }
  0xca   : > { %v4280_v42 = vsel %vm4260_vm3, %v316_v3, %v434_v34  ;;  %v921_v45 = vrot.slane %v4273_v38, 1  ;;  %v919_v47 = vrot.slane %v646_v44, 1  ;;  %v492_v48 = vshrl.u32 %v3164_v33, 16 }
  0xcb   : > { %973 = vrot.lane.b32.xlu0 %v4280_v42, %s3917_s6  ;;  %v897_v46 = vrot.slane %v4280_v42, 1  ;;  %v4292_v50 = vsel %vm4260_vm3, %v318_v7, %v441_v39  ;;  %v4296_v51 = vsel %vm4260_vm3, %v330_v13, %v483_v43  ;;  %v495_v53 = vshll.u32 %v3164_v33, 16 }
  0xcc   : > { %v4299_v52 = vsel %vm896_vm2, %v921_v45, %v922_v41  ;;  %v918_v55 = vrot.slane %v4296_v51, 1  ;;  %v494_v56 = vrot.slane %v492_v48, 7  ;;  %v657_v57 = vshrl.u32 %v4280_v42, 16 }
  0xcd   : > { %v4302_v54 = vsel %vm896_vm2, %v897_v46, %v898_v40  ;;  %v659_v58 = vshll.u32 %v4280_v42, 16  ;;  %v664_v59 = vshll.u32 %v639_v35, 16  ;;  %v753_v60 = vshrl.u32 %v4273_v38, 16 }
  0xce   : > { %942 = vrot.lane.b32.xlu1 %v4302_v54, %s3918_s24  ;;  %v755_v61 = vshll.u32 %v4273_v38, 16  ;;  %v4314_v62 = vsel %vm896_vm2, %v918_v55, %v919_v47  ;;  %v497_v63 = vor.u32 %v495_v53, %v494_v56  ;;  %v760_v0 = vshll.u32 %v647_v37, 16 }
  0xcf   : > { %975 = vrot.lane.b32.xlu0 %v4292_v50, %s3917_s6  ;;  %v741_v1 = vshrl.u32 %v4296_v51, 16  ;;  %v661_v2 = vrot.slane %v659_v58, 1  ;;  %v666_v3 = vrot.slane %v664_v59, 1  ;;  %v743_v5 = vshll.u32 %v4296_v51, 16 }
  0xd0   : > { %v757_v4 = vrot.slane %v755_v61, 1  ;;  %vm655_vm4 = vsmask.f32 7424  ;;  %v748_v6 = vshll.u32 %v646_v44, 16  ;;  %v3180_v7 = vcombine.low %v335_v25, %v335_v25 }
  0xd1   : > { %v4322_v8 = vsel %vm4260_vm3, %v334_v19, %v497_v63  ;;  %v662_v9 = vor.u32 %v661_v2, %v657_v57  ;;  %v762_v10 = vrot.slane %v760_v0, 1  ;;  %v745_v11 = vrot.slane %v743_v5, 1 }
  0xd2   : > { %958 = vrot.lane.b32.xlu1 %v4299_v52, %s3918_s24  ;;  %v758_v12 = vor.u32 %v757_v4, %v753_v60  ;;  %v597_v13 = vrot.slane %v3180_v7, 3  ;;  %v767_v14 = vshll.u32 %v4322_v8, 16  ;;  %v589_v15 = vrot.slane %v3172_v49, 3 }
  0xd3   : > { %956 = vrot.lane.b32.xlu0 %v4314_v62, %s3918_s24  ;;  %v667_v16 = vsel %vm655_vm4, %v662_v9, %v666_v3  ;;  %v746_v17 = vor.u32 %v745_v11, %v741_v1  ;;  %v750_v18 = vrot.slane %v748_v6, 1  ;;  %v671_v22 = vshll.u32 %v4292_v50, 16 }
  0xd4   : > { %v648_v19 = vsel %vm4260_vm3, %v494_v56, %v597_v13  ;;  %v640_v20 = vsel %vm4260_vm3, %v4265_v31, %v589_v15  ;;  %v765_v25 = vshrl.u32 %v4322_v8, 16  ;;  %v4343_v28 = vsel %vm655_vm4, %v758_v12, %v762_v10  ;;  %v3602_v10 = vld [vmem:[#allocation6] sm:$0xff]  }
  0xd5   : > { %v769_v29 = vrot.slane %v767_v14, 1  ;;  %v772_v30 = vshll.u32 %v648_v19, 16  ;;  %v669_v31 = vshrl.u32 %v4292_v50, 16  ;;  %v4347_v32 = vsel %vm655_vm4, %v746_v17, %v750_v18  ;;  %3331 = vmatprep.subr.bf16.mxu0 %v3602_v10  ;;  %3395 = vmatprep.subr.bf16.mxu1 %v3602_v10  ;;  %v3603_v17 = vld [vmem:[#allocation6 + $0x8] sm:$0xff]  }
  0xd6   : > { %991 = vrot.lane.b32.xlu1 %v4322_v8, %s3917_s6  ;;  %v673_v33 = vrot.slane %v671_v22, 1  ;;  %v676_v34 = vshll.u32 %v640_v20, 16  ;;  %v3165_v35 = vcombine.low %v336_v23, %v337_v24  ;;  %v3157_v36 = vcombine.low %v320_v26, %v321_v27  ;;  %3332 = vmatpush3.bf16.msra.mxu0 %v3602_v10 }
  0xd7   : > { %836 = vrot.lane.b32.xlu0 %v667_v16, %s3919_s25  ;;  %v770_v37 = vor.u32 %v769_v29, %v765_v25  ;;  %v774_v39 = vrot.slane %v772_v30, 1  ;;  %v924_v55 = vrot.slane %v4322_v8, 1  ;;  %v925_v56 = vrot.slane %v648_v19, 1  ;;  %3398 = vmatpush3.bf16.msra.mxu1 %v3602_v10  ;;  %v338_v25 = vld [vmem:[%s4225_s12 + $0x58] sm:$0xf] }
  0xd8   : > { %v674_v40 = vor.u32 %v673_v33, %v669_v31  ;;  %v678_v41 = vrot.slane %v676_v34, 1  ;;  %v499_v43 = vshrl.u32 %v3165_v35, 16  ;;  %v443_v44 = vshrl.u32 %v3157_v36, 16  ;;  %3333 = vmatprep.subr.bf16.mxu0 %v3603_v17  ;;  %3396 = vmatprep.subr.bf16.mxu1 %v3603_v17  ;;  %v323_v29 = vld [vmem:[%s4225_s12 + $0x1c] sm:$0xf] }
  0xd9   : > { %v4357_v45 = vsel %vm655_vm4, %v770_v37, %v774_v39  ;;  %v502_v48 = vshll.u32 %v3165_v35, 16  ;;  %v446_v53 = vshll.u32 %v3157_v36, 16  ;;  %v900_v57 = vrot.slane %v4292_v50, 1  ;;  %v3606_v37 = vld [vmem:[#allocation6 + $0x10] ss:$0 sps:$4 sm:$0x33]  }
  0xda   : > { %852 = vrot.lane.b32.xlu1 %v4343_v28, %s3919_s25  ;;  %v4360_v46 = vsel %vm655_vm4, %v674_v40, %v678_v41  ;;  %v501_v47 = vrot.slane %v499_v43, 7  ;;  %v445_v49 = vrot.slane %v443_v44, 7  ;;  %v901_v58 = vrot.slane %v640_v20, 1  ;;  %3334 = vmatpush3.bf16.msra.mxu0 %v3603_v17 }
  0xdb   : > { %850 = vrot.lane.b32.xlu0 %v4347_v32, %s3919_s25  ;;  %v3181_v60 = vcombine.low %v337_v24, %v337_v24  ;;  %v3173_v63 = vcombine.low %v321_v27, %v321_v27  ;;  %v4373_v0 = vsel %vm896_vm2, %v924_v55, %v925_v56  ;;  %3399 = vmatpush3.bf16.msra.mxu1 %v3603_v17  ;;  %v322_v27 = vld [vmem:[%s4225_s12 + $0x18] sm:$0xf]  ;;  %vm1492_vm5 = vcmask 1041408  }
  0xdc   : > { %v504_v59 = vor.u32 %v502_v48, %v501_v47  ;;  %v448_v61 = vor.u32 %v446_v53, %v445_v49  ;;  %v4376_v1 = vsel %vm896_vm2, %v900_v57, %v901_v58  ;;  %v3158_v36 = vcombine.low %v322_v27, %v323_v29  ;;  %3411 = vmatprep.subr.msk.bf16.mxu0 %vm1492_vm5, %v3606_v37 }
  0xdd   : > { %v598_v3 = vrot.slane %v3181_v60, 3  ;;  %v590_v5 = vrot.slane %v3173_v63, 3  ;;  %3412 = vmatprep.subr.msk.bf16.mxu1 %vm1492_vm5, %v3606_v37  ;;  %v1494_v44 = vsel %vm1492_vm5, %v3606_v37, 0  ;;  %v3174_v56 = vcombine.low %v323_v29, %v323_v29 }
  0xde   : > { %1033 = vrot.lane.b32.xlu1 %v4343_v28, %s3920_s30  ;;  %v4380_v2 = vsel %vm4260_vm3, %v336_v23, %v504_v59  ;;  %v4384_v4 = vsel %vm4260_vm3, %v320_v26, %v448_v61  ;;  %v339_v26 = vld [vmem:[%s4225_s12 + $0x5c] sm:$0xf]  ;;  %v450_v43 = vshrl.u32 %v3158_v36, 16  ;;  %3336 = vmatpush3.bf16.msra.mxu0 %v1494_v44  ;;  %v453_v48 = vshll.u32 %v3158_v36, 16 }
  0xdf   : > { %1017 = vrot.lane.b32.xlu0 %v667_v16, %s3920_s30  ;;  %v649_v6 = vsel %vm4260_vm3, %v501_v47, %v598_v3  ;;  %v683_v7 = vshll.u32 %v4384_v4, 16  ;;  %v641_v9 = vsel %vm4260_vm3, %v445_v49, %v590_v5  ;;  %v777_v11 = vshrl.u32 %v4380_v2, 16  ;;  %3400 = vmatpush3.bf16.msra.mxu1 %v1494_v44  ;;  %v340_v3 = vld [vmem:[%s4225_s12 + $0x60] sm:$0xf]  ;;  %v341_v5 = vld [vmem:[%s4225_s12 + $0x64] sm:$0xf] }
  0xe0   : > { %v784_v13 = vshll.u32 %v649_v6, 16  ;;  %v681_v14 = vshrl.u32 %v4384_v4, 16  ;;  %v688_v16 = vshll.u32 %v641_v9, 16  ;;  %v927_v30 = vrot.slane %v4380_v2, 1 }
  0xe1   : > { %v685_v15 = vrot.slane %v683_v7, 1  ;;  %v928_v31 = vrot.slane %v649_v6, 1  ;;  %v903_v33 = vrot.slane %v4384_v4, 1  ;;  %v904_v34 = vrot.slane %v641_v9, 1  ;;  %v325_v6 = vld [vmem:[%s4225_s12 + $0x24] sm:$0xf] }
  0xe2   : > { %1035 = vrot.lane.b32.xlu1 %v4357_v45, %s3920_s30  ;;  %v786_v19 = vrot.slane %v784_v13, 1  ;;  %v690_v22 = vrot.slane %v688_v16, 1  ;;  %v3166_v35 = vcombine.low %v338_v25, %v339_v26  ;;  %v452_v47 = vrot.slane %v450_v43, 7 }
  0xe3   : > { %1019 = vrot.lane.b32.xlu0 %v4360_v46, %s3920_s30  ;;  %v686_v20 = vor.u32 %v685_v15, %v681_v14  ;;  %v4435_v39 = vsel %vm896_vm2, %v927_v30, %v928_v31  ;;  %v4438_v40 = vsel %vm896_vm2, %v903_v33, %v904_v34  ;;  %v3182_v53 = vcombine.low %v339_v26, %v339_v26 }
  0xe4   : > { %v506_v41 = vshrl.u32 %v3166_v35, 16  ;;  %v455_v55 = vor.u32 %v453_v48, %v452_v47  ;;  %v591_v60 = vrot.slane %v3174_v56, 3  ;;  %v3167_v14 = vcombine.low %v340_v3, %v341_v5 }
  0xe5   : > { %v4414_v24 = vsel %vm655_vm4, %v686_v20, %v690_v22  ;;  %v599_v58 = vrot.slane %v3182_v53, 3  ;;  %v3183_v36 = vcombine.low %v341_v5, %v341_v5  ;;  %vm1175_vm6 = vcmask 31744  }
  0xe6   : > { %1069 = vrot.lane.b32.xlu1 %v4299_v52, %s3921_s5  ;;  %v4458_v59 = vsel %vm4260_vm3, %v322_v27, %v455_v55  ;;  %v513_v20 = vshrl.u32 %v3167_v14, 16  ;;  %v516_v29 = vshll.u32 %v3167_v14, 16  ;;  %vm1206_vm7 = vcmask 64512  }
  0xe7   : > { %1053 = vrot.lane.b32.xlu0 %v4302_v54, %s3921_s5  ;;  %v779_v54 = vshll.u32 %v4380_v2, 16  ;;  %vm1237_vm8 = vcmask 97280   ;;  %vm1270_vm9 = vcmask 130048   ;;  %vm1303_vm10 = vcmask 162816  }
  0xe8   : > { %v515_v27 = vrot.slane %v513_v20, 7  ;;  %vm1336_vm11 = vcmask 195584   ;;  %vm1368_vm12 = vcmask 228352   ;;  %vm1400_vm13 = vcmask 261120  }
  0xe9   : > { %v781_v12 = vrot.slane %v779_v54, 1  ;;  %v324_v54 = vld [vmem:[%s4225_s12 + $0x20] sm:$0xf]  ;;  %vm1459_vm14 = vcmask 293888  }
  0xea   : > { %1071 = vrot.lane.b32.xlu1 %v4373_v0, %s3921_s5  ;;  %v3159_v15 = vcombine.low %v324_v54, %v325_v6 }
  0xeb   : > { %1055 = vrot.lane.b32.xlu0 %v4376_v1, %s3921_s5  ;;  %v782_v18 = vor.u32 %v781_v12, %v777_v11  ;;  %v693_v11 = vshrl.u32 %v4458_v59, 16 }
  0xec   : > { %v457_v22 = vshrl.u32 %v3159_v15, 16  ;;  %v460_v31 = vshll.u32 %v3159_v15, 16 }
  0xed   : > { %v4411_v23 = vsel %vm655_vm4, %v782_v18, %v786_v19 }
  0xee   : > { %1101 = vrot.lane.b32.xlu1 %v4322_v8, %s3922_s18  ;;  %v459_v30 = vrot.slane %v457_v22, 7 }
  0xef   : > { %1085 = vrot.lane.b32.xlu0 %v4292_v50, %s3922_s18 }
  0xf0   : > { %v462_v37 = vor.u32 %v460_v31, %v459_v30 }
  0xf2   : > { %1103 = vrot.lane.b32.xlu1 %v4380_v2, %s3922_s18 }
  0xf3   : > { %1087 = vrot.lane.b32.xlu0 %v4384_v4, %s3922_s18 }
  0xf6   : > { %1131 = vrot.lane.b32.xlu1 %v4357_v45, %s3923_s1 }
  0xf7   : > { %1115 = vrot.lane.b32.xlu0 %v4360_v46, %s3923_s1 }
  0xfa   : > { %1133 = vrot.lane.b32.xlu1 %v4411_v23, %s3923_s1 }
  0xfb   : > { %1117 = vrot.lane.b32.xlu0 %v4414_v24, %s3923_s1 }
  0xfe   : > { %1161 = vrot.lane.b32.xlu1 %v4373_v0, %s3924_s9 }
  0xff   : > { %1145 = vrot.lane.b32.xlu0 %v4376_v1, %s3924_s9 }
 0x102   : > { %854 = vrot.lane.b32.xlu1 %v4357_v45, %s3919_s25  ;;  %v508_v45 = vrot.slane %v506_v41, 7  ;;  %v3175_v41 = vcombine.low %v325_v6, %v325_v6 }
 0x103   : > { %838 = vrot.lane.b32.xlu0 %v4360_v46, %s3919_s25  ;;  %v509_v46 = vshll.u32 %v3166_v35, 16  ;;  %v518_v35 = vor.u32 %v516_v29, %v515_v27 }
 0x104   : > { %v650_v63 = vsel %vm4260_vm3, %v508_v45, %v599_v58  ;;  %v592_v48 = vrot.slane %v3175_v41, 3 }
 0x105   : > { %v511_v49 = vor.u32 %v509_v46, %v508_v45  ;;  %v796_v10 = vshll.u32 %v650_v63, 16  ;;  %v931_v33 = vrot.slane %v650_v63, 1  ;;  %v4512_v45 = vsel %vm4260_vm3, %v340_v3, %v518_v35 }
 0x106   : > { %1163 = vrot.lane.b32.xlu1 %v4435_v39, %s3924_s9  ;;  %v600_v46 = vrot.slane %v3183_v36, 3  ;;  %v643_v53 = vsel %vm4260_vm3, %v459_v30, %v592_v48  ;;  %v801_v55 = vshrl.u32 %v4512_v45, 16  ;;  %v933_v14 = vrot.slane %v4512_v45, 1 }
 0x107   : > { %1147 = vrot.lane.b32.xlu0 %v4438_v40, %s3924_s9  ;;  %v4454_v57 = vsel %vm4260_vm3, %v338_v25, %v511_v49  ;;  %v798_v17 = vrot.slane %v796_v10, 1  ;;  %v712_v63 = vshll.u32 %v643_v53, 16  ;;  %v342_v10 = vld [vmem:[%s4225_s12 + $0x68] sm:$0xf] }
 0x108   : > { %v791_v61 = vshll.u32 %v4454_v57, 16  ;;  %v789_v7 = vshrl.u32 %v4454_v57, 16 }
 0x109   : > { %v714_v5 = vrot.slane %v712_v63, 1 }
 0x10a   : > { %856 = vrot.lane.b32.xlu1 %v4411_v23, %s3919_s25  ;;  %v793_v9 = vrot.slane %v791_v61, 1 }
 0x10b   : > { %840 = vrot.lane.b32.xlu0 %v4414_v24, %s3919_s25 }
 0x10c   : > { %v794_v16 = vor.u32 %v793_v9, %v789_v7 }
 0x10e   : > { %960 = vrot.lane.b32.xlu1 %v4373_v0, %s3918_s24  ;;  %v695_v0 = vshll.u32 %v4458_v59, 16  ;;  %v4489_v25 = vsel %vm655_vm4, %v794_v16, %v798_v17 }
 0x10f   : > { %944 = vrot.lane.b32.xlu0 %v4376_v1, %s3918_s24  ;;  %v642_v1 = vsel %vm4260_vm3, %v452_v47, %v591_v60  ;;  %v4516_v47 = vsel %vm4260_vm3, %v324_v54, %v462_v37 }
 0x110   : > { %v697_v12 = vrot.slane %v695_v0, 1  ;;  %v700_v13 = vshll.u32 %v642_v1, 16  ;;  %v907_v34 = vrot.slane %v642_v1, 1  ;;  %v707_v49 = vshll.u32 %v4516_v47, 16 }
 0x111   : > { %v705_v60 = vshrl.u32 %v4516_v47, 16  ;;  %v909_v17 = vrot.slane %v4516_v47, 1 }
 0x112   : > { %962 = vrot.lane.b32.xlu1 %v4435_v39, %s3918_s24  ;;  %v698_v18 = vor.u32 %v697_v12, %v693_v11  ;;  %v702_v19 = vrot.slane %v700_v13, 1  ;;  %v709_v61 = vrot.slane %v707_v49, 1  ;;  %v343_v11 = vld [vmem:[%s4225_s12 + $0x6c] sm:$0xf]  ;;  %v326_v12 = vld [vmem:[%s4225_s12 + $0x28] sm:$0xf] }
 0x113   : > { %946 = vrot.lane.b32.xlu0 %v4438_v40, %s3918_s24  ;;  %v327_v13 = vld [vmem:[%s4225_s12 + $0x2c] sm:$0xf] }
 0x114   : > { %v4492_v26 = vsel %vm655_vm4, %v698_v18, %v702_v19  ;;  %v710_v3 = vor.u32 %v709_v61, %v705_v60  ;;  %v910_v18 = vrot.slane %v643_v53, 1  ;;  %v3168_v19 = vcombine.low %v342_v10, %v343_v11 }
 0x115   : > { %v3160_v22 = vcombine.low %v326_v12, %v327_v13 }
 0x116   : > { %993 = vrot.lane.b32.xlu1 %v4380_v2, %s3917_s6  ;;  %v4546_v6 = vsel %vm655_vm4, %v710_v3, %v714_v5  ;;  %v4580_v30 = vsel %vm896_vm2, %v909_v17, %v910_v18  ;;  %v520_v31 = vshrl.u32 %v3168_v19, 16  ;;  %v344_v3 = vld [vmem:[%s4225_s12 + $0x70] sm:$0xf]  ;;  %v345_v5 = vld [vmem:[%s4225_s12 + $0x74] sm:$0xf] }
 0x117   : > { %977 = vrot.lane.b32.xlu0 %v4384_v4, %s3917_s6  ;;  %v467_v36 = vshll.u32 %v3160_v22, 16 }
 0x11a   : > { %995 = vrot.lane.b32.xlu1 %v4454_v57, %s3917_s6 }
 0x11b   : > { %979 = vrot.lane.b32.xlu0 %v4458_v59, %s3917_s6 }
 0x11e   : > { %1037 = vrot.lane.b32.xlu1 %v4411_v23, %s3920_s30  ;;  %v930_v23 = vrot.slane %v4454_v57, 1 }
 0x11f   : > { %1021 = vrot.lane.b32.xlu0 %v4414_v24, %s3920_s30  ;;  %v906_v24 = vrot.slane %v4458_v59, 1 }
 0x120   : > { %v4505_v43 = vsel %vm896_vm2, %v930_v23, %v931_v33  ;;  %v464_v33 = vshrl.u32 %v3160_v22, 16  ;;  %v3169_v22 = vcombine.low %v344_v3, %v345_v5 }
 0x121   : > { %v4508_v44 = vsel %vm896_vm2, %v906_v24, %v907_v34  ;;  %v523_v24 = vshll.u32 %v3168_v19, 16 }
 0x122   : > { %1039 = vrot.lane.b32.xlu1 %v4489_v25, %s3920_s30  ;;  %v466_v35 = vrot.slane %v464_v33, 7 }
 0x123   : > { %1023 = vrot.lane.b32.xlu0 %v4492_v26, %s3920_s30 }
 0x126   : > { %1073 = vrot.lane.b32.xlu1 %v4435_v39, %s3921_s5  ;;  %v803_v39 = vshll.u32 %v4512_v45, 16 }
 0x127   : > { %1057 = vrot.lane.b32.xlu0 %v4438_v40, %s3921_s5  ;;  %v651_v40 = vsel %vm4260_vm3, %v515_v27, %v600_v46  ;;  %v3184_v46 = vcombine.low %v343_v11, %v343_v11  ;;  %v329_v11 = vld [vmem:[%s4225_s12 + $0x34] sm:$0xf] }
 0x128   : > { %v805_v56 = vrot.slane %v803_v39, 1  ;;  %v808_v58 = vshll.u32 %v651_v40, 16  ;;  %v934_v15 = vrot.slane %v651_v40, 1  ;;  %v469_v39 = vor.u32 %v467_v36, %v466_v35 }
 0x129   : > { %v3176_v40 = vcombine.low %v327_v13, %v327_v13 }
 0x12a   : > { %1075 = vrot.lane.b32.xlu1 %v4505_v43, %s3921_s5  ;;  %v806_v0 = vor.u32 %v805_v56, %v801_v55  ;;  %v810_v1 = vrot.slane %v808_v58, 1  ;;  %v4575_v27 = vsel %vm896_vm2, %v933_v14, %v934_v15  ;;  %v601_v55 = vrot.slane %v3184_v46, 3 }
 0x12b   : > { %1059 = vrot.lane.b32.xlu0 %v4508_v44, %s3921_s5  ;;  %v4612_v58 = vsel %vm4260_vm3, %v326_v12, %v469_v39  ;;  %v527_v46 = vshrl.u32 %v3169_v22, 16 }
 0x12c   : > { %v4543_v54 = vsel %vm655_vm4, %v806_v0, %v810_v1  ;;  %v719_v63 = vshll.u32 %v4612_v58, 16  ;;  %v717_v17 = vshrl.u32 %v4612_v58, 16 }
 0x12e   : > { %1105 = vrot.lane.b32.xlu1 %v4454_v57, %s3922_s18  ;;  %v721_v18 = vrot.slane %v719_v63, 1  ;;  %v529_v63 = vrot.slane %v527_v46, 7  ;;  %v3177_v46 = vcombine.low %v329_v11, %v329_v11 }
 0x12f   : > { %1089 = vrot.lane.b32.xlu0 %v4458_v59, %s3922_s18 }
 0x130   : > { %v722_v36 = vor.u32 %v721_v18, %v717_v17  ;;  %v912_v18 = vrot.slane %v4612_v58, 1 }
 0x132   : > { %1107 = vrot.lane.b32.xlu1 %v4512_v45, %s3922_s18 }
 0x133   : > { %1091 = vrot.lane.b32.xlu0 %v4516_v47, %s3922_s18 }
 0x136   : > { %1135 = vrot.lane.b32.xlu1 %v4489_v25, %s3923_s1 }
 0x137   : > { %1119 = vrot.lane.b32.xlu0 %v4492_v26, %s3923_s1 }
 0x13a   : > { %1137 = vrot.lane.b32.xlu1 %v4543_v54, %s3923_s1 }
 0x13b   : > { %1121 = vrot.lane.b32.xlu0 %v4546_v6, %s3923_s1  ;;  %v4552_v7 = vpop.permute.xlu1 %989 }
 0x13d   : > { %v4554_v9 = vpop.permute.xlu0 %973 }
 0x13e   : > { %1165 = vrot.lane.b32.xlu1 %v4505_v43, %s3924_s9 }
 0x13f   : > { %1149 = vrot.lane.b32.xlu0 %v4508_v44, %s3924_s9 }
 0x140   : > { %v4565_v16 = vpop.permute.xlu1 %942 }
 0x141   : > { %v4568_v20 = vpop.permute.xlu0 %975 }
 0x142   : > { %858 = vrot.lane.b32.xlu1 %v4489_v25, %s3919_s25 }
 0x143   : > { %842 = vrot.lane.b32.xlu0 %v4492_v26, %s3919_s25  ;;  %v522_v26 = vrot.slane %v520_v31, 7 }
 0x144   : > { %v4577_v29 = vpop.permute.xlu1 %958 }
 0x145   : > { %v4582_v23 = vpop.permute.xlu0 %956  ;;  %v525_v41 = vor.u32 %v523_v24, %v522_v26  ;;  %v652_v61 = vsel %vm4260_vm3, %v522_v26, %v601_v55 }
 0x146   : > { %1167 = vrot.lane.b32.xlu1 %v4575_v27, %s3924_s9  ;;  %v820_v14 = vshll.u32 %v652_v61, 16 }
 0x147   : > { %1151 = vrot.lane.b32.xlu0 %v4580_v30, %s3924_s9  ;;  %v4606_v53 = vsel %vm4260_vm3, %v342_v10, %v525_v41  ;;  %v328_v10 = vld [vmem:[%s4225_s12 + $0x30] sm:$0xf] }
 0x148   : > { %v4588_v25 = vpop.permute.xlu1 %991  ;;  %v813_v12 = vshrl.u32 %v4606_v53, 16  ;;  %v3161_v33 = vcombine.low %v328_v10, %v329_v11  ;;  %v822_v24 = vrot.slane %v820_v14, 1 }
 0x149   : > { %v4590_v34 = vpop.permute.xlu0 %836 }
 0x14a   : > { %860 = vrot.lane.b32.xlu1 %v4543_v54, %s3919_s25  ;;  %v474_v17 = vshll.u32 %v3161_v33, 16 }
 0x14b   : > { %844 = vrot.lane.b32.xlu0 %v4546_v6, %s3919_s25 }
 0x14c   : > { %v4596_v37 = vpop.permute.xlu1 %852 }
 0x14d   : > { %v851_v48 = vpop.permute.xlu0 %850 }
 0x14e   : > { %964 = vrot.lane.b32.xlu1 %v4505_v43, %s3918_s24  ;;  %v593_v43 = vrot.slane %v3176_v40, 3  ;;  %v471_v40 = vshrl.u32 %v3161_v33, 16  ;;  %v3185_v33 = vcombine.low %v345_v5, %v345_v5 }
 0x14f   : > { %948 = vrot.lane.b32.xlu0 %v4508_v44, %s3918_s24  ;;  %v815_v44 = vshll.u32 %v4606_v53, 16 }
 0x150   : > { %v4602_v49 = vpop.permute.xlu1 %1033  ;;  %v644_v1 = vsel %vm4260_vm3, %v466_v35, %v593_v43  ;;  %v473_v14 = vrot.slane %v471_v40, 7  ;;  %v602_v40 = vrot.slane %v3185_v33, 3 }
 0x151   : > { %v4608_v56 = vpop.permute.xlu0 %1017  ;;  %v817_v13 = vrot.slane %v815_v44, 1  ;;  %v724_v19 = vshll.u32 %v644_v1, 16 }
 0x152   : > { %966 = vrot.lane.b32.xlu1 %v4575_v27, %s3918_s24 }
 0x153   : > { %950 = vrot.lane.b32.xlu0 %v4580_v30, %s3918_s24  ;;  %v818_v26 = vor.u32 %v817_v13, %v813_v12  ;;  %v726_v41 = vrot.slane %v724_v19, 1  ;;  %v530_v12 = vshll.u32 %v3169_v22, 16  ;;  %v1191_v19 = vsel %vm1175_vm6, %v4296_v51, %v851_v48 }
 0x154   : > { %v4619_v60 = vpop.permute.xlu1 %1035  ;;  %v913_v22 = vrot.slane %v644_v1, 1  ;;  %v1222_v48 = vsel %vm1206_vm7, %v1191_v19, %v4582_v23 }
 0x155   : > { %v4624_v0 = vpop.permute.xlu0 %1019  ;;  %v4655_v55 = vsel %vm655_vm4, %v818_v26, %v822_v24  ;;  %v4658_v44 = vsel %vm655_vm4, %v722_v36, %v726_v41  ;;  %v532_v24 = vor.u32 %v530_v12, %v529_v63  ;;  %v476_v41 = vor.u32 %v474_v17, %v473_v14 }
 0x156   : > { %997 = vrot.lane.b32.xlu1 %v4512_v45, %s3917_s6  ;;  %v4685_v11 = vsel %vm896_vm2, %v912_v18, %v913_v22  ;;  %v1255_v12 = vsel %vm1237_vm8, %v1222_v48, %v4552_v7 }
 0x157   : > { %981 = vrot.lane.b32.xlu0 %v4516_v47, %s3917_s6  ;;  %v4693_v23 = vsel %vm4260_vm3, %v328_v10, %v476_v41  ;;  %v1288_v17 = vsel %vm1270_vm9, %v1255_v12, %v4602_v49 }
 0x158   : > { %v4637_v15 = vpop.permute.xlu1 %1069  ;;  %v731_v7 = vshll.u32 %v4693_v23, 16 }
 0x159   : > { %v4640_v31 = vpop.permute.xlu0 %1053  ;;  %v1321_v49 = vsel %vm1303_vm10, %v1288_v17, %v4637_v15 }
 0x15a   : > { %999 = vrot.lane.b32.xlu1 %v4606_v53, %s3917_s6 }
 0x15b   : > { %983 = vrot.lane.b32.xlu0 %v4612_v58, %s3917_s6 }
 0x15c   : > { %v4646_v35 = vpop.permute.xlu1 %1071 }
 0x15d   : > { %v4648_v39 = vpop.permute.xlu0 %1055 }
 0x15e   : > { %1041 = vrot.lane.b32.xlu1 %v4543_v54, %s3920_s30  ;;  %v936_v54 = vrot.slane %v4606_v53, 1 }
 0x15f   : > { %1025 = vrot.lane.b32.xlu0 %v4546_v6, %s3920_s30  ;;  %v937_v6 = vrot.slane %v652_v61, 1  ;;  %v1177_v61 = vsel %vm1175_vm6, %v4280_v42, %v4590_v34  ;;  %v594_v34 = vrot.slane %v3177_v46, 3  ;;  %v733_v46 = vrot.slane %v731_v7, 1 }
 0x160   : > { %v1102_v43 = vpop.permute.xlu1 %1101 }
 0x161   : > { %v1086_v13 = vpop.permute.xlu0 %1085  ;;  %v4682_v1 = vsel %vm896_vm2, %v936_v54, %v937_v6  ;;  %v4716_v19 = vsel %vm4260_vm3, %v473_v14, %v594_v34  ;;  %v1354_v14 = vsel %vm1336_vm11, %v1321_v49, %v1102_v43 }
 0x162   : > { %1043 = vrot.lane.b32.xlu1 %v4655_v55, %s3920_s30 }
 0x163   : > { %1027 = vrot.lane.b32.xlu0 %v4658_v44, %s3920_s30 }
 0x164   : > { %v4668_v26 = vpop.permute.xlu1 %1103 }
 0x165   : > { %v4670_v36 = vpop.permute.xlu0 %1087 }
 0x166   : > { %1077 = vrot.lane.b32.xlu1 %v4575_v27, %s3921_s5  ;;  %v4689_v27 = vsel %vm4260_vm3, %v344_v3, %v532_v24 }
 0x167   : > { %1061 = vrot.lane.b32.xlu0 %v4580_v30, %s3921_s5  ;;  %v1208_v30 = vsel %vm1206_vm7, %v1177_v61, %v4565_v16  ;;  %v827_v3 = vshll.u32 %v4689_v27, 16  ;;  %v4706_v16 = vsel %vm4260_vm3, %v529_v63, %v602_v40  ;;  %v825_v18 = vshrl.u32 %v4689_v27, 16 }
 0x168   : > { %v1132_v5 = vpop.permute.xlu1 %1131  ;;  %v1239_v54 = vsel %vm1237_vm8, %v1208_v30, %v4554_v9  ;;  %v1193_v63 = vsel %vm1175_vm6, %v4273_v38, %v4596_v37  ;;  %v729_v9 = vshrl.u32 %v4693_v23, 16  ;;  %v832_v33 = vshll.u32 %v4706_v16, 16 }
 0x169   : > { %v1116_v42 = vpop.permute.xlu0 %1115  ;;  %v1272_v22 = vsel %vm1270_vm9, %v1239_v54, %v4608_v56  ;;  %v829_v37 = vrot.slane %v827_v3, 1  ;;  %v1386_v15 = vsel %vm1368_vm12, %v1354_v14, %v1132_v5  ;;  %v736_v61 = vshll.u32 %v4716_v19, 16 }
 0x16a   : > { %1079 = vrot.lane.b32.xlu1 %v4682_v1, %s3921_s5  ;;  %v1305_v24 = vsel %vm1303_vm10, %v1272_v22, %v4640_v31  ;;  %v1224_v48 = vsel %vm1206_vm7, %v1193_v63, %v4577_v29  ;;  %v834_v5 = vrot.slane %v832_v33, 1  ;;  %v734_v12 = vor.u32 %v733_v46, %v729_v9 }
 0x16b   : > { %1063 = vrot.lane.b32.xlu0 %v4685_v11, %s3921_s5  ;;  %v1338_v56 = vsel %vm1336_vm11, %v1305_v24, %v1086_v13  ;;  %v830_v13 = vor.u32 %v829_v37, %v825_v18  ;;  %v1257_v29 = vsel %vm1237_vm8, %v1224_v48, %v4588_v25  ;;  %v738_v3 = vrot.slane %v736_v61, 1  ;;  %v347_v24 = vld [vmem:[%s4225_s12 + $0x7c] sm:$0xf] }
 0x16c   : > { %v1134_v10 = vpop.permute.xlu1 %1133  ;;  %v1370_v31 = vsel %vm1368_vm12, %v1338_v56, %v1116_v42  ;;  %v1290_v7 = vsel %vm1270_vm9, %v1257_v29, %v4619_v60  ;;  %v1241_v17 = vsel %vm1237_vm8, %v1208_v30, %v4568_v20  ;;  %v939_v14 = vrot.slane %v4689_v27, 1 }
 0x16d   : > { %v1118_v6 = vpop.permute.xlu0 %1117  ;;  %v1274_v63 = vsel %vm1270_vm9, %v1241_v17, %v4624_v0  ;;  %v1323_v18 = vsel %vm1303_vm10, %v1290_v7, %v4646_v35  ;;  %v4771_v20 = vsel %vm655_vm4, %v830_v13, %v834_v5  ;;  %v4777_v22 = vsel %vm655_vm4, %v734_v12, %v738_v3 }
 0x16e   : > { %1109 = vrot.lane.b32.xlu1 %v4606_v53, %s3922_s18  ;;  %v1307_v25 = vsel %vm1303_vm10, %v1274_v63, %v4648_v39  ;;  %v1356_v60 = vsel %vm1336_vm11, %v1323_v18, %v4668_v26  ;;  %v940_v37 = vrot.slane %v4706_v16, 1  ;;  %v915_v56 = vrot.slane %v4693_v23, 1 }
 0x16f   : > { %1093 = vrot.lane.b32.xlu0 %v4612_v58, %s3922_s18  ;;  %v1340_v0 = vsel %vm1336_vm11, %v1307_v25, %v4670_v36  ;;  %v1388_v35 = vsel %vm1368_vm12, %v1356_v60, %v1134_v10  ;;  %v3186_v5 = vcombine.low %v347_v24, %v347_v24 }
 0x170   : > { %v1162_v41 = vpop.permute.xlu1 %1161  ;;  %v1372_v39 = vsel %vm1368_vm12, %v1340_v0, %v1118_v6  ;;  %v346_v6 = vld [vmem:[%s4225_s12 + $0x78] sm:$0xf]  ;;  %v941_v61 = vsel %vm896_vm2, %v939_v14, %v940_v37 }
 0x171   : > { %v1146_v43 = vpop.permute.xlu0 %1145  ;;  %v1418_v40 = vsel %vm1400_vm13, %v1386_v15, %v1162_v41  ;;  %v916_v15 = vrot.slane %v4716_v19, 1  ;;  %v3170_v41 = vcombine.low %v346_v6, %v347_v24  ;;  %v603_v3 = vrot.slane %v3186_v5, 3 }
 0x172   : > { %1111 = vrot.lane.b32.xlu1 %v4689_v27, %s3922_s18  ;;  %v1402_v34 = vsel %vm1400_vm13, %v1370_v31, %v1146_v43  ;;  %3353 = vmatprep.mubr.msk.bf16.mxu1 %vm1459_vm14, %v1418_v40 }
 0x173   : > { %1095 = vrot.lane.b32.xlu0 %v4693_v23, %s3922_s18  ;;  %3337 = vmatprep.mubr.msk.bf16.mxu0 %vm1459_vm14, %v1402_v34  ;;  %v917_v16 = vsel %vm896_vm2, %v915_v56, %v916_v15  ;;  %v534_v31 = vshrl.u32 %v3170_v41, 16  ;;  %v537_v34 = vshll.u32 %v3170_v41, 16 }
 0x174   : > { %v4750_v42 = vpop.permute.xlu1 %854 }
 0x175   : > { %v4756_v54 = vpop.permute.xlu0 %838  ;;  %v536_v40 = vrot.slane %v534_v31, 7 }
 0x176   : > { %1139 = vrot.lane.b32.xlu1 %v4655_v55, %s3923_s1 }
 0x177   : > { %1123 = vrot.lane.b32.xlu0 %v4658_v44, %s3923_s1  ;;  %v539_v13 = vor.u32 %v537_v34, %v536_v40  ;;  %v654_v25 = vsel %vm4260_vm3, %v536_v40, %v603_v3  ;;  %v1195_v40 = vsel %vm1175_vm6, %v4322_v8, %v4750_v42  ;;  %v1179_v34 = vsel %vm1175_vm6, %v4292_v50, %v4756_v54 }
 0x178   : > { %v1164_v30 = vpop.permute.xlu1 %1163  ;;  %v1013_v0 = vshll.u32 %v654_v25, 16  ;;  %v1051_v56 = vrot.slane %v654_v25, 1 }
 0x179   : > { %v1420_v26 = vsel %vm1400_vm13, %v1388_v35, %v1164_v30  ;;  %v1148_v49 = vpop.permute.xlu0 %1147  ;;  %v638_v7 = vsel %vm4260_vm3, %v346_v6, %v539_v13 }
 0x17a   : > { %v1404_v9 = vsel %vm1400_vm13, %v1372_v39, %v1148_v49  ;;  %1141 = vrot.lane.b32.xlu1 %v4771_v20, %s3923_s1  ;;  %3354 = vmatmul.mubr.msk.bf16.vlgmr.msra.gmra.mrb[0].mxu1 %vm1459_vm14, %v1420_v26  ;;  %v1008_v63 = vshll.u32 %v638_v7, 16  ;;  %v1015_v26 = vrot.slane %v1013_v0, 1  ;;  %v1050_v37 = vrot.slane %v638_v7, 1 }
 0x17b   : > { %1125 = vrot.lane.b32.xlu0 %v4777_v22, %s3923_s1  ;;  %3338 = vmatmul.mubr.msk.bf16.vlgmr.msra.gmra.mrb[0].mxu0 %vm1459_vm14, %v1404_v9 }
 0x17c   : > { %v4788_v36 = vpop.permute.xlu1 %856  ;;  %v1010_v60 = vrot.slane %v1008_v63, 1 }
 0x17d   : > { %v4790_v10 = vpop.permute.xlu0 %840 }
 0x17e   : > { %1169 = vrot.lane.b32.xlu1 %v4682_v1, %s3924_s9 }
 0x17f   : > { %1153 = vrot.lane.b32.xlu0 %v4685_v11, %s3924_s9 }
 0x180   : > { %v4800_v33 = vpop.permute.xlu1 %960 }
 0x181   : > { %v4804_v46 = vpop.permute.xlu0 %944  ;;  %v1226_v13 = vsel %vm1206_vm7, %v1195_v40, %v4800_v33 }
 0x182   : > { %862 = vrot.lane.b32.xlu1 %v4655_v55, %s3919_s25 }
 0x183   : > { %846 = vrot.lane.b32.xlu0 %v4658_v44, %s3919_s25 }
 0x184   : > { %v4811_v48 = vpop.permute.xlu1 %962 }
 0x185   : > { %v4814_v43 = vpop.permute.xlu0 %946 }
 0x186   : > { %1171 = vrot.lane.b32.xlu1 %v941_v61, %s3924_s9 }
 0x187   : > { %1155 = vrot.lane.b32.xlu0 %v917_v16, %s3924_s9 }
 0x188   : > { %v994_v19 = vpop.permute.xlu1 %993 }
 0x189   : > { %v978_v55 = vpop.permute.xlu0 %977 }
 0x18a   : > { %864 = vrot.lane.b32.xlu1 %v4771_v20, %s3919_s25 }
 0x18b   : > { %848 = vrot.lane.b32.xlu0 %v4777_v22, %s3919_s25 }
 0x18c   : > { %v4822_v44 = vpop.permute.xlu1 %995 }
 0x18d   : > { %v4824_v29 = vpop.permute.xlu0 %979 }
 0x18e   : > { %968 = vrot.lane.b32.xlu1 %v4682_v1, %s3918_s24 }
 0x18f   : > { %952 = vrot.lane.b32.xlu0 %v4685_v11, %s3918_s24  ;;  %v1006_v11 = vshrl.u32 %v638_v7, 16 }
 0x190   : > { %v1038_v12 = vpop.permute.xlu1 %1037 }
 0x191   : > { %v1022_v17 = vpop.permute.xlu0 %1021  ;;  %v1011_v39 = vor.u32 %v1010_v60, %v1006_v11 }
 0x192   : > { %970 = vrot.lane.b32.xlu1 %v941_v61, %s3918_s24 }
 0x193   : > { %954 = vrot.lane.b32.xlu0 %v917_v16, %s3918_s24  ;;  %v1016_v6 = vsel %vm655_vm4, %v1011_v39, %v1015_v26 }
 0x194   : > { %v4834_v18 = vpop.permute.xlu1 %1039 }
 0x195   : > { %v4838_v1 = vpop.permute.xlu0 %1023 }
 0x196   : > { %1001 = vrot.lane.b32.xlu1 %v4689_v27, %s3917_s6 }
 0x197   : > { %985 = vrot.lane.b32.xlu0 %v4693_v23, %s3917_s6 }
 0x198   : > { %v1074_v35 = vpop.permute.xlu1 %1073 }
 0x199   : > { %v1058_v30 = vpop.permute.xlu0 %1057 }
 0x19a   : > { %1003 = vrot.lane.b32.xlu1 %v638_v7, %s3917_s6 }
 0x19b   : > { %987 = vrot.lane.b32.xlu0 %v4296_v51, %s3917_s6 }
 0x19c   : > { %v1076_v49 = vpop.permute.xlu1 %1075 }
 0x19d   : > { %v1060_v9 = vpop.permute.xlu0 %1059 }
 0x19e   : > { %1045 = vrot.lane.b32.xlu1 %v4771_v20, %s3920_s30  ;;  %v1052_v20 = vsel %vm896_vm2, %v1050_v37, %v1051_v56 }
 0x19f   : > { %1029 = vrot.lane.b32.xlu0 %v4777_v22, %s3920_s30 }
 0x1a0   : > { %v1106_v24 = vpop.permute.xlu1 %1105 }
 0x1a1   : > { %v1090_v14 = vpop.permute.xlu0 %1089 }
 0x1a2   : > { %1047 = vrot.lane.b32.xlu1 %v1016_v6, %s3920_s30 }
 0x1a3   : > { %1031 = vrot.lane.b32.xlu0 %v4347_v32, %s3920_s30 }
 0x1a4   : > { %v1108_v15 = vpop.permute.xlu1 %1107 }
 0x1a5   : > { %v1092_v41 = vpop.permute.xlu0 %1091 }
 0x1a6   : > { %1081 = vrot.lane.b32.xlu1 %v941_v61, %s3921_s5  ;;  %v1210_v61 = vsel %vm1206_vm7, %v1179_v34, %v4804_v46 }
 0x1a7   : > { %1065 = vrot.lane.b32.xlu0 %v917_v16, %s3921_s5  ;;  %v1259_v16 = vsel %vm1237_vm8, %v1226_v13, %v994_v19  ;;  %v1243_v8 = vsel %vm1237_vm8, %v1210_v61, %v978_v55 }
 0x1a8   : > { %v1136_v22 = vpop.permute.xlu1 %1135  ;;  %v1292_v42 = vsel %vm1270_vm9, %v1259_v16, %v1038_v12  ;;  %v1276_v63 = vsel %vm1270_vm9, %v1243_v8, %v1022_v17 }
 0x1a9   : > { %v1120_v31 = vpop.permute.xlu0 %1119  ;;  %v1325_v50 = vsel %vm1303_vm10, %v1292_v42, %v1074_v35  ;;  %v1309_v54 = vsel %vm1303_vm10, %v1276_v63, %v1058_v30 }
 0x1aa   : > { %1083 = vrot.lane.b32.xlu1 %v1052_v20, %s3921_s5  ;;  %v1358_v33 = vsel %vm1336_vm11, %v1325_v50, %v1106_v24  ;;  %v1342_v46 = vsel %vm1336_vm11, %v1309_v54, %v1090_v14 }
 0x1ab   : > { %1067 = vrot.lane.b32.xlu0 %v4314_v62, %s3921_s5  ;;  %v1390_v19 = vsel %vm1368_vm12, %v1358_v33, %v1136_v22  ;;  %v1374_v12 = vsel %vm1368_vm12, %v1342_v46, %v1120_v31 }
 0x1ac   : > { %v1138_v5 = vpop.permute.xlu1 %1137 }
 0x1ad   : > { %v1122_v3 = vpop.permute.xlu0 %1121 }
 0x1ae   : > { %1113 = vrot.lane.b32.xlu1 %v638_v7, %s3922_s18  ;;  %v1197_v7 = vsel %vm1175_vm6, %v4380_v2, %v4788_v36 }
 0x1af   : > { %1097 = vrot.lane.b32.xlu0 %v4296_v51, %s3922_s18  ;;  %v1181_v51 = vsel %vm1175_vm6, %v4384_v4, %v4790_v10  ;;  %v1228_v60 = vsel %vm1206_vm7, %v1197_v7, %v4811_v48 }
 0x1b0   : > { %v1166_v55 = vpop.permute.xlu1 %1165  ;;  %v1212_v2 = vsel %vm1206_vm7, %v1181_v51, %v4814_v43 }
 0x1b1   : > { %v1422_v17 = vsel %vm1400_vm13, %v1390_v19, %v1166_v55  ;;  %v1150_v25 = vpop.permute.xlu0 %1149  ;;  %v1245_v0 = vsel %vm1237_vm8, %v1212_v2, %v4824_v29 }
 0x1b2   : > { %v1406_v11 = vsel %vm1400_vm13, %v1374_v12, %v1150_v25  ;;  %1127 = vrot.lane.b32.xlu1 %v4347_v32, %s3923_s1  ;;  %3357 = vmatprep.mubr.msk.bf16.mxu1 %vm1459_vm14, %v1422_v17  ;;  %v1261_v32 = vsel %vm1237_vm8, %v1228_v60, %v4822_v44  ;;  %v1278_v48 = vsel %vm1270_vm9, %v1245_v0, %v4838_v1 }
 0x1b3   : > { %1099 = vrot.lane.b32.xlu0 %v4273_v38, %s3922_s18  ;;  %3341 = vmatprep.mubr.msk.bf16.mxu0 %vm1459_vm14, %v1406_v11  ;;  %v1294_v4 = vsel %vm1270_vm9, %v1261_v32, %v4834_v18  ;;  %v1311_v43 = vsel %vm1303_vm10, %v1278_v48, %v1060_v9 }
 0x1b4   : > { %v859_v36 = vpop.permute.xlu1 %858  ;;  %v1327_v38 = vsel %vm1303_vm10, %v1294_v4, %v1076_v49  ;;  %v1344_v29 = vsel %vm1336_vm11, %v1311_v43, %v1092_v41 }
 0x1b5   : > { %v843_v10 = vpop.permute.xlu0 %842  ;;  %v1360_v44 = vsel %vm1336_vm11, %v1327_v38, %v1108_v15  ;;  %v1376_v30 = vsel %vm1368_vm12, %v1344_v29, %v1122_v3  ;;  %v1199_v63 = vsel %vm1175_vm6, %v4454_v57, %v859_v36 }
 0x1b6   : > { %1129 = vrot.lane.b32.xlu1 %v4343_v28, %s3923_s1  ;;  %v1392_v35 = vsel %vm1368_vm12, %v1360_v44, %v1138_v5  ;;  %v1183_v50 = vsel %vm1175_vm6, %v4458_v59, %v843_v10 }
 0x1b7   : > { %1143 = vrot.lane.b32.xlu0 %v1016_v6, %s3923_s1 }
 0x1b8   : > { %v1168_v18 = vpop.permute.xlu1 %1167 }
 0x1b9   : > { %v1424_v1 = vsel %vm1400_vm13, %v1392_v35, %v1168_v18  ;;  %v1152_v39 = vpop.permute.xlu0 %1151 }
 0x1ba   : > { %v1408_v26 = vsel %vm1400_vm13, %v1376_v30, %v1152_v39  ;;  %1173 = vrot.lane.b32.xlu1 %v1052_v20, %s3924_s9  ;;  %3358 = vmatmul.mubr.msk.bf16.gmra.mrb[4].mxu1 %vm1459_vm14, %v1424_v1 }
 0x1bb   : > { %1157 = vrot.lane.b32.xlu0 %v4314_v62, %s3924_s9  ;;  %3342 = vmatmul.mubr.msk.bf16.gmra.mrb[4].mxu0 %vm1459_vm14, %v1408_v26 }
 0x1bc   : > { %v861_v28 = vpop.permute.xlu1 %860 }
 0x1bd   : > { %v845_v49 = vpop.permute.xlu0 %844  ;;  %v1201_v0 = vsel %vm1175_vm6, %v4512_v45, %v861_v28 }
 0x1be   : > { %v1185_v10 = vsel %vm1175_vm6, %v4516_v47, %v845_v49 }
 0x1bf   : > { %1159 = vrot.lane.b32.xlu0 %v4299_v52, %s3924_s9 }
 0x1c0   : > { %v965_v9 = vpop.permute.xlu1 %964 }
 0x1c1   : > { %v949_v6 = vpop.permute.xlu0 %948  ;;  %v1230_v54 = vsel %vm1206_vm7, %v1199_v63, %v965_v9 }
 0x1c2   : > { %v1214_v33 = vsel %vm1206_vm7, %v1183_v50, %v949_v6 }
 0x1c4   : > { %v967_v24 = vpop.permute.xlu1 %966 }
 0x1c5   : > { %v951_v14 = vpop.permute.xlu0 %950  ;;  %v1232_v48 = vsel %vm1206_vm7, %v1201_v0, %v967_v24 }
 0x1c6   : > { %v1216_v38 = vsel %vm1206_vm7, %v1185_v10, %v951_v14 }
 0x1c8   : > { %v998_v37 = vpop.permute.xlu1 %997 }
 0x1c9   : > { %v982_v56 = vpop.permute.xlu0 %981  ;;  %v1263_v46 = vsel %vm1237_vm8, %v1230_v54, %v998_v37 }
 0x1ca   : > { %v1247_v55 = vsel %vm1237_vm8, %v1214_v33, %v982_v56 }
 0x1cc   : > { %v1000_v15 = vpop.permute.xlu1 %999 }
 0x1cd   : > { %v984_v41 = vpop.permute.xlu0 %983  ;;  %v1265_v43 = vsel %vm1237_vm8, %v1232_v48, %v1000_v15 }
 0x1ce   : > { %v1249_v29 = vsel %vm1237_vm8, %v1216_v38, %v984_v41 }
 0x1d0   : > { %v1042_v20 = vpop.permute.xlu1 %1041 }
 0x1d1   : > { %v1026_v22 = vpop.permute.xlu0 %1025  ;;  %v1296_v12 = vsel %vm1270_vm9, %v1263_v46, %v1042_v20 }
 0x1d2   : > { %v1280_v25 = vsel %vm1270_vm9, %v1247_v55, %v1026_v22 }
 0x1d4   : > { %v1044_v31 = vpop.permute.xlu1 %1043 }
 0x1d5   : > { %v1028_v40 = vpop.permute.xlu0 %1027  ;;  %v1298_v45 = vsel %vm1270_vm9, %v1265_v43, %v1044_v31 }
 0x1d6   : > { %v1282_v18 = vsel %vm1270_vm9, %v1249_v29, %v1028_v40 }
 0x1d8   : > { %v1078_v62 = vpop.permute.xlu1 %1077 }
 0x1d9   : > { %v1062_v34 = vpop.permute.xlu0 %1061  ;;  %v1329_v7 = vsel %vm1303_vm10, %v1296_v12, %v1078_v62 }
 0x1da   : > { %v1313_v57 = vsel %vm1303_vm10, %v1280_v25, %v1062_v34 }
 0x1dc   : > { %v1080_v13 = vpop.permute.xlu1 %1079 }
 0x1dd   : > { %v1064_v61 = vpop.permute.xlu0 %1063  ;;  %v1331_v30 = vsel %vm1303_vm10, %v1298_v45, %v1080_v13 }
 0x1de   : > { %v1315_v47 = vsel %vm1303_vm10, %v1282_v18, %v1064_v61 }
 0x1e0   : > { %v1110_v16 = vpop.permute.xlu1 %1109 }
 0x1e1   : > { %v1094_v5 = vpop.permute.xlu0 %1093  ;;  %v1362_v59 = vsel %vm1336_vm11, %v1329_v7, %v1110_v16 }
 0x1e2   : > { %v1346_v11 = vsel %vm1336_vm11, %v1313_v57, %v1094_v5 }
 0x1e4   : > { %v1112_v8 = vpop.permute.xlu1 %1111 }
 0x1e5   : > { %v1096_v52 = vpop.permute.xlu0 %1095  ;;  %v1364_v1 = vsel %vm1336_vm11, %v1331_v30, %v1112_v8 }
 0x1e6   : > { %v1348_v39 = vsel %vm1336_vm11, %v1315_v47, %v1096_v52 }
 0x1e8   : > { %v1140_v42 = vpop.permute.xlu1 %1139 }
 0x1e9   : > { %v1124_v3 = vpop.permute.xlu0 %1123  ;;  %v1394_v51 = vsel %vm1368_vm12, %v1362_v59, %v1140_v42 }
 0x1ea   : > { %v1378_v2 = vsel %vm1368_vm12, %v1346_v11, %v1124_v3 }
 0x1ec   : > { %v1142_v19 = vpop.permute.xlu1 %1141 }
 0x1ed   : > { %v1126_v17 = vpop.permute.xlu0 %1125  ;;  %v1396_v26 = vsel %vm1368_vm12, %v1364_v1, %v1142_v19 }
 0x1ee   : > { %v1380_v49 = vsel %vm1368_vm12, %v1348_v39, %v1126_v17 }
 0x1f0   : > { %v1170_v60 = vpop.permute.xlu1 %1169 }
 0x1f1   : > { %v1426_v32 = vsel %vm1400_vm13, %v1394_v51, %v1170_v60  ;;  %v1154_v36 = vpop.permute.xlu0 %1153 }
 0x1f2   : > { %v1410_v4 = vsel %vm1400_vm13, %v1378_v2, %v1154_v36  ;;  %3361 = vmatprep.mubr.msk.bf16.mxu1 %vm1459_vm14, %v1426_v32 }
 0x1f3   : > { %3345 = vmatprep.mubr.msk.bf16.mxu0 %vm1459_vm14, %v1410_v4 }
 0x1f4   : > { %v863_v44 = vpop.permute.xlu1 %862 }
 0x1f5   : > { %v847_v35 = vpop.permute.xlu0 %846  ;;  %v1203_v33 = vsel %vm1175_vm6, %v4606_v53, %v863_v44 }
 0x1f6   : > { %v1187_v19 = vsel %vm1175_vm6, %v4612_v58, %v847_v35 }
 0x1f8   : > { %v1172_v28 = vpop.permute.xlu1 %1171 }
 0x1f9   : > { %v1428_v9 = vsel %vm1400_vm13, %v1396_v26, %v1172_v28  ;;  %v1156_v6 = vpop.permute.xlu0 %1155 }
 0x1fa   : > { %v1412_v24 = vsel %vm1400_vm13, %v1380_v49, %v1156_v6  ;;  %3362 = vmatmul.mubr.msk.bf16.gmra.mrb[8].mxu1 %vm1459_vm14, %v1428_v9  ;;  %v5008_v49 = vld [vmem:[#allocation8] ss:$0 sm:$0xff] }
 0x1fb   : > { %3346 = vmatmul.mubr.msk.bf16.gmra.mrb[8].mxu0 %vm1459_vm14, %v1412_v24 }
 0x1fc   : > { %v865_v14 = vpop.permute.xlu1 %864 }
 0x1fd   : > { %v849_v37 = vpop.permute.xlu0 %848  ;;  %v1205_v46 = vsel %vm1175_vm6, %v4689_v27, %v865_v14 }
 0x1fe   : > { %v1189_v2 = vsel %vm1175_vm6, %v4693_v23, %v849_v37 }
 0x200   : > { %v969_v56 = vpop.permute.xlu1 %968 }
 0x201   : > { %v953_v15 = vpop.permute.xlu0 %952  ;;  %v1234_v55 = vsel %vm1206_vm7, %v1203_v33, %v969_v56 }
 0x202   : > { %v1218_v17 = vsel %vm1206_vm7, %v1187_v19, %v953_v15 }
 0x204   : > { %v971_v41 = vpop.permute.xlu1 %970 }
 0x205   : > { %v955_v20 = vpop.permute.xlu0 %954  ;;  %v1236_v12 = vsel %vm1206_vm7, %v1205_v46, %v971_v41 }
 0x206   : > { %v1220_v4 = vsel %vm1206_vm7, %v1189_v2, %v955_v20  ;;  %vm2172_vm7 = vcmask 57344  }
 0x208   : > { %v1002_v22 = vpop.permute.xlu1 %1001 }
 0x209   : > { %v986_v31 = vpop.permute.xlu0 %985  ;;  %v1267_v25 = vsel %vm1237_vm8, %v1234_v55, %v1002_v22 }
 0x20a   : > { %v1251_v59 = vsel %vm1237_vm8, %v1218_v17, %v986_v31 }
 0x20c   : > { %v1004_v40 = vpop.permute.xlu1 %1003 }
 0x20d   : > { %v988_v62 = vpop.permute.xlu0 %987  ;;  %v1269_v7 = vsel %vm1237_vm8, %v1236_v12, %v1004_v40 }
 0x20e   : > { %v1253_v44 = vsel %vm1237_vm8, %v1220_v4, %v988_v62 }
 0x210   : > { %v1046_v34 = vpop.permute.xlu1 %1045 }
 0x211   : > { %v1030_v13 = vpop.permute.xlu0 %1029  ;;  %v1300_v53 = vsel %vm1270_vm9, %v1267_v25, %v1046_v34 }
 0x212   : > { %v1284_v58 = vsel %vm1270_vm9, %v1251_v59, %v1030_v13 }
 0x214   : > { %v1048_v61 = vpop.permute.xlu1 %1047 }
 0x215   : > { %v1032_v16 = vpop.permute.xlu0 %1031  ;;  %v1302_v27 = vsel %vm1270_vm9, %v1269_v7, %v1048_v61 }
 0x216   : > { %v1286_v18 = vsel %vm1270_vm9, %v1253_v44, %v1032_v16  ;;  %vm2169_vm9 = vcmask 60416  }
 0x218   : > { %v1082_v5 = vpop.permute.xlu1 %1081 }
 0x219   : > { %v1066_v8 = vpop.permute.xlu0 %1065  ;;  %v1333_v51 = vsel %vm1303_vm10, %v1300_v53, %v1082_v5 }
 0x21a   : > { %v1317_v32 = vsel %vm1303_vm10, %v1284_v58, %v1066_v8 }
 0x21c   : > { %v1084_v52 = vpop.permute.xlu1 %1083 }
 0x21d   : > { %v1068_v42 = vpop.permute.xlu0 %1067  ;;  %v1335_v60 = vsel %vm1303_vm10, %v1302_v27, %v1084_v52 }
 0x21e   : > { %v1319_v47 = vsel %vm1303_vm10, %v1286_v18, %v1068_v42 }
 0x220   : > { %v1114_v3 = vpop.permute.xlu1 %1113 }
 0x221   : > { %v1098_v63 = vpop.permute.xlu0 %1097  ;;  %v1366_v36 = vsel %vm1336_vm11, %v1333_v51, %v1114_v3  ;;  %v1367_v0 = vsel %vm1336_vm11, %v1335_v60, %v1114_v3 }
 0x222   : > { %v1350_v10 = vsel %vm1336_vm11, %v1317_v32, %v1098_v63 }
 0x224   : > { %v1128_v50 = vpop.permute.xlu1 %1127 }
 0x225   : > { %v1100_v54 = vpop.permute.xlu0 %1099  ;;  %v1382_v29 = vsel %vm1368_vm12, %v1350_v10, %v1128_v50 }
 0x226   : > { %v1352_v1 = vsel %vm1336_vm11, %v1319_v47, %v1100_v54 }
 0x228   : > { %v1130_v57 = vpop.permute.xlu1 %1129 }
 0x229   : > { %v1144_v11 = vpop.permute.xlu0 %1143  ;;  %v1384_v39 = vsel %vm1368_vm12, %v1352_v1, %v1130_v57 }
 0x22a   : > { %v1398_v48 = vsel %vm1368_vm12, %v1366_v36, %v1144_v11  ;;  %v1399_v38 = vsel %vm1368_vm12, %v1367_v0, %v1144_v11 }
 0x22c   : > { %v1174_v43 = vpop.permute.xlu1 %1173 }
 0x22d   : > { %v1430_v23 = vsel %vm1400_vm13, %v1398_v48, %v1174_v43  ;;  %v1431_v45 = vsel %vm1400_vm13, %v1399_v38, %v1174_v43  ;;  %v1158_v35 = vpop.permute.xlu0 %1157 }
 0x22e   : > { %v1414_v30 = vsel %vm1400_vm13, %v1382_v29, %v1158_v35  ;;  %3365 = vmatprep.mubr.msk.bf16.mxu1 %vm1459_vm14, %v1430_v23 }
 0x22f   : > { %3349 = vmatprep.mubr.msk.bf16.mxu0 %vm1459_vm14, %v1414_v30  ;;  %3366 = vmatmul.mubr.msk.bf16.gmra.mrb[12].mxu1 %vm1459_vm14, %v1431_v45 }
 0x231   : > { %v1160_v26 = vpop.permute.xlu0 %1159 }
 0x232   : > { %v1416_v28 = vsel %vm1400_vm13, %v1384_v39, %v1160_v26 }
 0x233   : > { %3350 = vmatmul.mubr.msk.bf16.gmra.mrb[12].mxu0 %vm1459_vm14, %v1416_v28 }
 0x24d   : > { %v3355_v9 = vpop.f32.mrb[0].mxu1 }
 0x24e   : > { %v3339_v6 = vpop.f32.mrb[0].mxu0  ;;  %v1603_v24 = vadd.f32 %v3355_v9, %v5008_v49  ;;  %v1594_v14 = vpop.f32.mrb[1].mxu1 }
 0x24f   : > { %v1539_v37 = vadd.f32 %v3339_v6, %v5008_v49  ;;  %v1530_v56 = vpop.f32.mrb[1].mxu0  ;;  %v1595_v15 = vadd.f32 %v5008_v49, %v1594_v14  ;;  %v3356_v41 = vpop.f32.mrb[2].mxu1 }
 0x250   : > { %vm1675_vm15 = vcmp.ge.f32.partialorder %v1603_v24, 0.0  ;;  %v1707_v20 = vmul.f32 0.2, %v1603_v24  ;;  %v1531_v22 = vadd.f32 %v5008_v49, %v1530_v56  ;;  %v3340_v31 = vpop.f32.mrb[2].mxu0  ;;  %v1606_v40 = vadd.f32 %v3356_v41, %v5008_v49  ;;  %v1597_v62 = vpop.f32.mrb[3].mxu1 }
 0x251   : > { %v1691_v34 = vmul.f32 0.2, %v1539_v37  ;;  %vm1659_vm0 = vcmp.ge.f32.partialorder %v1539_v37, 0.0  ;;  %vm1673_vm1 = vcmp.ge.f32.partialorder %v1595_v15, 0.0  ;;  %v1542_v13 = vadd.f32 %v3340_v31, %v5008_v49  ;;  %v1533_v61 = vpop.f32.mrb[3].mxu0 }
 0x252   : > { %v1739_v16 = vsel %vm1675_vm15, %v1603_v24, %v1707_v20  ;;  %v1705_v5 = vmul.f32 0.2, %v1595_v15  ;;  %vm1676_vm2 = vcmp.ge.f32.partialorder %v1606_v40, 0.0  ;;  %v1708_v8 = vmul.f32 0.2, %v1606_v40 }
 0x253   : > { %v1689_v52 = vmul.f32 0.2, %v1531_v22  ;;  %vm1660_vm4 = vcmp.ge.f32.partialorder %v1542_v13, 0.0  ;;  %v1692_v42 = vmul.f32 0.2, %v1542_v13  ;;  %v1534_v3 = vadd.f32 %v5008_v49, %v1533_v61 }
 0x254   : > { %v1723_v63 = vsel %vm1659_vm0, %v1539_v37, %v1691_v34  ;;  %vm1657_vm5 = vcmp.ge.f32.partialorder %v1531_v22, 0.0  ;;  %v1740_v50 = vsel %vm1676_vm2, %v1606_v40, %v1708_v8  ;;  %v1598_v54 = vadd.f32 %v5008_v49, %v1597_v62 }
 0x255   : > { %v1724_v33 = vsel %vm1660_vm4, %v1542_v13, %v1692_v42  ;;  %v1762_v46 = vpack.c.bf16 %v1740_v50, %v1739_v16  ;;  %vm1658_vm6 = vcmp.ge.f32.partialorder %v1534_v3, 0.0  ;;  %v1690_v19 = vmul.f32 0.2, %v1534_v3 }
 0x256   : > { %v1754_v55 = vpack.c.bf16 %v1724_v33, %v1723_v63  ;;  %vm1674_vm8 = vcmp.ge.f32.partialorder %v1598_v54, 0.0  ;;  %v1706_v12 = vmul.f32 0.2, %v1598_v54  ;;  %v1721_v17 = vsel %vm1657_vm5, %v1531_v22, %v1689_v52 }
 0x257   : > { %v1833_v25 = vshrl.u32 %v1762_v46, 16  ;;  %v1722_v7 = vsel %vm1658_vm6, %v1534_v3, %v1690_v19  ;;  %v1737_v57 = vsel %vm1673_vm1, %v1595_v15, %v1705_v5  ;;  %v1836_v53 = vshll.u32 %v1762_v46, 16 }
 0x258   : > { %v1777_v59 = vshrl.u32 %v1754_v55, 16  ;;  %v1753_v27 = vpack.c.bf16 %v1722_v7, %v1721_v17  ;;  %v1780_v11 = vshll.u32 %v1754_v55, 16  ;;  %v1938_v51 = vrot.slane %v1762_v46, 7 }
 0x259   : > { %v1835_v58 = vrot.slane %v1833_v25, 7  ;;  %v1738_v60 = vsel %vm1674_vm8, %v1598_v54, %v1706_v12  ;;  %v1930_v32 = vrot.slane %v1754_v55, 7 }
 0x25a   : > { %v1779_v2 = vrot.slane %v1777_v59, 7  ;;  %v1770_v36 = vshrl.u32 %v1753_v27, 16  ;;  %v1773_v0 = vshll.u32 %v1753_v27, 16  ;;  %v1929_v48 = vrot.slane %v1753_v27, 7 }
 0x25b   : > { %v1838_v4 = vor.u32 %v1836_v53, %v1835_v58  ;;  %v1986_v10 = vsel %vm4260_vm3, %v1835_v58, %v1938_v51  ;;  %v1761_v38 = vpack.c.bf16 %v1738_v60, %v1737_v57 }
 0x25c   : > { %v1782_v43 = vor.u32 %v1780_v11, %v1779_v2  ;;  %v1978_v44 = vsel %vm4260_vm3, %v1779_v2, %v1930_v32  ;;  %v3236_v29 = vcombine.low %v1986_v10, %v1986_v10  ;;  %v1772_v23 = vrot.slane %v1770_v36, 7 }
 0x25d   : > { %v3212_v45 = vcombine.low %v1978_v44, %v1978_v44  ;;  %v1970_v35 = vsel %vm4260_vm3, %v1762_v46, %v1838_v4  ;;  %v1826_v18 = vshrl.u32 %v1761_v38, 16  ;;  %v1829_v30 = vshll.u32 %v1761_v38, 16 }
 0x25e   : > { %v1962_v47 = vsel %vm4260_vm3, %v1754_v55, %v1782_v43  ;;  %v3234_v1 = vcombine.low %v1970_v35, %v1970_v35  ;;  %v3235_v39 = vcombine.high %v1970_v35, %v1970_v35  ;;  %2203 = vst.msk [vmem:[#allocation2 + $0x80] sm:$0x1] %vm2172_vm7, %v3236_v29  ;;  %v1775_v26 = vor.u32 %v1773_v0, %v1772_v23 }
 0x25f   : > { %v3210_v28 = vcombine.low %v1962_v47, %v1962_v47  ;;  %v3211_v9 = vcombine.high %v1962_v47, %v1962_v47  ;;  %2179 = vst.msk [vmem:[#allocation2 + $0x20] sm:$0x1] %vm2172_vm7, %v3212_v45  ;;  %v1977_v6 = vsel %vm4260_vm3, %v1772_v23, %v1929_v48  ;;  %v1828_v24 = vrot.slane %v1826_v18, 7 }
 0x260   : > { %2201 = vst.msk [vmem:[#allocation2 + $0x78] sm:$0xf] %vm2169_vm9, %v3234_v1  ;;  %2202 = vst.msk [vmem:[#allocation2 + $0x7c] sm:$0xf] %vm2169_vm9, %v3235_v39  ;;  %v1961_v14 = vsel %vm4260_vm3, %v1753_v27, %v1775_v26  ;;  %v3209_v37 = vcombine.low %v1977_v6, %v1977_v6  ;;  %v1937_v56 = vrot.slane %v1761_v38, 7 }
 0x261   : > { %2177 = vst.msk [vmem:[#allocation2 + $0x18] sm:$0xf] %vm2169_vm9, %v3210_v28  ;;  %2178 = vst.msk [vmem:[#allocation2 + $0x1c] sm:$0xf] %vm2169_vm9, %v3211_v9  ;;  %v3207_v15 = vcombine.low %v1961_v14, %v1961_v14  ;;  %v3208_v41 = vcombine.high %v1961_v14, %v1961_v14  ;;  %v1831_v20 = vor.u32 %v1829_v30, %v1828_v24 }
 0x262   : > { %2173 = vst.msk [vmem:[#allocation2 + $0x8] sm:$0x1] %vm2172_vm7, %v3209_v37  ;;  %2176 = vst.msk [vmem:[#allocation2 + $0x14] sm:$0x1] %vm2172_vm7, %v3209_v37  ;;  %v1985_v22 = vsel %vm4260_vm3, %v1828_v24, %v1937_v56 }
 0x263   : > { %2170 = vst.msk [vmem:[#allocation2] sm:$0xf] %vm2169_vm9, %v3207_v15  ;;  %2171 = vst.msk [vmem:[#allocation2 + $0x4] sm:$0xf] %vm2169_vm9, %v3208_v41  ;;  %v1969_v31 = vsel %vm4260_vm3, %v1761_v38, %v1831_v20  ;;  %v3233_v40 = vcombine.low %v1985_v22, %v1985_v22 }
 0x264   : > { %2174 = vst.msk [vmem:[#allocation2 + $0xc] sm:$0xf] %vm2169_vm9, %v3207_v15  ;;  %2175 = vst.msk [vmem:[#allocation2 + $0x10] sm:$0xf] %vm2169_vm9, %v3208_v41  ;;  %v3231_v62 = vcombine.low %v1969_v31, %v1969_v31  ;;  %v3232_v34 = vcombine.high %v1969_v31, %v1969_v31 }
 0x265   : > { %2200 = vst.msk [vmem:[#allocation2 + $0x74] sm:$0x1] %vm2172_vm7, %v3233_v40 }
 0x266   : > { %2198 = vst.msk [vmem:[#allocation2 + $0x6c] sm:$0xf] %vm2169_vm9, %v3231_v62  ;;  %2199 = vst.msk [vmem:[#allocation2 + $0x70] sm:$0xf] %vm2169_vm9, %v3232_v34 }
 0x28d   : > { %v3359_v13 = vpop.f32.mrb[4].mxu1 }
 0x28e   : > { %v3343_v61 = vpop.f32.mrb[4].mxu0  ;;  %v1619_v16 = vadd.f32 %v3359_v13, %v5008_v49  ;;  %v1610_v5 = vpop.f32.mrb[5].mxu1 }
 0x28f   : > { %v1555_v8 = vadd.f32 %v3343_v61, %v5008_v49  ;;  %v1546_v52 = vpop.f32.mrb[5].mxu0  ;;  %v1611_v42 = vadd.f32 %v5008_v49, %v1610_v5  ;;  %v3360_v3 = vpop.f32.mrb[6].mxu1 }
 0x290   : > { %vm1679_vm10 = vcmp.ge.f32.partialorder %v1619_v16, 0.0  ;;  %v1711_v63 = vmul.f32 0.2, %v1619_v16  ;;  %v1547_v50 = vadd.f32 %v5008_v49, %v1546_v52  ;;  %v3344_v54 = vpop.f32.mrb[6].mxu0  ;;  %v1622_v33 = vadd.f32 %v3360_v3, %v5008_v49  ;;  %v1613_v46 = vpop.f32.mrb[7].mxu1 }
 0x291   : > { %v1695_v19 = vmul.f32 0.2, %v1555_v8  ;;  %vm1663_vm11 = vcmp.ge.f32.partialorder %v1555_v8, 0.0  ;;  %vm1677_vm12 = vcmp.ge.f32.partialorder %v1611_v42, 0.0  ;;  %v1558_v55 = vadd.f32 %v3344_v54, %v5008_v49  ;;  %v1549_v12 = vpop.f32.mrb[7].mxu0 }
 0x292   : > { %v1743_v17 = vsel %vm1679_vm10, %v1619_v16, %v1711_v63  ;;  %v1709_v25 = vmul.f32 0.2, %v1611_v42  ;;  %vm1680_vm13 = vcmp.ge.f32.partialorder %v1622_v33, 0.0  ;;  %v1712_v7 = vmul.f32 0.2, %v1622_v33 }
 0x293   : > { %v1693_v57 = vmul.f32 0.2, %v1547_v50  ;;  %vm1664_vm14 = vcmp.ge.f32.partialorder %v1558_v55, 0.0  ;;  %v1696_v59 = vmul.f32 0.2, %v1558_v55  ;;  %v1550_v53 = vadd.f32 %v5008_v49, %v1549_v12 }
 0x294   : > { %v1727_v27 = vsel %vm1663_vm11, %v1555_v8, %v1695_v19  ;;  %vm1661_vm15 = vcmp.ge.f32.partialorder %v1547_v50, 0.0  ;;  %v1744_v11 = vsel %vm1680_vm13, %v1622_v33, %v1712_v7  ;;  %v1614_v58 = vadd.f32 %v5008_v49, %v1613_v46 }
 0x295   : > { %v1728_v51 = vsel %vm1664_vm14, %v1558_v55, %v1696_v59  ;;  %v1764_v60 = vpack.c.bf16 %v1744_v11, %v1743_v17  ;;  %vm1662_vm0 = vcmp.ge.f32.partialorder %v1550_v53, 0.0  ;;  %v1694_v2 = vmul.f32 0.2, %v1550_v53 }
 0x296   : > { %v1756_v32 = vpack.c.bf16 %v1728_v51, %v1727_v27  ;;  %vm1678_vm1 = vcmp.ge.f32.partialorder %v1614_v58, 0.0  ;;  %v1710_v36 = vmul.f32 0.2, %v1614_v58  ;;  %v1725_v0 = vsel %vm1661_vm15, %v1547_v50, %v1693_v57 }
 0x297   : > { %v1847_v4 = vshrl.u32 %v1764_v60, 16  ;;  %v1726_v10 = vsel %vm1662_vm0, %v1550_v53, %v1694_v2  ;;  %v1741_v48 = vsel %vm1677_vm12, %v1611_v42, %v1709_v25  ;;  %v1850_v43 = vshll.u32 %v1764_v60, 16 }
 0x298   : > { %v1791_v38 = vshrl.u32 %v1756_v32, 16  ;;  %v1755_v44 = vpack.c.bf16 %v1726_v10, %v1725_v0  ;;  %v1794_v29 = vshll.u32 %v1756_v32, 16  ;;  %v1940_v45 = vrot.slane %v1764_v60, 7 }
 0x299   : > { %v1849_v23 = vrot.slane %v1847_v4, 7  ;;  %v1742_v35 = vsel %vm1678_vm1, %v1614_v58, %v1710_v36  ;;  %v1932_v30 = vrot.slane %v1756_v32, 7 }
 0x29a   : > { %v1793_v18 = vrot.slane %v1791_v38, 7  ;;  %v1784_v47 = vshrl.u32 %v1755_v44, 16  ;;  %v1787_v1 = vshll.u32 %v1755_v44, 16  ;;  %v1931_v28 = vrot.slane %v1755_v44, 7 }
 0x29b   : > { %v1852_v39 = vor.u32 %v1850_v43, %v1849_v23  ;;  %v1988_v26 = vsel %vm4260_vm3, %v1849_v23, %v1940_v45  ;;  %v1763_v9 = vpack.c.bf16 %v1742_v35, %v1741_v48 }
 0x29c   : > { %v1796_v6 = vor.u32 %v1794_v29, %v1793_v18  ;;  %v1980_v24 = vsel %vm4260_vm3, %v1793_v18, %v1932_v30  ;;  %v3242_v14 = vcombine.low %v1988_v26, %v1988_v26  ;;  %v1786_v37 = vrot.slane %v1784_v47, 7 }
 0x29d   : > { %v3218_v56 = vcombine.low %v1980_v24, %v1980_v24  ;;  %v1972_v15 = vsel %vm4260_vm3, %v1764_v60, %v1852_v39  ;;  %v1840_v41 = vshrl.u32 %v1763_v9, 16  ;;  %v1843_v20 = vshll.u32 %v1763_v9, 16 }
 0x29e   : > { %v1964_v22 = vsel %vm4260_vm3, %v1756_v32, %v1796_v6  ;;  %v3240_v31 = vcombine.low %v1972_v15, %v1972_v15  ;;  %v3241_v40 = vcombine.high %v1972_v15, %v1972_v15  ;;  %2209 = vst.msk [vmem:[#allocation2 + $0x98] sm:$0x1] %vm2172_vm7, %v3242_v14  ;;  %v1789_v62 = vor.u32 %v1787_v1, %v1786_v37 }
 0x29f   : > { %v3216_v34 = vcombine.low %v1964_v22, %v1964_v22  ;;  %v3217_v13 = vcombine.high %v1964_v22, %v1964_v22  ;;  %2185 = vst.msk [vmem:[#allocation2 + $0x38] sm:$0x1] %vm2172_vm7, %v3218_v56  ;;  %v1979_v61 = vsel %vm4260_vm3, %v1786_v37, %v1931_v28  ;;  %v1842_v16 = vrot.slane %v1840_v41, 7 }
 0x2a0   : > { %2207 = vst.msk [vmem:[#allocation2 + $0x90] sm:$0xf] %vm2169_vm9, %v3240_v31  ;;  %2208 = vst.msk [vmem:[#allocation2 + $0x94] sm:$0xf] %vm2169_vm9, %v3241_v40  ;;  %v1963_v5 = vsel %vm4260_vm3, %v1755_v44, %v1789_v62  ;;  %v3215_v8 = vcombine.low %v1979_v61, %v1979_v61  ;;  %v1939_v52 = vrot.slane %v1763_v9, 7 }
 0x2a1   : > { %2183 = vst.msk [vmem:[#allocation2 + $0x30] sm:$0xf] %vm2169_vm9, %v3216_v34  ;;  %2184 = vst.msk [vmem:[#allocation2 + $0x34] sm:$0xf] %vm2169_vm9, %v3217_v13  ;;  %v3213_v42 = vcombine.low %v1963_v5, %v1963_v5  ;;  %v3214_v3 = vcombine.high %v1963_v5, %v1963_v5  ;;  %v1845_v63 = vor.u32 %v1843_v20, %v1842_v16 }
 0x2a2   : > { %2182 = vst.msk [vmem:[#allocation2 + $0x2c] sm:$0x1] %vm2172_vm7, %v3215_v8  ;;  %v1987_v50 = vsel %vm4260_vm3, %v1842_v16, %v1939_v52 }
 0x2a3   : > { %2180 = vst.msk [vmem:[#allocation2 + $0x24] sm:$0xf] %vm2169_vm9, %v3213_v42  ;;  %2181 = vst.msk [vmem:[#allocation2 + $0x28] sm:$0xf] %vm2169_vm9, %v3214_v3  ;;  %v1971_v54 = vsel %vm4260_vm3, %v1763_v9, %v1845_v63  ;;  %v3239_v33 = vcombine.low %v1987_v50, %v1987_v50 }
 0x2a4   : > { %v3237_v46 = vcombine.low %v1971_v54, %v1971_v54  ;;  %v3238_v19 = vcombine.high %v1971_v54, %v1971_v54 }
 0x2a5   : > { %2206 = vst.msk [vmem:[#allocation2 + $0x8c] sm:$0x1] %vm2172_vm7, %v3239_v33 }
 0x2a6   : > { %2204 = vst.msk [vmem:[#allocation2 + $0x84] sm:$0xf] %vm2169_vm9, %v3237_v46  ;;  %2205 = vst.msk [vmem:[#allocation2 + $0x88] sm:$0xf] %vm2169_vm9, %v3238_v19 }
 0x2cd   : > { %v3363_v55 = vpop.f32.mrb[8].mxu1 }
 0x2ce   : > { %v3347_v12 = vpop.f32.mrb[8].mxu0  ;;  %v1635_v17 = vadd.f32 %v3363_v55, %v5008_v49  ;;  %v1626_v25 = vpop.f32.mrb[9].mxu1 }
 0x2cf   : > { %v1571_v7 = vadd.f32 %v3347_v12, %v5008_v49  ;;  %v1562_v57 = vpop.f32.mrb[9].mxu0  ;;  %v1627_v59 = vadd.f32 %v5008_v49, %v1626_v25  ;;  %v3364_v53 = vpop.f32.mrb[10].mxu1 }
 0x2d0   : > { %vm1683_vm2 = vcmp.ge.f32.partialorder %v1635_v17, 0.0  ;;  %v1715_v27 = vmul.f32 0.2, %v1635_v17  ;;  %v1563_v11 = vadd.f32 %v5008_v49, %v1562_v57  ;;  %v3348_v58 = vpop.f32.mrb[10].mxu0  ;;  %v1638_v51 = vadd.f32 %v3364_v53, %v5008_v49  ;;  %v1629_v60 = vpop.f32.mrb[11].mxu1 }
 0x2d1   : > { %v1699_v2 = vmul.f32 0.2, %v1571_v7  ;;  %vm1667_vm4 = vcmp.ge.f32.partialorder %v1571_v7, 0.0  ;;  %vm1681_vm5 = vcmp.ge.f32.partialorder %v1627_v59, 0.0  ;;  %v1574_v32 = vadd.f32 %v3348_v58, %v5008_v49  ;;  %v1565_v36 = vpop.f32.mrb[11].mxu0 }
 0x2d2   : > { %v1747_v0 = vsel %vm1683_vm2, %v1635_v17, %v1715_v27  ;;  %v1713_v4 = vmul.f32 0.2, %v1627_v59  ;;  %vm1684_vm6 = vcmp.ge.f32.partialorder %v1638_v51, 0.0  ;;  %v1716_v10 = vmul.f32 0.2, %v1638_v51 }
 0x2d3   : > { %v1697_v48 = vmul.f32 0.2, %v1563_v11  ;;  %vm1668_vm8 = vcmp.ge.f32.partialorder %v1574_v32, 0.0  ;;  %v1700_v38 = vmul.f32 0.2, %v1574_v32  ;;  %v1566_v43 = vadd.f32 %v5008_v49, %v1565_v36 }
 0x2d4   : > { %v1731_v44 = vsel %vm1667_vm4, %v1571_v7, %v1699_v2  ;;  %vm1665_vm10 = vcmp.ge.f32.partialorder %v1563_v11, 0.0  ;;  %v1748_v29 = vsel %vm1684_vm6, %v1638_v51, %v1716_v10  ;;  %v1630_v23 = vadd.f32 %v5008_v49, %v1629_v60 }
 0x2d5   : > { %v1732_v45 = vsel %vm1668_vm8, %v1574_v32, %v1700_v38  ;;  %v1766_v35 = vpack.c.bf16 %v1748_v29, %v1747_v0  ;;  %vm1666_vm11 = vcmp.ge.f32.partialorder %v1566_v43, 0.0  ;;  %v1698_v18 = vmul.f32 0.2, %v1566_v43 }
 0x2d6   : > { %v1758_v30 = vpack.c.bf16 %v1732_v45, %v1731_v44  ;;  %vm1682_vm12 = vcmp.ge.f32.partialorder %v1630_v23, 0.0  ;;  %v1714_v47 = vmul.f32 0.2, %v1630_v23  ;;  %v1729_v1 = vsel %vm1665_vm10, %v1563_v11, %v1697_v48 }
 0x2d7   : > { %v1861_v39 = vshrl.u32 %v1766_v35, 16  ;;  %v1730_v26 = vsel %vm1666_vm11, %v1566_v43, %v1698_v18  ;;  %v1745_v28 = vsel %vm1681_vm5, %v1627_v59, %v1713_v4  ;;  %v1864_v6 = vshll.u32 %v1766_v35, 16 }
 0x2d8   : > { %v1805_v9 = vshrl.u32 %v1758_v30, 16  ;;  %v1757_v24 = vpack.c.bf16 %v1730_v26, %v1729_v1  ;;  %v1808_v14 = vshll.u32 %v1758_v30, 16  ;;  %v1942_v56 = vrot.slane %v1766_v35, 7 }
 0x2d9   : > { %v1863_v37 = vrot.slane %v1861_v39, 7  ;;  %v1746_v15 = vsel %vm1682_vm12, %v1630_v23, %v1714_v47  ;;  %v1934_v20 = vrot.slane %v1758_v30, 7 }
 0x2da   : > { %v1807_v41 = vrot.slane %v1805_v9, 7  ;;  %v1798_v22 = vshrl.u32 %v1757_v24, 16  ;;  %v1801_v31 = vshll.u32 %v1757_v24, 16  ;;  %v1933_v34 = vrot.slane %v1757_v24, 7 }
 0x2db   : > { %v1866_v40 = vor.u32 %v1864_v6, %v1863_v37  ;;  %v1990_v62 = vsel %vm4260_vm3, %v1863_v37, %v1942_v56  ;;  %v1765_v13 = vpack.c.bf16 %v1746_v15, %v1745_v28 }
 0x2dc   : > { %v1810_v61 = vor.u32 %v1808_v14, %v1807_v41  ;;  %v1982_v16 = vsel %vm4260_vm3, %v1807_v41, %v1934_v20  ;;  %v3248_v5 = vcombine.low %v1990_v62, %v1990_v62  ;;  %v1800_v8 = vrot.slane %v1798_v22, 7 }
 0x2dd   : > { %v3224_v52 = vcombine.low %v1982_v16, %v1982_v16  ;;  %v1974_v42 = vsel %vm4260_vm3, %v1766_v35, %v1866_v40  ;;  %v1854_v3 = vshrl.u32 %v1765_v13, 16  ;;  %v1857_v63 = vshll.u32 %v1765_v13, 16 }
 0x2de   : > { %v1966_v50 = vsel %vm4260_vm3, %v1758_v30, %v1810_v61  ;;  %v3246_v54 = vcombine.low %v1974_v42, %v1974_v42  ;;  %v3247_v33 = vcombine.high %v1974_v42, %v1974_v42  ;;  %2215 = vst.msk [vmem:[#allocation2 + $0xb0] sm:$0x1] %vm2172_vm7, %v3248_v5  ;;  %v1803_v46 = vor.u32 %v1801_v31, %v1800_v8 }
 0x2df   : > { %v3222_v19 = vcombine.low %v1966_v50, %v1966_v50  ;;  %v3223_v55 = vcombine.high %v1966_v50, %v1966_v50  ;;  %2191 = vst.msk [vmem:[#allocation2 + $0x50] sm:$0x1] %vm2172_vm7, %v3224_v52  ;;  %v1981_v12 = vsel %vm4260_vm3, %v1800_v8, %v1933_v34  ;;  %v1856_v17 = vrot.slane %v1854_v3, 7 }
 0x2e0   : > { %2213 = vst.msk [vmem:[#allocation2 + $0xa8] sm:$0xf] %vm2169_vm9, %v3246_v54  ;;  %2214 = vst.msk [vmem:[#allocation2 + $0xac] sm:$0xf] %vm2169_vm9, %v3247_v33  ;;  %v1965_v25 = vsel %vm4260_vm3, %v1757_v24, %v1803_v46  ;;  %v3221_v7 = vcombine.low %v1981_v12, %v1981_v12  ;;  %v1941_v57 = vrot.slane %v1765_v13, 7 }
 0x2e1   : > { %2189 = vst.msk [vmem:[#allocation2 + $0x48] sm:$0xf] %vm2169_vm9, %v3222_v19  ;;  %2190 = vst.msk [vmem:[#allocation2 + $0x4c] sm:$0xf] %vm2169_vm9, %v3223_v55  ;;  %v3219_v59 = vcombine.low %v1965_v25, %v1965_v25  ;;  %v3220_v53 = vcombine.high %v1965_v25, %v1965_v25  ;;  %v1859_v27 = vor.u32 %v1857_v63, %v1856_v17 }
 0x2e2   : > { %2188 = vst.msk [vmem:[#allocation2 + $0x44] sm:$0x1] %vm2172_vm7, %v3221_v7  ;;  %v1989_v11 = vsel %vm4260_vm3, %v1856_v17, %v1941_v57 }
 0x2e3   : > { %2186 = vst.msk [vmem:[#allocation2 + $0x3c] sm:$0xf] %vm2169_vm9, %v3219_v59  ;;  %2187 = vst.msk [vmem:[#allocation2 + $0x40] sm:$0xf] %vm2169_vm9, %v3220_v53  ;;  %v1973_v58 = vsel %vm4260_vm3, %v1765_v13, %v1859_v27  ;;  %v3245_v51 = vcombine.low %v1989_v11, %v1989_v11 }
 0x2e4   : > { %v3243_v60 = vcombine.low %v1973_v58, %v1973_v58  ;;  %v3244_v2 = vcombine.high %v1973_v58, %v1973_v58 }
 0x2e5   : > { %2212 = vst.msk [vmem:[#allocation2 + $0xa4] sm:$0x1] %vm2172_vm7, %v3245_v51 }
 0x2e6   : > { %2210 = vst.msk [vmem:[#allocation2 + $0x9c] sm:$0xf] %vm2169_vm9, %v3243_v60  ;;  %2211 = vst.msk [vmem:[#allocation2 + $0xa0] sm:$0xf] %vm2169_vm9, %v3244_v2 }
 0x302   : > { %v3367_v32 = vpop.f32.mrb[12].mxu1 }
 0x303   : > { %v1651_v36 = vadd.f32 %v3367_v32, %v5008_v49  ;;  %v1642_v0 = vpop.f32.mrb[13].mxu1 }
 0x304   : > { %v1643_v4 = vadd.f32 %v5008_v49, %v1642_v0  ;;  %v3368_v10 = vpop.f32.mrb[14].mxu1 }
 0x305   : > { %v1719_v48 = vmul.f32 0.2, %v1651_v36  ;;  %v1654_v38 = vadd.f32 %v3368_v10, %v5008_v49  ;;  %v1645_v43 = vpop.f32.mrb[15].mxu1  ;;  %vm1687_vm13 = vcmp.ge.f32.partialorder %v1651_v36, 0.0 }
 0x306   : > { %v1717_v44 = vmul.f32 0.2, %v1643_v4  ;;  %v3351_v29 = vpop.f32.mrb[12].mxu0  ;;  %v1646_v23 = vadd.f32 %v5008_v49, %v1645_v43  ;;  %vm1685_vm14 = vcmp.ge.f32.partialorder %v1643_v4, 0.0 }
 0x307   : > { %vm1688_vm15 = vcmp.ge.f32.partialorder %v1654_v38, 0.0  ;;  %v1720_v45 = vmul.f32 0.2, %v1654_v38  ;;  %v1587_v35 = vadd.f32 %v3351_v29, %v5008_v49  ;;  %v1578_v18 = vpop.f32.mrb[13].mxu0  ;;  %v1751_v39 = vsel %vm1687_vm13, %v1651_v36, %v1719_v48 }
 0x308   : > { %vm1686_vm0 = vcmp.ge.f32.partialorder %v1646_v23, 0.0  ;;  %v1718_v30 = vmul.f32 0.2, %v1646_v23  ;;  %v1579_v47 = vadd.f32 %v5008_v49, %v1578_v18  ;;  %v3352_v1 = vpop.f32.mrb[14].mxu0  ;;  %v1749_v24 = vsel %vm1685_vm14, %v1643_v4, %v1717_v44 }
 0x309   : > { %v1752_v26 = vsel %vm1688_vm15, %v1654_v38, %v1720_v45  ;;  %v1703_v28 = vmul.f32 0.2, %v1587_v35  ;;  %v1590_v9 = vadd.f32 %v3352_v1, %v5008_v49  ;;  %v1581_v6 = vpop.f32.mrb[15].mxu0  ;;  %vm1671_vm1 = vcmp.ge.f32.partialorder %v1587_v35, 0.0 }
 0x30a   : > { %v1768_v14 = vpack.c.bf16 %v1752_v26, %v1751_v39  ;;  %v1750_v37 = vsel %vm1686_vm0, %v1646_v23, %v1718_v30  ;;  %vm1669_vm4 = vcmp.ge.f32.partialorder %v1579_v47, 0.0  ;;  %v1582_v61 = vadd.f32 %v5008_v49, %v1581_v6 }
 0x30b   : > { %v1767_v56 = vpack.c.bf16 %v1750_v37, %v1749_v24  ;;  %vm1672_vm2 = vcmp.ge.f32.partialorder %v1590_v9, 0.0  ;;  %v1704_v15 = vmul.f32 0.2, %v1590_v9  ;;  %v1735_v22 = vsel %vm1671_vm1, %v1587_v35, %v1703_v28 }
 0x30c   : > { %v1875_v41 = vshrl.u32 %v1768_v14, 16  ;;  %v1878_v20 = vshll.u32 %v1768_v14, 16  ;;  %v1944_v34 = vrot.slane %v1768_v14, 7  ;;  %v1701_v52 = vmul.f32 0.2, %v1579_v47 }
 0x30d   : > { %v1868_v31 = vshrl.u32 %v1767_v56, 16  ;;  %v1736_v40 = vsel %vm1672_vm2, %v1590_v9, %v1704_v15  ;;  %v1871_v5 = vshll.u32 %v1767_v56, 16  ;;  %v1943_v8 = vrot.slane %v1767_v56, 7 }
 0x30e   : > { %v1877_v62 = vrot.slane %v1875_v41, 7  ;;  %v1760_v13 = vpack.c.bf16 %v1736_v40, %v1735_v22  ;;  %vm1670_vm5 = vcmp.ge.f32.partialorder %v1582_v61, 0.0  ;;  %v1702_v57 = vmul.f32 0.2, %v1582_v61 }
 0x30f   : > { %v1870_v16 = vrot.slane %v1868_v31, 7  ;;  %v1733_v58 = vsel %vm1669_vm4, %v1579_v47, %v1701_v52 }
 0x310   : > { %v1880_v42 = vor.u32 %v1878_v20, %v1877_v62  ;;  %v1992_v3 = vsel %vm4260_vm3, %v1877_v62, %v1944_v34  ;;  %v1819_v63 = vshrl.u32 %v1760_v13, 16  ;;  %v1822_v50 = vshll.u32 %v1760_v13, 16 }
 0x311   : > { %v3254_v54 = vcombine.low %v1992_v3, %v1992_v3  ;;  %v1873_v33 = vor.u32 %v1871_v5, %v1870_v16  ;;  %v1991_v46 = vsel %vm4260_vm3, %v1870_v16, %v1943_v8  ;;  %v1936_v19 = vrot.slane %v1760_v13, 7 }
 0x312   : > { %v1976_v55 = vsel %vm4260_vm3, %v1768_v14, %v1880_v42  ;;  %v3251_v49 = vcombine.low %v1991_v46, %v1991_v46  ;;  %v1821_v12 = vrot.slane %v1819_v63, 7  ;;  %v1734_v60 = vsel %vm1670_vm5, %v1582_v61, %v1702_v57 }
 0x313   : > { %v3252_v17 = vcombine.low %v1976_v55, %v1976_v55  ;;  %v3253_v25 = vcombine.high %v1976_v55, %v1976_v55  ;;  %2221 = vst.msk [vmem:[#allocation2 + $0xc8] sm:$0x1] %vm2172_vm7, %v3254_v54  ;;  %2224 = vst.msk [vmem:[#allocation2 + $0xd4] sm:$0x1] %vm2172_vm7, %v3254_v54  ;;  %v1975_v7 = vsel %vm4260_vm3, %v1767_v56, %v1873_v33 }
 0x314   : > { %v3249_v59 = vcombine.low %v1975_v7, %v1975_v7  ;;  %v3250_v53 = vcombine.high %v1975_v7, %v1975_v7  ;;  %2218 = vst.msk [vmem:[#allocation2 + $0xbc] sm:$0x1] %vm2172_vm7, %v3251_v49  ;;  %v1824_v27 = vor.u32 %v1822_v50, %v1821_v12  ;;  %v1984_v11 = vsel %vm4260_vm3, %v1821_v12, %v1936_v19 }
 0x315   : > { %2219 = vst.msk [vmem:[#allocation2 + $0xc0] sm:$0xf] %vm2169_vm9, %v3252_v17  ;;  %2220 = vst.msk [vmem:[#allocation2 + $0xc4] sm:$0xf] %vm2169_vm9, %v3253_v25  ;;  %v3230_v51 = vcombine.low %v1984_v11, %v1984_v11  ;;  %v1759_v32 = vpack.c.bf16 %v1734_v60, %v1733_v58 }
 0x316   : > { %2222 = vst.msk [vmem:[#allocation2 + $0xcc] sm:$0xf] %vm2169_vm9, %v3252_v17  ;;  %2223 = vst.msk [vmem:[#allocation2 + $0xd0] sm:$0xf] %vm2169_vm9, %v3253_v25  ;;  %v1968_v2 = vsel %vm4260_vm3, %v1760_v13, %v1824_v27 }
 0x317   : > { %2216 = vst.msk [vmem:[#allocation2 + $0xb4] sm:$0xf] %vm2169_vm9, %v3249_v59  ;;  %2217 = vst.msk [vmem:[#allocation2 + $0xb8] sm:$0xf] %vm2169_vm9, %v3250_v53  ;;  %v3228_v36 = vcombine.low %v1968_v2, %v1968_v2  ;;  %v3229_v0 = vcombine.high %v1968_v2, %v1968_v2  ;;  %v1812_v4 = vshrl.u32 %v1759_v32, 16  ;;  %v1815_v48 = vshll.u32 %v1759_v32, 16 }
 0x318   : > { %2197 = vst.msk [vmem:[#allocation2 + $0x68] sm:$0x1] %vm2172_vm7, %v3230_v51  ;;  %v1935_v38 = vrot.slane %v1759_v32, 7 }
 0x319   : > { %2195 = vst.msk [vmem:[#allocation2 + $0x60] sm:$0xf] %vm2169_vm9, %v3228_v36  ;;  %2196 = vst.msk [vmem:[#allocation2 + $0x64] sm:$0xf] %vm2169_vm9, %v3229_v0  ;;  %v1814_v10 = vrot.slane %v1812_v4, 7 }
 0x31b   : > { %v1817_v43 = vor.u32 %v1815_v48, %v1814_v10  ;;  %v1983_v44 = vsel %vm4260_vm3, %v1814_v10, %v1935_v38 }
 0x31c   : > { %v3227_v29 = vcombine.low %v1983_v44, %v1983_v44 }
 0x31d   : > { %v1967_v23 = vsel %vm4260_vm3, %v1759_v32, %v1817_v43 }
 0x31e   : > { %v3225_v45 = vcombine.low %v1967_v23, %v1967_v23  ;;  %v3226_v35 = vcombine.high %v1967_v23, %v1967_v23  ;;  %2194 = vst.msk [vmem:[#allocation2 + $0x5c] sm:$0x1] %vm2172_vm7, %v3227_v29 }
 0x320   : > { %2192 = vst.msk [vmem:[#allocation2 + $0x54] sm:$0xf] %vm2169_vm9, %v3225_v45  ;;  %2193 = vst.msk [vmem:[#allocation2 + $0x58] sm:$0xf] %vm2169_vm9, %v3226_v35 }
 0x321 PF: > { %s5608_s29 = sld [smem:[#allocation18_spill]]  ;;  %vm2436_vm3 = vcmask 1046528   ;;  %s3925_s16 = smov 24   ;;  %vm2323_vm7 = vsmask.f32 7424  ;;  %vm2815_vm9 = vcmask 1043456  }
 0x322   : > { %s3926_s12 = smov 16   ;;  %s3927_s17 = smov 8   ;;  %vm2619_vm6 = vcmask 64512   ;;  %vm2636_vm8 = vcmask 130048   ;;  %vm2653_vm10 = vcmask 195584   ;;  %vm2670_vm11 = vcmask 261120  }
 0x323   : > { %s3928_s6 = smov 32   ;;  %s3929_s24 = smov 40   ;;  %vm2687_vm12 = vcmask 326656   ;;  %vm2704_vm13 = vcmask 392192   ;;  %vm2738_vm14 = vcmask 523264   ;;  %vm2721_vm15 = vcmask 457728  }
 0x324   : > { %s3930_s25 = smov 48   ;;  %s3931_s30 = smov 56   ;;  %vm2798_vm0 = vcmask 588800  }
 0x325   : > { %s3932_s5 = smov 64   ;;  %s5609_s18 = sld [smem:[#allocation19_spill]] }
 0x326   : > { %s5610_s1 = sld [smem:[#allocation20_spill]] }
 0x327   : > { %s3298_s21 = smul.u32 96, %s5608_s29 }
 0x329   : > { %s5166_s14 = scalar_lea.vmem [#allocation2], %s3298_s21 }
 0x32a   : > { %v5169_v21 = vld [vmem:[%s5166_s14 + $0x18] sm:$0xff]   ;;  %v5172_v18 = vld [vmem:[%s5166_s14 + $0xc] sm:$0xff]   ;;  %v5179_v30 = vld [vmem:[%s5166_s14] sm:$0xff]  }
 0x32b   : > { %2484 = vrot.lane.b32.xlu1 %v5169_v21, %s3925_s16  ;;  %2482 = vrot.lane.b32.xlu0 %v5172_v18, %s3925_s16  ;;  %v3614_v47 = vld [vmem:[%s5166_s14 + $0x8] ss:$0 sps:$4 sm:$0x11]   ;;  %v3615_v1 = vld [vmem:[%s5166_s14 + $0x14] ss:$0 sps:$4 sm:$0x11]  }
 0x32c   : > { %v2440_v39 = vrot.slane %v5172_v18, 1  ;;  %v2337_v26 = vshrl.u32 %v5172_v18, 16  ;;  %v2339_v28 = vshll.u32 %v5172_v18, 16  ;;  %v2437_v9 = vrot.slane %v5179_v30, 1  ;;  %v5196_v42 = vld [vmem:[%s5166_s14 + $0x24] sm:$0xff]   ;;  %v5222_v59 = vld [vmem:[%s5166_s14 + $0x54] sm:$0xff]  }
 0x32d   : > { %v2438_v6 = vrot.slane %v3614_v47, 1  ;;  %v2325_v24 = vshrl.u32 %v5179_v30, 16  ;;  %v2327_v14 = vshll.u32 %v5179_v30, 16  ;;  %v2332_v37 = vshll.u32 %v3614_v47, 16  ;;  %v5219_v57 = vld [vmem:[%s5166_s14 + $0x48] sm:$0xff]   ;;  %v5225_v53 = vld [vmem:[%s5166_s14 + $0x60] sm:$0xff]  }
 0x32e   : > { %v2441_v56 = vrot.slane %v3615_v1, 1  ;;  %v2341_v15 = vrot.slane %v2339_v28, 1  ;;  %v2344_v41 = vshll.u32 %v3615_v1, 16  ;;  %v3616_v31 = vld [vmem:[%s5166_s14 + $0x20] ss:$0 sps:$4 sm:$0x11]  }
 0x32f   : > { %v2439_v20 = vsel %vm2436_vm3, %v2437_v9, %v2438_v6  ;;  %v2329_v22 = vrot.slane %v2327_v14, 1  ;;  %v2349_v40 = vshrl.u32 %v5169_v21, 16  ;;  %v2351_v62 = vshll.u32 %v5169_v21, 16  ;;  %v5203_v33 = vld [vmem:[%s5166_s14 + $0x2c] ss:$0 sps:$4 sm:$0x11]  }
 0x330   : > { %2461 = vrot.lane.b32.xlu1 %v2439_v20, %s3926_s12  ;;  %v2334_v34 = vrot.slane %v2332_v37, 1  ;;  %v2442_v13 = vsel %vm2436_vm3, %v2440_v39, %v2441_v56  ;;  %v2342_v61 = vor.u32 %v2341_v15, %v2337_v26  ;;  %v2346_v5 = vrot.slane %v2344_v41, 1  ;;  %v3624_v27 = vld [vmem:[%s5166_s14 + $0x50] ss:$0 sps:$4 sm:$0x11]   ;;  %s3293_s9 = sshll.u32 %s5609_s18, 1 }
 0x331   : > { %v2330_v16 = vor.u32 %v2329_v22, %v2325_v24  ;;  %v2353_v8 = vrot.slane %v2351_v62, 1  ;;  %v2356_v52 = vshll.u32 %v3616_v31, 16  ;;  %v2443_v54 = vrot.slane %v5169_v21, 1  ;;  %v5236_v10 = vld [vmem:[%s5166_s14 + $0x6c] sm:$0xff]   ;;  %s3009_s21 = sadd.s32 %s5608_s29, %s3293_s9  ;;  %p5612_p6 = scmp.ne.s32.totalorder %s5610_s1, 0 }
 0x332   : > { %v2347_v46 = vsel %vm2323_vm7, %v2342_v61, %v2346_v5  ;;  %v2444_v55 = vrot.slane %v3616_v31, 1  ;;  %v2363_v49 = vshll.u32 %v5196_v42, 16  ;;  %v2368_v12 = vshll.u32 %v5203_v33, 16  ;;  %v3626_v48 = vld [vmem:[%s5166_s14 + $0x5c] ss:$0 sps:$4 sm:$0x11]  }
 0x333   : > { %v2335_v3 = vsel %vm2323_vm7, %v2330_v16, %v2334_v34  ;;  %v2354_v63 = vor.u32 %v2353_v8, %v2349_v40  ;;  %v2358_v50 = vrot.slane %v2356_v52, 1  ;;  %v2361_v25 = vshrl.u32 %v5196_v42, 16  ;;  %v3628_v6 = vld [vmem:[%s5166_s14 + $0x68] ss:$0 sps:$4 sm:$0x11]   ;;  %v5268_v62 = vld [vmem:[%s5166_s14 + $0x30] sm:$0xff]  }
 0x334   : > { %2420 = vrot.lane.b32.xlu0 %v2335_v3, %s3927_s17  ;;  %2463 = vrot.lane.b32.xlu1 %v2442_v13, %s3926_s12  ;;  %v5215_v17 = vsel %vm2436_vm3, %v2443_v54, %v2444_v55  ;;  %v2365_v7 = vrot.slane %v2363_v49, 1  ;;  %v2397_v11 = vshrl.u32 %v5219_v57, 16  ;;  %v2399_v58 = vshll.u32 %v5219_v57, 16  ;;  %v3630_v31 = vld [vmem:[%s5166_s14 + $0x74] ss:$0 sps:$4 sm:$0x11]  }
 0x335   : > { %v5207_v19 = vsel %vm2323_vm7, %v2354_v63, %v2358_v50  ;;  %v2455_v51 = vrot.slane %v5219_v57, 1  ;;  %v2370_v60 = vrot.slane %v2368_v12, 1  ;;  %v2409_v2 = vshrl.u32 %v5222_v59, 16  ;;  %v3631_v61 = vld [vmem:[#allocation9] sm:$0xff]   ;;  %v3632_v3 = vld [vmem:[#allocation9 + $0x8] sm:$0xff]   ;;  %s3933_s29 = smov [#allocation12]  }
 0x336   : > { %v2366_v32 = vor.u32 %v2365_v7, %v2361_v25  ;;  %v2401_v36 = vrot.slane %v2399_v58, 1  ;;  %v2404_v0 = vshll.u32 %v3624_v27, 16  ;;  %v2456_v4 = vrot.slane %v3624_v27, 1  ;;  %3369 = vmatprep.subr.bf16.mxu0 %v3631_v61  ;;  %3401 = vmatprep.subr.bf16.mxu1 %v3631_v61  ;;  %v3620_v25 = vld [vmem:[%s5166_s14 + $0x38] ss:$0 sps:$4 sm:$0x11]  }
 0x337   : > { %v2411_v38 = vshll.u32 %v5222_v59, 16  ;;  %v2458_v43 = vrot.slane %v5222_v59, 1  ;;  %v2502_v44 = vshrl.u32 %v5225_v53, 16  ;;  %v2504_v35 = vshll.u32 %v5225_v53, 16  ;;  %3370 = vmatpush3.bf16.msra.mxu0 %v3631_v61  ;;  %3406 = vmatpush3.bf16.msra.mxu1 %v3631_v61 }
 0x338   : > { %2422 = vrot.lane.b32.xlu0 %v2347_v46, %s3927_s17  ;;  %2515 = vrot.lane.b32.xlu1 %v5207_v19, %s3928_s6  ;;  %v2402_v29 = vor.u32 %v2401_v36, %v2397_v11  ;;  %v2406_v23 = vrot.slane %v2404_v0, 1  ;;  %v5243_v45 = vsel %vm2436_vm3, %v2455_v51, %v2456_v4  ;;  %v2416_v1 = vshll.u32 %v3626_v48, 16  ;;  %v3633_v11 = vld [vmem:[#allocation9 + $0x10] sm:$0xff]  }
 0x339   : > { %v2413_v47 = vrot.slane %v2411_v38, 1  ;;  %v2459_v39 = vrot.slane %v3626_v48, 1  ;;  %v2529_v26 = vrot.slane %v5225_v53, 1  ;;  %v5251_v28 = vsel %vm2323_vm7, %v2366_v32, %v2370_v60  ;;  %3371 = vmatprep.subr.bf16.mxu0 %v3632_v3  ;;  %3402 = vmatprep.subr.bf16.mxu1 %v3632_v3  ;;  %v3634_v60 = vld [vmem:[#allocation9 + $0x18] sm:$0xff]   ;;  %v5303_v0 = vld [vmem:[%s5166_s14 + $0x3c] sm:$0xff]  }
 0x33a   : > { %v5254_v9 = vsel %vm2323_vm7, %v2402_v29, %v2406_v23  ;;  %v2506_v24 = vrot.slane %v2504_v35, 1  ;;  %v2418_v37 = vrot.slane %v2416_v1, 1  ;;  %v2573_v15 = vshrl.u32 %v5236_v10, 16 }
 0x33b   : > { %v2414_v14 = vor.u32 %v2413_v47, %v2409_v2  ;;  %v5258_v56 = vsel %vm2436_vm3, %v2458_v43, %v2459_v39  ;;  %v2509_v20 = vshll.u32 %v3628_v6, 16  ;;  %v2530_v22 = vrot.slane %v3628_v6, 1  ;;  %3372 = vmatpush3.bf16.msra.mxu0 %v3632_v3  ;;  %3407 = vmatpush3.bf16.msra.mxu1 %v3632_v3  ;;  %v3635_v2 = vld [vmem:[#allocation9 + $0x20] ss:$0 sps:$4 sm:$0xff]  }
 0x33c   : > { %2513 = vrot.lane.b32.xlu0 %v2347_v46, %s3928_s6  ;;  %2534 = vrot.lane.b32.xlu1 %v5215_v17, %s3929_s24  ;;  %v2507_v41 = vor.u32 %v2506_v24, %v2502_v44  ;;  %v2575_v40 = vshll.u32 %v5236_v10, 16  ;;  %v2580_v52 = vshll.u32 %v3630_v31, 16  ;;  %v2601_v63 = vrot.slane %v3630_v31, 1  ;;  %v3622_v44 = vld [vmem:[%s5166_s14 + $0x44] ss:$0 sps:$4 sm:$0x11]  }
 0x33d   : > { %v5271_v34 = vsel %vm2323_vm7, %v2414_v14, %v2418_v37  ;;  %v2511_v16 = vrot.slane %v2509_v20, 1  ;;  %v5275_v5 = vsel %vm2436_vm3, %v2529_v26, %v2530_v22  ;;  %v2446_v55 = vrot.slane %v5196_v42, 1  ;;  %3373 = vmatprep.subr.bf16.mxu0 %v3633_v11  ;;  %3403 = vmatprep.subr.bf16.mxu1 %v3633_v11  ;;  %s3294_s14 = sshll.u32 %s3009_s21, 7 }
 0x33e   : > { %v2577_v8 = vrot.slane %v2575_v40, 1  ;;  %v2582_v46 = vrot.slane %v2580_v52, 1  ;;  %v2447_v12 = vrot.slane %v5203_v33, 1  ;;  %v2375_v7 = vshll.u32 %v5268_v62, 16 }
 0x33f   : > { %v5278_v50 = vsel %vm2323_vm7, %v2507_v41, %v2511_v16  ;;  %v2380_v51 = vshll.u32 %v3620_v25, 16  ;;  %3374 = vmatpush3.bf16.msra.mxu0 %v3633_v11  ;;  %3408 = vmatpush3.bf16.msra.mxu1 %v3633_v11  ;;  %v2817_v4 = vsel %vm2815_vm9, %v3635_v2, 0  ;;  %v2449_v38 = vrot.slane %v5268_v62, 1 }
 0x340   : > { %2532 = vrot.lane.b32.xlu0 %v2442_v13, %s3929_s24  ;;  %2555 = vrot.lane.b32.xlu1 %v5196_v42, %s3930_s25  ;;  %v2600_v13 = vrot.slane %v5236_v10, 1  ;;  %v2578_v54 = vor.u32 %v2577_v8, %v2573_v15  ;;  %v2448_v33 = vsel %vm2436_vm3, %v2446_v55, %v2447_v12  ;;  %v2377_v58 = vrot.slane %v2375_v7, 1 }
 0x341   : > { %v2382_v36 = vrot.slane %v2380_v51, 1  ;;  %3375 = vmatprep.subr.bf16.mxu0 %v3634_v60  ;;  %3404 = vmatprep.subr.bf16.mxu1 %v3634_v60  ;;  %v2450_v43 = vrot.slane %v3620_v25, 1  ;;  %v2387_v29 = vshll.u32 %v5303_v0, 16  ;;  %v2385_v23 = vshrl.u32 %v5303_v0, 16 }
 0x342   : > { %v5286_v49 = vsel %vm2436_vm3, %v2600_v13, %v2601_v63  ;;  %v5292_v27 = vsel %vm2323_vm7, %v2578_v54, %v2582_v46  ;;  %v2392_v47 = vshll.u32 %v3622_v44, 16  ;;  %v2453_v6 = vrot.slane %v3622_v44, 1 }
 0x343   : > { %3376 = vmatpush3.bf16.msra.mxu0 %v3634_v60  ;;  %3409 = vmatpush3.bf16.msra.mxu1 %v3634_v60  ;;  %v2389_v35 = vrot.slane %v2387_v29, 1 }
 0x344   : > { %2553 = vrot.lane.b32.xlu0 %v5169_v21, %s3930_s25  ;;  %2586 = vrot.lane.b32.xlu1 %v5251_v28, %s3931_s30  ;;  %v2394_v39 = vrot.slane %v2392_v47, 1 }
 0x345   : > { %3413 = vmatprep.subr.msk.bf16.mxu0 %vm2815_vm9, %v3635_v2  ;;  %3414 = vmatprep.subr.msk.bf16.mxu1 %vm2815_vm9, %v3635_v2  ;;  %v2390_v1 = vor.u32 %v2389_v35, %v2385_v23 }
 0x347   : > { %3378 = vmatpush3.bf16.msra.mxu0 %v2817_v4  ;;  %3410 = vmatpush3.bf16.msra.mxu1 %v2817_v4  ;;  %v2395_v26 = vsel %vm2323_vm7, %v2390_v1, %v2394_v39 }
 0x348   : > { %2584 = vrot.lane.b32.xlu0 %v5207_v19, %s3931_s30  ;;  %2424 = vrot.lane.b32.xlu1 %v5207_v19, %s3927_s17  ;;  %v2373_v19 = vshrl.u32 %v5268_v62, 16 }
 0x34a   : > { %v2378_v32 = vor.u32 %v2377_v58, %v2373_v19 }
 0x34c   : > { %2603 = vrot.lane.b32.xlu0 %v5215_v17, %s3932_s5  ;;  %2426 = vrot.lane.b32.xlu1 %v5251_v28, %s3927_s17  ;;  %v2383_v48 = vsel %vm2323_vm7, %v2378_v32, %v2382_v36 }
 0x350   : > { %2605 = vrot.lane.b32.xlu0 %v2448_v33, %s3932_s5  ;;  %2467 = vrot.lane.b32.xlu1 %v2448_v33, %s3926_s12 }
 0x354   : > { %2465 = vrot.lane.b32.xlu0 %v5215_v17, %s3926_s12  ;;  %2488 = vrot.lane.b32.xlu1 %v5268_v62, %s3925_s16  ;;  %v2451_v17 = vsel %vm2436_vm3, %v2449_v38, %v2450_v43 }
 0x358   : > { %2486 = vrot.lane.b32.xlu0 %v5196_v42, %s3925_s16  ;;  %2519 = vrot.lane.b32.xlu1 %v2383_v48, %s3928_s6 }
 0x35c   : > { %2517 = vrot.lane.b32.xlu0 %v5251_v28, %s3928_s6  ;;  %2538 = vrot.lane.b32.xlu1 %v2451_v17, %s3929_s24  ;;  %v2452_v28 = vrot.slane %v5303_v0, 1 }
 0x35e   : > { %v2454_v24 = vsel %vm2436_vm3, %v2452_v28, %v2453_v6 }
 0x360   : > { %2536 = vrot.lane.b32.xlu0 %v2448_v33, %s3929_s24  ;;  %2559 = vrot.lane.b32.xlu1 %v5303_v0, %s3930_s25 }
 0x364   : > { %2557 = vrot.lane.b32.xlu0 %v5268_v62, %s3930_s25  ;;  %2590 = vrot.lane.b32.xlu1 %v2395_v26, %s3931_s30 }
 0x368   : > { %2588 = vrot.lane.b32.xlu0 %v2383_v48, %s3931_s30  ;;  %2428 = vrot.lane.b32.xlu1 %v2383_v48, %s3927_s17 }
 0x36c   : > { %2607 = vrot.lane.b32.xlu0 %v2451_v17, %s3932_s5  ;;  %2430 = vrot.lane.b32.xlu1 %v2395_v26, %s3927_s17 }
 0x370   : > { %2609 = vrot.lane.b32.xlu0 %v2454_v24, %s3932_s5  ;;  %2471 = vrot.lane.b32.xlu1 %v2454_v24, %s3926_s12 }
 0x374   : > { %2469 = vrot.lane.b32.xlu0 %v2451_v17, %s3926_s12  ;;  %2492 = vrot.lane.b32.xlu1 %v5219_v57, %s3925_s16 }
 0x378   : > { %2490 = vrot.lane.b32.xlu0 %v5303_v0, %s3925_s16  ;;  %2523 = vrot.lane.b32.xlu1 %v5254_v9, %s3928_s6 }
 0x37c   : > { %2521 = vrot.lane.b32.xlu0 %v2395_v26, %s3928_s6  ;;  %2542 = vrot.lane.b32.xlu1 %v5243_v45, %s3929_s24 }
 0x380   : > { %2540 = vrot.lane.b32.xlu0 %v2454_v24, %s3929_s24  ;;  %2563 = vrot.lane.b32.xlu1 %v5222_v59, %s3930_s25 }
 0x384   : > { %2561 = vrot.lane.b32.xlu0 %v5219_v57, %s3930_s25  ;;  %2594 = vrot.lane.b32.xlu1 %v5271_v34, %s3931_s30 }
 0x388   : > { %2592 = vrot.lane.b32.xlu0 %v5254_v9, %s3931_s30  ;;  %2432 = vrot.lane.b32.xlu1 %v5254_v9, %s3927_s17 }
 0x38c   : > { %2611 = vrot.lane.b32.xlu0 %v5243_v45, %s3932_s5  ;;  %2434 = vrot.lane.b32.xlu1 %v5271_v34, %s3927_s17 }
 0x390   : > { %2613 = vrot.lane.b32.xlu0 %v5258_v56, %s3932_s5  ;;  %2475 = vrot.lane.b32.xlu1 %v5258_v56, %s3926_s12 }
 0x394   : > { %2473 = vrot.lane.b32.xlu0 %v5243_v45, %s3926_s12  ;;  %2496 = vrot.lane.b32.xlu1 %v5225_v53, %s3925_s16 }
 0x398   : > { %2494 = vrot.lane.b32.xlu0 %v5222_v59, %s3925_s16  ;;  %2527 = vrot.lane.b32.xlu1 %v5278_v50, %s3928_s6  ;;  %s3013_s16 = sshll.u32 %s310_s7, 4  ;;  %s5498_s16 = int_to_ptr.vmem [resolvable:$true] %s3013_s16 }
 0x39c   : > { %2525 = vrot.lane.b32.xlu0 %v5271_v34, %s3928_s6  ;;  %2546 = vrot.lane.b32.xlu1 %v5275_v5, %s3929_s24  ;;  %s5611_s6 = sld [smem:[#allocation24_spill]] }
 0x39d   : > { %v2485_v9 = vpop.permute.xlu1 %2484  ;;  %v2483_v45 = vpop.permute.xlu0 %2482 }
 0x3a0   : > { %2544 = vrot.lane.b32.xlu0 %v5258_v56, %s3929_s24  ;;  %2567 = vrot.lane.b32.xlu1 %v5236_v10, %s3930_s25 }
 0x3a2   : > { %v2462_v14 = vpop.permute.xlu1 %2461  ;;  %s5496_s24 = scalar_lea.hbm %s5611_s6, %s3294_s14 }
 0x3a4   : > { %2565 = vrot.lane.b32.xlu0 %v5225_v53, %s3930_s25  ;;  %2598 = vrot.lane.b32.xlu1 %v5292_v27, %s3931_s30  ;;  %s2998_s25 = scalar_lea.sflag [#allocation5], %s308_s2 }
 0x3a6   : > { %v2421_v37 = vpop.permute.xlu0 %2420  ;;  %v2464_v15 = vpop.permute.xlu1 %2463 }
 0x3a7   : > { %v2621_v31 = vsel %vm2619_vm6, %v5179_v30, %v2421_v37 }
 0x3a8   : > { %2596 = vrot.lane.b32.xlu0 %v5278_v50, %s3931_s30  ;;  %2617 = vrot.lane.b32.xlu1 %v5286_v49, %s3932_s5  ;;  %v2638_v61 = vsel %vm2636_vm8, %v2621_v31, %v2462_v14  ;;  %s3778_s30 = scalar_lea.vmem %s5498_s16, 128 }
 0x3a9   : > { %v2655_v8 = vsel %vm2653_vm10, %v2638_v61, %v2483_v45  ;;  %p3779_p4 = scmp.ne.s32.totalorder %s5498_s16, %s3778_s30 }
 0x3aa   : > { %v2423_v56 = vpop.permute.xlu0 %2422  ;;  %v2516_v41 = vpop.permute.xlu1 %2515 }
 0x3ab   : > { %v2623_v40 = vsel %vm2619_vm6, %v5172_v18, %v2423_v56  ;;  %p3780_p10 = pnand %p3779_p4, %p5612_p6 }
 0x3ac   : > { %2615 = vrot.lane.b32.xlu0 %v5275_v5, %s3932_s5  ;;  %v2640_v16 = vsel %vm2636_vm8, %v2623_v40, %v2464_v15  ;;  %s3782_s5 = sshll.u32 %s3933_s29, 4  ;;  %s3783_s5 = int_to_ptr.vmem [resolvable:$false] %s3782_s5 }
 0x3ad   : > { %v2657_v5 = vsel %vm2653_vm10, %v2640_v16, %v2485_v9  ;;  %p3781_p13 = pneg %p3780_p10  ;;  %s3784_s18 = scalar_lea.vmem %s3783_s5, 256 }
 0x3ae   : > { %v2514_v10 = vpop.permute.xlu0 %2513  ;;  %v2535_v20 = vpop.permute.xlu1 %2534  ;;  %v2674_v18 = vsel %vm2670_vm11, %v2657_v5, %v2516_v41  ;;  %p3785_p11 = scmp.lt.s32.totalorder %s5498_s16, %s3783_s5  ;;  %p3786_p0 = scmp.lt.s32.totalorder %s3784_s18, %s3778_s30 }
 0x3af   : > { %v2672_v63 = vsel %vm2670_vm11, %v2655_v8, %v2514_v10  ;;  %v2691_v12 = vsel %vm2687_vm12, %v2674_v18, %v2535_v20 }
 0x3b0   : > { %p3787_p5 = por %p3786_p0, %p3785_p11 }
 0x3b2   : > { %v2533_v53 = vpop.permute.xlu0 %2532  ;;  %v2556_v22 = vpop.permute.xlu1 %2555  ;;  %p3788_p8 = pnand %p3787_p5, %p3781_p13 }
 0x3b3   : > { %v2689_v30 = vsel %vm2687_vm12, %v2672_v63, %v2533_v53  ;;  %v2708_v25 = vsel %vm2704_vm13, %v2691_v12, %v2556_v22 }
 0x3b6   : > { %v2554_v34 = vpop.permute.xlu0 %2553  ;;  %v2587_v13 = vpop.permute.xlu1 %2586 }
 0x3b7   : > { %v2706_v50 = vsel %vm2704_vm13, %v2689_v30, %v2554_v34  ;;  %v2725_v7 = vsel %vm2721_vm15, %v2708_v25, %v2587_v13 }
 0x3ba   : > { %v2585_v52 = vpop.permute.xlu0 %2584  ;;  %v2425_v3 = vpop.permute.xlu1 %2424 }
 0x3bb   : > { %v2723_v54 = vsel %vm2721_vm15, %v2706_v50, %v2585_v52  ;;  %v2625_v43 = vsel %vm2619_vm6, %v5169_v21, %v2425_v3 }
 0x3be   : > { %v2604_v46 = vpop.permute.xlu0 %2603  ;;  %v2427_v55 = vpop.permute.xlu1 %2426 }
 0x3bf   : > { %v2740_v49 = vsel %vm2738_vm14, %v2723_v54, %v2604_v46  ;;  %v2627_v29 = vsel %vm2619_vm6, %v5196_v42, %v2427_v55 }
 0x3c0   : > { %3379 = vmatprep.mubr.msk.bf16.mxu0 %vm2798_vm0, %v2740_v49 }
 0x3c2   : > { %v2606_v27 = vpop.permute.xlu0 %2605  ;;  %v2468_v11 = vpop.permute.xlu1 %2467 }
 0x3c3   : > { %v2742_v33 = vsel %vm2738_vm14, %v2725_v7, %v2606_v27  ;;  %v2644_v39 = vsel %vm2636_vm8, %v2627_v29, %v2468_v11 }
 0x3c4   : > { %3380 = vmatmul.mubr.msk.bf16.vlgmr.msra.gmra.mrb[0].mxu0 %vm2798_vm0, %v2742_v33 }
 0x3c6   : > { %v2466_v19 = vpop.permute.xlu0 %2465  ;;  %v2489_v58 = vpop.permute.xlu1 %2488 }
 0x3c7   : > { %v2642_v44 = vsel %vm2636_vm8, %v2625_v43, %v2466_v19  ;;  %v2661_v28 = vsel %vm2653_vm10, %v2644_v39, %v2489_v58 }
 0x3ca   : > { %v2487_v51 = vpop.permute.xlu0 %2486  ;;  %v2520_v60 = vpop.permute.xlu1 %2519 }
 0x3cb   : > { %v2659_v17 = vsel %vm2653_vm10, %v2642_v44, %v2487_v51  ;;  %v2678_v42 = vsel %vm2670_vm11, %v2661_v28, %v2520_v60 }
 0x3ce   : > { %v2518_v2 = vpop.permute.xlu0 %2517  ;;  %v2539_v32 = vpop.permute.xlu1 %2538 }
 0x3cf   : > { %v2676_v47 = vsel %vm2670_vm11, %v2659_v17, %v2518_v2  ;;  %v2695_v45 = vsel %vm2687_vm12, %v2678_v42, %v2539_v32 }
 0x3d2   : > { %v2537_v36 = vpop.permute.xlu0 %2536  ;;  %v2560_v4 = vpop.permute.xlu1 %2559 }
 0x3d3   : > { %v2693_v1 = vsel %vm2687_vm12, %v2676_v47, %v2537_v36  ;;  %v2712_v14 = vsel %vm2704_vm13, %v2695_v45, %v2560_v4 }
 0x3d6   : > { %v2558_v48 = vpop.permute.xlu0 %2557  ;;  %v2591_v38 = vpop.permute.xlu1 %2590 }
 0x3d7   : > { %v2710_v26 = vsel %vm2704_vm13, %v2693_v1, %v2558_v48  ;;  %v2729_v37 = vsel %vm2721_vm15, %v2712_v14, %v2591_v38 }
 0x3da   : > { %v2589_v23 = vpop.permute.xlu0 %2588  ;;  %v2429_v35 = vpop.permute.xlu1 %2428 }
 0x3db   : > { %v2727_v21 = vsel %vm2721_vm15, %v2710_v26, %v2589_v23  ;;  %v2629_v5 = vsel %vm2619_vm6, %v5268_v62, %v2429_v35 }
 0x3de   : > { %v2608_v6 = vpop.permute.xlu0 %2607  ;;  %v2431_v24 = vpop.permute.xlu1 %2430 }
 0x3df   : > { %v2744_v9 = vsel %vm2738_vm14, %v2727_v21, %v2608_v6  ;;  %v2631_v52 = vsel %vm2619_vm6, %v5303_v0, %v2431_v24 }
 0x3e0   : > { %3383 = vmatprep.mubr.msk.bf16.mxu0 %vm2798_vm0, %v2744_v9 }
 0x3e2   : > { %v2610_v15 = vpop.permute.xlu0 %2609  ;;  %v2472_v56 = vpop.permute.xlu1 %2471 }
 0x3e3   : > { %v2746_v41 = vsel %vm2738_vm14, %v2729_v37, %v2610_v15  ;;  %v2648_v54 = vsel %vm2636_vm8, %v2631_v52, %v2472_v56  ;;  %v5471_v15 = vld [vmem:[#allocation11] ss:$0 sm:$0xff] }
 0x3e4   : > { %3384 = vmatmul.mubr.msk.bf16.gmra.mrb[4].mxu0 %vm2798_vm0, %v2746_v41 }
 0x3e6   : > { %v2470_v10 = vpop.permute.xlu0 %2469  ;;  %v2493_v20 = vpop.permute.xlu1 %2492 }
 0x3e7   : > { %v2646_v8 = vsel %vm2636_vm8, %v2629_v5, %v2470_v10  ;;  %v2665_v55 = vsel %vm2653_vm10, %v2648_v54, %v2493_v20 }
 0x3ea   : > { %v2491_v53 = vpop.permute.xlu0 %2490  ;;  %v2524_v22 = vpop.permute.xlu1 %2523 }
 0x3eb   : > { %v2663_v3 = vsel %vm2653_vm10, %v2646_v8, %v2491_v53  ;;  %v2682_v0 = vsel %vm2670_vm11, %v2665_v55, %v2524_v22 }
 0x3ee   : > { %v2522_v31 = vpop.permute.xlu0 %2521  ;;  %v2543_v40 = vpop.permute.xlu1 %2542 }
 0x3ef   : > { %v2680_v18 = vsel %vm2670_vm11, %v2663_v3, %v2522_v31  ;;  %v2699_v7 = vsel %vm2687_vm12, %v2682_v0, %v2543_v40 }
 0x3f2   : > { %v2541_v34 = vpop.permute.xlu0 %2540  ;;  %v2564_v13 = vpop.permute.xlu1 %2563 }
 0x3f3   : > { %v2697_v50 = vsel %vm2687_vm12, %v2680_v18, %v2541_v34  ;;  %v2716_v27 = vsel %vm2704_vm13, %v2699_v7, %v2564_v13 }
 0x3f6   : > { %v2562_v61 = vpop.permute.xlu0 %2561  ;;  %v2595_v16 = vpop.permute.xlu1 %2594 }
 0x3f7   : > { %v2714_v46 = vsel %vm2704_vm13, %v2697_v50, %v2562_v61  ;;  %v2733_v11 = vsel %vm2721_vm15, %v2716_v27, %v2595_v16 }
 0x3fa   : > { %v2593_v63 = vpop.permute.xlu0 %2592  ;;  %v2433_v30 = vpop.permute.xlu1 %2432 }
 0x3fb   : > { %v2731_v62 = vsel %vm2721_vm15, %v2714_v46, %v2593_v63  ;;  %v2633_v17 = vsel %vm2619_vm6, %v5219_v57, %v2433_v30 }
 0x3fe   : > { %v2612_v49 = vpop.permute.xlu0 %2611  ;;  %v2435_v12 = vpop.permute.xlu1 %2434 }
 0x3ff   : > { %v2748_v25 = vsel %vm2738_vm14, %v2731_v62, %v2612_v49  ;;  %v2635_v44 = vsel %vm2619_vm6, %v5222_v59, %v2435_v12 }
 0x400   : > { %3387 = vmatprep.mubr.msk.bf16.mxu1 %vm2798_vm0, %v2748_v25 }
 0x402   : > { %v2614_v33 = vpop.permute.xlu0 %2613  ;;  %v2476_v19 = vpop.permute.xlu1 %2475 }
 0x403   : > { %v2750_v58 = vsel %vm2738_vm14, %v2733_v11, %v2614_v33  ;;  %v2652_v35 = vsel %vm2636_vm8, %v2635_v44, %v2476_v19 }
 0x404   : > { %3388 = vmatmul.mubr.msk.bf16.vlgmr.msra.gmra.mrb[0].mxu1 %vm2798_vm0, %v2750_v58 }
 0x406   : > { %v2474_v51 = vpop.permute.xlu0 %2473  ;;  %v2497_v60 = vpop.permute.xlu1 %2496 }
 0x407   : > { %v2650_v23 = vsel %vm2636_vm8, %v2633_v17, %v2474_v51  ;;  %v2669_v39 = vsel %vm2653_vm10, %v2652_v35, %v2497_v60 }
 0x40a   : > { %v2495_v2 = vpop.permute.xlu0 %2494  ;;  %v2528_v32 = vpop.permute.xlu1 %2527 }
 0x40b   : > { %v2667_v47 = vsel %vm2653_vm10, %v2650_v23, %v2495_v2  ;;  %v2686_v28 = vsel %vm2670_vm11, %v2669_v39, %v2528_v32 }
 0x40e   : > { %v2526_v36 = vpop.permute.xlu0 %2525  ;;  %v2547_v4 = vpop.permute.xlu1 %2546 }
 0x40f   : > { %v2684_v26 = vsel %vm2670_vm11, %v2667_v47, %v2526_v36  ;;  %v2703_v59 = vsel %vm2687_vm12, %v2686_v28, %v2547_v4 }
 0x412   : > { %v2545_v48 = vpop.permute.xlu0 %2544  ;;  %v2568_v38 = vpop.permute.xlu1 %2567 }
 0x413   : > { %v2701_v21 = vsel %vm2687_vm12, %v2684_v26, %v2545_v48  ;;  %v2720_v24 = vsel %vm2704_vm13, %v2703_v59, %v2568_v38 }
 0x416   : > { %v2566_v43 = vpop.permute.xlu0 %2565  ;;  %v2599_v29 = vpop.permute.xlu1 %2598 }
 0x417   : > { %v2718_v6 = vsel %vm2704_vm13, %v2701_v21, %v2566_v43  ;;  %v2737_v45 = vsel %vm2721_vm15, %v2720_v24, %v2599_v29 }
 0x41a   : > { %v2597_v1 = vpop.permute.xlu0 %2596  ;;  %v2618_v57 = vpop.permute.xlu1 %2617 }
 0x41b   : > { %v2735_v42 = vsel %vm2721_vm15, %v2718_v6, %v2597_v1  ;;  %v2754_v37 = vsel %vm2738_vm14, %v2737_v45, %v2618_v57 }
 0x41e   : > { %v2616_v9 = vpop.permute.xlu0 %2615 }
 0x41f   : > { %v2752_v14 = vsel %vm2738_vm14, %v2735_v42, %v2616_v9 }
 0x420   : > { %3391 = vmatprep.mubr.msk.bf16.mxu1 %vm2798_vm0, %v2752_v14 }
 0x421   : > { %3392 = vmatmul.mubr.msk.bf16.gmra.mrb[4].mxu1 %vm2798_vm0, %v2754_v37 }
 0x497   : > { %v3381_v56 = vpop.f32.mrb[0].mxu0 }
 0x498   : > { %v2853_v41 = vpop.f32.mrb[1].mxu0  ;;  %v2862_v40 = vadd.f32 %v3381_v56, %v5471_v15 }
 0x499   : > { %v2854_v10 = vadd.f32 %v5471_v15, %v2853_v41  ;;  %v3382_v20 = vpop.f32.mrb[2].mxu0 }
 0x49a   : > { %v2856_v53 = vpop.f32.mrb[3].mxu0  ;;  %v2934_v61 = vmul.f32 0.2, %v2862_v40  ;;  %v2865_v16 = vadd.f32 %v3382_v20, %v5471_v15  ;;  %vm2918_vm4 = vcmp.ge.f32.partialorder %v2862_v40, 0.0 }
 0x49b   : > { %v2857_v22 = vadd.f32 %v5471_v15, %v2856_v53  ;;  %vm2916_vm1 = vcmp.ge.f32.partialorder %v2854_v10, 0.0  ;;  %v2932_v31 = vmul.f32 0.2, %v2854_v10 }
 0x49c   : > { %v2935_v8 = vmul.f32 0.2, %v2865_v16  ;;  %v2950_v52 = vsel %vm2918_vm4, %v2862_v40, %v2934_v61  ;;  %vm2919_vm5 = vcmp.ge.f32.partialorder %v2865_v16, 0.0 }
 0x49d   : > { %v2933_v34 = vmul.f32 0.2, %v2857_v22  ;;  %v2948_v13 = vsel %vm2916_vm1, %v2854_v10, %v2932_v31  ;;  %vm2917_vm2 = vcmp.ge.f32.partialorder %v2857_v22, 0.0 }
 0x49e   : > { %2964 = vxpose.xlu0.b32.start [1/16] (narrow) %v2948_v13, 8  ;;  %v2951_v3 = vsel %vm2919_vm5, %v2865_v16, %v2935_v8 }
 0x49f   : > { %v2949_v5 = vsel %vm2917_vm2, %v2857_v22, %v2933_v34 }
 0x4a2   : > { %2965 = vxpose.xlu0.b32.cont [2/16] (narrow) %v2949_v5, 8 }
 0x4a6   : > { %2966 = vxpose.xlu0.b32.cont [3/16] (narrow) %v2950_v52, 8 }
 0x4aa   : > { %2967 = vxpose.xlu0.b32.cont [4/16] (narrow) %v2951_v3, 8 }
 0x4b7   : > { %v3385_v63 = vpop.f32.mrb[4].mxu0 }
 0x4b8   : > { %v2869_v30 = vpop.f32.mrb[5].mxu0  ;;  %v2878_v62 = vadd.f32 %v3385_v63, %v5471_v15 }
 0x4b9   : > { %v2870_v18 = vadd.f32 %v5471_v15, %v2869_v30  ;;  %v3386_v50 = vpop.f32.mrb[6].mxu0 }
 0x4ba   : > { %v2872_v54 = vpop.f32.mrb[7].mxu0  ;;  %v2938_v0 = vmul.f32 0.2, %v2878_v62  ;;  %v2881_v25 = vadd.f32 %v3386_v50, %v5471_v15  ;;  %vm2922_vm9 = vcmp.ge.f32.partialorder %v2878_v62, 0.0 }
 0x4bb   : > { %v2936_v46 = vmul.f32 0.2, %v2870_v18  ;;  %v2873_v55 = vadd.f32 %v5471_v15, %v2872_v54  ;;  %vm2920_vm3 = vcmp.ge.f32.partialorder %v2870_v18, 0.0 }
 0x4bc   : > { %v2939_v27 = vmul.f32 0.2, %v2881_v25  ;;  %v2954_v11 = vsel %vm2922_vm9, %v2878_v62, %v2938_v0  ;;  %vm2923_vm6 = vcmp.ge.f32.partialorder %v2881_v25, 0.0 }
 0x4bd   : > { %v2937_v49 = vmul.f32 0.2, %v2873_v55  ;;  %v2952_v12 = vsel %vm2920_vm3, %v2870_v18, %v2936_v46  ;;  %vm2921_vm7 = vcmp.ge.f32.partialorder %v2873_v55, 0.0 }
 0x4be   : > { %2968 = vxpose.xlu0.b32.cont [5/16] (narrow) %v2952_v12, 8  ;;  %v2955_v33 = vsel %vm2923_vm6, %v2881_v25, %v2939_v27 }
 0x4bf   : > { %v2953_v7 = vsel %vm2921_vm7, %v2873_v55, %v2937_v49 }
 0x4c2   : > { %2969 = vxpose.xlu0.b32.cont [6/16] (narrow) %v2953_v7, 8 }
 0x4c6   : > { %2970 = vxpose.xlu0.b32.cont [7/16] (narrow) %v2954_v11, 8 }
 0x4ca   : > { %2971 = vxpose.xlu0.b32.cont [8/16] (narrow) %v2955_v33, 8 }
 0x4d7   : > { %v3389_v19 = vpop.f32.mrb[0].mxu1 }
 0x4d8   : > { %v2885_v58 = vpop.f32.mrb[1].mxu1  ;;  %v2894_v4 = vadd.f32 %v3389_v19, %v5471_v15 }
 0x4d9   : > { %v2886_v51 = vadd.f32 %v5471_v15, %v2885_v58  ;;  %v3390_v60 = vpop.f32.mrb[2].mxu1 }
 0x4da   : > { %v2888_v2 = vpop.f32.mrb[3].mxu1  ;;  %v2942_v43 = vmul.f32 0.2, %v2894_v4  ;;  %v2897_v44 = vadd.f32 %v3390_v60, %v5471_v15  ;;  %vm2926_vm11 = vcmp.ge.f32.partialorder %v2894_v4, 0.0 }
 0x4db   : > { %v2940_v32 = vmul.f32 0.2, %v2886_v51  ;;  %v2889_v36 = vadd.f32 %v5471_v15, %v2888_v2  ;;  %vm2924_vm8 = vcmp.ge.f32.partialorder %v2886_v51, 0.0 }
 0x4dc   : > { %v2943_v17 = vmul.f32 0.2, %v2897_v44  ;;  %v2958_v23 = vsel %vm2926_vm11, %v2894_v4, %v2942_v43  ;;  %vm2927_vm12 = vcmp.ge.f32.partialorder %v2897_v44, 0.0 }
 0x4dd   : > { %v2941_v48 = vmul.f32 0.2, %v2889_v36  ;;  %v2956_v38 = vsel %vm2924_vm8, %v2886_v51, %v2940_v32  ;;  %vm2925_vm10 = vcmp.ge.f32.partialorder %v2889_v36, 0.0 }
 0x4de   : > { %2972 = vxpose.xlu0.b32.cont [9/16] (narrow) %v2956_v38, 8  ;;  %v2959_v35 = vsel %vm2927_vm12, %v2897_v44, %v2943_v17 }
 0x4df   : > { %v2957_v29 = vsel %vm2925_vm10, %v2889_v36, %v2941_v48 }
 0x4e2   : > { %2973 = vxpose.xlu0.b32.cont [10/16] (narrow) %v2957_v29, 8 }
 0x4e6   : > { %2974 = vxpose.xlu0.b32.cont [11/16] (narrow) %v2958_v23, 8 }
 0x4ea   : > { %2975 = vxpose.xlu0.b32.cont [12/16] (narrow) %v2959_v35, 8 }
 0x4f4   : > { %v3393_v47 = vpop.f32.mrb[4].mxu1 }
 0x4f5   : > { %v2901_v1 = vpop.f32.mrb[5].mxu1  ;;  %v2910_v6 = vadd.f32 %v3393_v47, %v5471_v15 }
 0x4f6   : > { %v2902_v39 = vadd.f32 %v5471_v15, %v2901_v1  ;;  %v3394_v26 = vpop.f32.mrb[6].mxu1 }
 0x4f7   : > { %v2904_v28 = vpop.f32.mrb[7].mxu1  ;;  %v2946_v42 = vmul.f32 0.2, %v2910_v6  ;;  %v2913_v9 = vadd.f32 %v3394_v26, %v5471_v15  ;;  %vm2930_vm15 = vcmp.ge.f32.partialorder %v2910_v6, 0.0 }
 0x4f8   : > { %v2944_v21 = vmul.f32 0.2, %v2902_v39  ;;  %v2905_v59 = vadd.f32 %v5471_v15, %v2904_v28  ;;  %vm2928_vm13 = vcmp.ge.f32.partialorder %v2902_v39, 0.0 }
 0x4f9   : > { %v2947_v14 = vmul.f32 0.2, %v2913_v9  ;;  %v2962_v37 = vsel %vm2930_vm15, %v2910_v6, %v2946_v42  ;;  %vm2931_vm0 = vcmp.ge.f32.partialorder %v2913_v9, 0.0 }
 0x4fa   : > { %v2945_v57 = vmul.f32 0.2, %v2905_v59  ;;  %v2960_v24 = vsel %vm2928_vm13, %v2902_v39, %v2944_v21  ;;  %vm2929_vm14 = vcmp.ge.f32.partialorder %v2905_v59, 0.0 }
 0x4fb   : > { %2976 = vxpose.xlu0.b32.cont [13/16] (narrow) %v2960_v24, 8  ;;  %v2963_v56 = vsel %vm2931_vm0, %v2913_v9, %v2947_v14 }
 0x4fc   : > { %v2961_v45 = vsel %vm2929_vm14, %v2905_v59, %v2945_v57 }
 0x4ff   : > { %2977 = vxpose.xlu0.b32.cont [14/16] (narrow) %v2961_v45, 8 }
 0x503   : > { %2978 = vxpose.xlu0.b32.cont [15/16] (narrow) %v2962_v37, 8 }
 0x507   : > { %2979 = vxpose.xlu0.b32.end [16/16] (narrow) %v2963_v56, 8 }
 0x54b   : > { %v2980_v15 = vpop.trf.xlu0 }
 0x54c   : > { %2996 = vst [vmem:[%s310_s7] sm:$0xff] %v2980_v15 }
 0x54d   : > { %3791 = shalt.err (!%p3788_p8)
}
 0x54e   : > { %s3792_s2 = scalar_lea.hbm %s5496_s24, 128  ;;  %s3796_s9 = scalar_lea.hbm %s5611_s6, 512 }
 0x54f   : > { %p3793_p12 = scmp.ne.s32.totalorder %s5496_s24, %s3792_s2  ;;  %p3797_p9 = scmp.lt.u32.totalorder %s5496_s24, %s5611_s6 }
 0x550   : > { %p3798_p1 = scmp.lt.u32.totalorder %s3796_s9, %s3792_s2  ;;  %p3800_p4 = scmp.lt.u32.totalorder %s3792_s2, %s5496_s24 }
 0x551   : > { %p3794_p2 = pnand %p3793_p12, %p5612_p6 }
 0x552   : > { %p3799_p3 = por %p3798_p1, %p3797_p9 }
 0x553   : > { %p3795_p7 = pneg %p3794_p2 }
 0x554   : > { %p3801_p10 = por %p3800_p4, %p3799_p3 }
 0x556   : > { %p3802_p13 = pnand %p3801_p10, %p3795_p7 }
 0x558   : > { %3805 = shalt.err (!%p3802_p13)
}
 0x559   : > { %3433 = dma.vmem_to_hbm [thread:$0]  (%p5612_p6), %s5498_s16, 128, %s5496_s24, %s2998_s25  }
 0x55a PF: > { %s5613_s12 = sld [smem:[#allocation17_spill]]  ;;  %s5614_s17 = sld [smem:[#allocation21_spill]] }
 0x55b   : > { %p3465_p11 = scmp.ge.s32.totalorder %s3908_s28, 2 }
 0x560   : > { %s3025_s30 = sand.u32 1, %s5613_s12   ;;  %p5615_p0 = scmp.ne.s32.totalorder %s5614_s17, 0 }
 0x561   : > { %s3026_s29 = scalar_lea.sflag [#allocation5], %s3025_s30 }
 0x562   : > { %p3453_p5 = pnand %p3465_p11, %p5615_p0 }
 0x564   : > { %3863 = dma.done.wait (!%p3453_p5), %s3026_s29, 128  }
 0x565   : > { %3865 = vsyncadd (!%p3453_p5), %s3026_s29, 4294967168  ;;  %s23_s28 = sadd.s32 1, %s3908_s28   ;;  %s5616_s18 = smov %s3872_s19 }
 0x566   : > { %p20_p8 = scmp.ge.s32.totalorder %s23_s28, 6   ;;  %s5617_s19 = smov %s3876_s20 }
 0x567   : > { %s5618_s20 = smov %s4174_s8  ;;  %s5619_s21 = smov %s3884_s22 }
 0x568   : > { %s5620_s22 = smov %s3888_s23  ;;  %s5621_s23 = smov %s4171_s15 }
 0x569   : > { %s5622_s24 = smov %s3900_s26  ;;  %s5623_s25 = smov %s3904_s27 }
 0x56a   : > { %s5624_s26 = smov %s5627_s11  ;;  %s5625_s27 = smov %s5631_s13 }
 0x56b   :  { %22 = sbr.rel (!%p20_p8) target bundleno = 15 (0xf), region = 106 }
 0x572   :  { %3031 = vsyncpa [#allocation4], 1 }
 0x573   :  { %3033 = vsyncpa [#allocation4 + $0x1], 1 }
 0x574   :  { %3034 = vsyncpa [#allocation7], 1 }
 0x575   :  { %3035 = vsyncpa [#allocation10], 1 }
 0x576   :  { %3036 = vsyncpa [#allocation5], 1 }
 0x577   :  { %3038 = vsyncpa [#allocation5 + $0x1], 1 }

</bundles_post_ra>
